<compile_context>
chip_gen: v5e
topology: v5e:2x2
jax: 0.10.0
libtpu: 0.0.40
codegen_flags: <defaults>
</compile_context>

<pallas_src>
import functools
import math

import jax
import jax.numpy as jnp
import numpy as np
from jax.experimental import pallas as pl
from jax.experimental.pallas import tpu as pltpu


# ----------------------------- Pallas kernel ------------------------------ #
def _drnn_fused_kernel(x_ref, wih_ref, whh_ref, bfold_ref, bhhn_ref,
                       y_ref, gi_ref, *, t_ds, B, H):
    """All dilated GRU layers fused into one kernel invocation.

    x_ref    : (L, T*B, I)    dilated, zero-padded inputs (time*batch flattened)
    wih_ref  : (L, I, 3*HP)   input weights, gate-padded to 128-lane stride
    whh_ref  : (L, H, 3*HP)   recurrent weights, gate-padded
    bfold_ref: (L, 1, 3*HP)   b_ih (+ b_hh for the r,z gates folded in)
    bhhn_ref : (L, 1, H)      b_hh of the n gate (must stay inside r*(...))
    y_ref    : (L, T*B, H)    per-step hidden outputs
    gi_ref   : (L, T*B, 3*HP) VMEM scratch for the hoisted input projection
    """
    L = x_ref.shape[0]
    GP = wih_ref.shape[-1]
    HP = GP // 3                       # lane-aligned gate stride (multiple of 128)

    # Zero the padded / never-written region of the output once (discarded by
    # the wrapper, but keep it deterministic).
    y_ref[...] = jnp.zeros_like(y_ref)

    # ---- stage 1: input projection (no h-dependence) -> bulk MXU matmuls ----
    for l in range(L):
        gi_ref[l] = (jnp.dot(x_ref[l], wih_ref[l],
                             preferred_element_type=jnp.float32)
                     + bfold_ref[l])

    # ---- stage 2: serial recurrences; the L independent layer chains are ----
    # interleaved per timestep so their MXU/EUP latencies overlap.
    whh = [whh_ref[l] for l in range(L)]                       # resident weights
    bhh_n = [jnp.broadcast_to(bhhn_ref[l], (B, H)) for l in range(L)]  # hoisted
    h = [jnp.zeros((B, H), jnp.float32) for _ in range(L)]

    # T is tiny & static here -> fully unrolled.
    # TODO(synk): for long sequences switch to lax.fori_loop(unroll=4..8) with
    # time-chunked BlockSpecs (gi/y) so VMEM stays bounded on v7x.
    for t in range(max(t_ds)):
        for l in range(L):
            if t >= t_ds[l]:           # dead (cross-layer padding) timestep
                continue
            gi = gi_ref[l, t * B:(t + 1) * B]                        # (B, 3*HP)
            gh = jnp.dot(h[l], whh[l],
                         preferred_element_type=jnp.float32)         # (B, 3*HP)
            # PyTorch GRU gate order r, z, n; slices start at lane 0/HP/2HP.
            r = jax.nn.sigmoid(gi[:, 0:H] + gh[:, 0:H])
            z = jax.nn.sigmoid(gi[:, HP:HP + H] + gh[:, HP:HP + H])
            n = jnp.tanh(gi[:, 2 * HP:2 * HP + H]
                         + r * (gh[:, 2 * HP:2 * HP + H] + bhh_n[l]))
            h[l] = (1.0 - z) * n + z * h[l]
            y_ref[l, t * B:(t + 1) * B] = h[l]


# ------------------------------ DRNN forward ------------------------------ #
def drnn_forward(inputs, params, n_hidden, dilations):
    """inputs: (seq, batch, n_input).  Returns (result, hidden_states)."""
    # TODO(synk): lengths / pack_padded_sequence path and RNN/LSTM/QRNN cell
    # types are not implemented (this reproduces lengths=None, hidden=None, GRU).
    seq, batch, n_input = inputs.shape
    L = len(dilations)
    H = n_hidden
    HP = ((H + 127) // 128) * 128          # gate stride, padded to 128 lanes
    GP = 3 * HP
    t_ds = tuple(-(-seq // r) for r in dilations)        # ceil(seq / rate)
    T_max = max(t_ds)
    B_max = max(batch * r for r in dilations)
    TB = T_max * B_max

    # ---- per-layer dilated + padded input slabs (plain-JAX glue) -----------
    x_slabs = []
    for r, t_d in zip(dilations, t_ds):
        pad_t = t_d * r - seq
        x = inputs
        if pad_t > 0:                                    # _pad_inputs
            x = jnp.concatenate(
                [x, jnp.zeros((pad_t, batch, n_input), x.dtype)], axis=0)
        # _prepare_inputs: cat([x[j::r]], dim=1) == pure reshape of padded x
        xd = x.reshape(t_d, r * batch, n_input)
        # pad to the common (T_max, B_max) slab; padded rows/steps discarded
        # after the kernel (they never feed back into real steps).
        xd = jnp.pad(xd, ((0, T_max - t_d), (0, B_max - r * batch), (0, 0)))
        x_slabs.append(xd.reshape(TB, n_input))
    x_all = jnp.stack(x_slabs)                           # (L, TB, I)

    # ---- gate-padded parameter packing (gates at lane offsets 0/HP/2HP) ----
    def pad_gates(w):                                    # (..., 3H) -> (..., GP)
        w3 = w.reshape(w.shape[:-1] + (3, H))
        w3 = jnp.pad(w3, [(0, 0)] * (w.ndim - 1) + [(0, 0), (0, HP - H)])
        return w3.reshape(w.shape[:-1] + (GP,))

    wih_all = jnp.stack([pad_gates(p[0]) for p in params])       # (L, I, GP)
    whh_all = jnp.stack([pad_gates(p[1]) for p in params])       # (L, H, GP)
    # fold b_ih (all gates) + b_hh (r,z gates ONLY) into the projection bias
    bfold_all = jnp.stack([
        pad_gates(p[2] + jnp.concatenate(
            [p[3][:, :2 * H], jnp.zeros((1, H), p[3].dtype)], axis=1))
        for p in params])                                         # (L, 1, GP)
    bhhn_all = jnp.stack([p[3][:, 2 * H:] for p in params])       # (L, 1, H)

    # ---- one fused pallas_call: projection + all layer recurrences ---------
    kernel = functools.partial(_drnn_fused_kernel, t_ds=t_ds, B=B_max, H=H)
    y_all = pl.pallas_call(
        kernel,
        out_shape=jax.ShapeDtypeStruct((L, TB, H), jnp.float32),
        grid_spec=pltpu.PrefetchScalarGridSpec(
            num_scalar_prefetch=0,
            grid=(1,),
            in_specs=[
                pl.BlockSpec((L, TB, n_input), lambda i: (0, 0, 0)),
                pl.BlockSpec((L, n_input, GP), lambda i: (0, 0, 0)),
                pl.BlockSpec((L, H, GP), lambda i: (0, 0, 0)),
                pl.BlockSpec((L, 1, GP), lambda i: (0, 0, 0)),
                pl.BlockSpec((L, 1, H), lambda i: (0, 0, 0)),
            ],
            out_specs=pl.BlockSpec((L, TB, H), lambda i: (0, 0, 0)),
            scratch_shapes=[pltpu.VMEM((L, TB, GP), jnp.float32)],
        ),
        compiler_params=pltpu.CompilerParams(
            dimension_semantics=("arbitrary",)),
    )(x_all, wih_all, whh_all, bfold_all, bhhn_all)

    # ---- un-dilate, truncate, sum; collect final hidden states -------------
    y4 = y_all.reshape(L, T_max, B_max, H)
    result = jnp.zeros((seq, batch, H), jnp.float32)
    hidden_states = []
    for i, (r, t_d) in enumerate(zip(dilations, t_ds)):
        b_eff = batch * r
        y = y4[i, :t_d, :b_eff]                          # (t_d, r*batch, H)
        result = result + y.reshape(t_d * r, batch, H)[:seq]   # _split + _unpad
        # final hidden state == output at the last dilated step
        hidden_states.append(y4[i, t_d - 1, :b_eff][None])     # (1, r*batch, H)
    return result, hidden_states


# ------------------------- pure-JAX reference GRU -------------------------- #
_PREC = jax.lax.Precision.HIGHEST


def _gru_ref(x, w_ih_t, w_hh_t, b_ih, b_hh):
    H = w_hh_t.shape[0]

    def step(h, xt):
        gi = jnp.dot(xt, w_ih_t, precision=_PREC) + b_ih
        gh = jnp.dot(h, w_hh_t, precision=_PREC) + b_hh
        r = jax.nn.sigmoid(gi[:, :H] + gh[:, :H])
        z = jax.nn.sigmoid(gi[:, H:2 * H] + gh[:, H:2 * H])
        n = jnp.tanh(gi[:, 2 * H:] + r * gh[:, 2 * H:])
        h_new = (1.0 - z) * n + z * h
        return h_new, h_new

    h0 = jnp.zeros((x.shape[1], H), jnp.float32)
    h_last, ys = jax.lax.scan(step, h0, x)
    return ys, h_last


def drnn_forward_ref(inputs, params, n_hidden, dilations):
    seq, batch, n_input = inputs.shape
    result = jnp.zeros((seq, batch, n_hidden), jnp.float32)
    hiddens = []
    for (w_ih_t, w_hh_t, b_ih, b_hh), rate in zip(params, dilations):
        dilated_steps = -(-seq // rate)
        pad = dilated_steps * rate - seq
        x = inputs
        if pad > 0:
            x = jnp.concatenate(
                [x, jnp.zeros((pad, batch, n_input), x.dtype)], axis=0)
        # faithful PyTorch-style strided shuffle (validates the reshape trick)
        dilated = jnp.concatenate([x[j::rate] for j in range(rate)], axis=1)
        y_dil, h_last = _gru_ref(dilated, w_ih_t, w_hh_t, b_ih, b_hh)
        out = y_dil.reshape(dilated_steps, rate, batch, n_hidden).reshape(
            dilated_steps * rate, batch, n_hidden)[:seq]
        result = result + out
        hiddens.append(h_last[None])
    return result, hiddens


# ---------------------------------- main ----------------------------------- #
if __name__ == "__main__":
    # DRNN(n_input=16, n_hidden=32, n_layers=3, cell_type='GRU')
    n_input, n_hidden, n_layers = 16, 32, 3
    seq, batch = 8, 2
    dilations = [2 ** i for i in range(n_layers)]

    key = jax.random.PRNGKey(0)
    k_in, key = jax.random.split(key)
    inputs = jax.random.normal(k_in, (seq, batch, n_input), jnp.float32)

    # Deterministic GRU parameter init (PyTorch: U(-1/sqrt(H), 1/sqrt(H))).
    k = 1.0 / math.sqrt(n_hidden)
    params = []
    for _ in range(n_layers):
        key, k1, k2, k3, k4 = jax.random.split(key, 5)
        # stored pre-transposed: (I, 3H) and (H, 3H), gate order r|z|n
        w_ih_t = jax.random.uniform(k1, (n_input, 3 * n_hidden), jnp.float32, -k, k)
        w_hh_t = jax.random.uniform(k2, (n_hidden, 3 * n_hidden), jnp.float32, -k, k)
        b_ih = jax.random.uniform(k3, (1, 3 * n_hidden), jnp.float32, -k, k)
        b_hh = jax.random.uniform(k4, (1, 3 * n_hidden), jnp.float32, -k, k)
        params.append((w_ih_t, w_hh_t, b_ih, b_hh))

    fwd = jax.jit(functools.partial(drnn_forward, n_hidden=n_hidden,
                                    dilations=tuple(dilations)))
    result, hidden_states = fwd(inputs, params)
    result = jax.block_until_ready(result)
    hidden_states = [jax.block_until_ready(h) for h in hidden_states]

    # Sanity check against a pure-JAX reference.
    ref_result, ref_hiddens = drnn_forward_ref(inputs, params, n_hidden, dilations)
    ref_result = jax.block_until_ready(ref_result)

    assert result.shape == (seq, batch, n_hidden)
    assert [h.shape for h in hidden_states] == \
        [(1, batch * r, n_hidden) for r in dilations]
    np.testing.assert_allclose(np.asarray(result), np.asarray(ref_result),
                               rtol=1e-4, atol=1e-4)
    for h, hr in zip(hidden_states, ref_hiddens):
        np.testing.assert_allclose(np.asarray(h), np.asarray(hr),
                                   rtol=1e-4, atol=1e-4)

    print("KERNEL_OK")
</pallas_src>

<mosaic_0001>
module attributes {stable_mosaic.version = 11 : i64} {
  func.func @_drnn_fused_kernel(%arg0: i32, %arg1: memref<3x64x16xf32, #tpu.memory_space<vmem>>, %arg2: memref<3x16x384xf32, #tpu.memory_space<vmem>>, %arg3: memref<3x32x384xf32, #tpu.memory_space<vmem>>, %arg4: memref<3x1x384xf32, #tpu.memory_space<vmem>>, %arg5: memref<3x1x32xf32, #tpu.memory_space<vmem>>, %arg6: memref<3x64x32xf32, #tpu.memory_space<vmem>>, %arg7: memref<3x64x384xf32, #tpu.memory_space<vmem>>) attributes {dimension_semantics = [#tpu.dimension_semantics<arbitrary>], iteration_bounds = array<i64: 1>, scalar_prefetch = 0 : i64, scratch_operands = 1 : i64, tpu.core_type = #tpu.core_type<tc>, window_params = [{pipeline_mode = #tpu.pipeline_mode<synchronous>, transform_indices = @transform_0, window_bounds = array<i64: 3, 64, 16>}, {pipeline_mode = #tpu.pipeline_mode<synchronous>, transform_indices = @transform_1, window_bounds = array<i64: 3, 16, 384>}, {pipeline_mode = #tpu.pipeline_mode<synchronous>, transform_indices = @transform_2, window_bounds = array<i64: 3, 32, 384>}, {pipeline_mode = #tpu.pipeline_mode<synchronous>, transform_indices = @transform_3, window_bounds = array<i64: 3, 1, 384>}, {pipeline_mode = #tpu.pipeline_mode<synchronous>, transform_indices = @transform_4, window_bounds = array<i64: 3, 1, 32>}, {pipeline_mode = #tpu.pipeline_mode<synchronous>, transform_indices = @transform_5, window_bounds = array<i64: 3, 64, 32>}]} {
    %cst = arith.constant 0.000000e+00 : f32
    %0 = vector.broadcast %cst : f32 to vector<3x64x32xf32>
    %c0 = arith.constant 0 : index
    %c0_0 = arith.constant 0 : index
    %c0_1 = arith.constant 0 : index
    %1 = vector.load %arg6[%c0, %c0_0, %c0_1] : memref<3x64x32xf32, #tpu.memory_space<vmem>>, vector<3x64x32xf32>
    tpu.vector_store %arg6[%c0, %c0_0, %c0_1], %0 {strides = array<i32>} : memref<3x64x32xf32, #tpu.memory_space<vmem>>, vector<3x64x32xf32>,
    %c0_2 = arith.constant 0 : index
    %c0_3 = arith.constant 0 : index
    %c0_4 = arith.constant 0 : index
    %2 = vector.load %arg1[%c0_2, %c0_3, %c0_4] : memref<3x64x16xf32, #tpu.memory_space<vmem>>, vector<1x64x16xf32>
    %3 = vector.shape_cast %2 : vector<1x64x16xf32> to vector<64x16xf32>
    %c0_5 = arith.constant 0 : index
    %c0_6 = arith.constant 0 : index
    %c0_7 = arith.constant 0 : index
    %4 = vector.load %arg2[%c0_5, %c0_6, %c0_7] : memref<3x16x384xf32, #tpu.memory_space<vmem>>, vector<1x16x384xf32>
    %5 = vector.shape_cast %4 : vector<1x16x384xf32> to vector<16x384xf32>
    %cst_8 = arith.constant dense<0.000000e+00> : vector<64x384xf32>
    %6 = tpu.matmul %3, %5, %cst_8 {dimension_numbers = #tpu.dot_dimension_numbers<[1], [0], [0], [1], [0, 0, 1, 1], [], []>} : vector<64x16xf32>, vector<16x384xf32>, vector<64x384xf32> -> vector<64x384xf32>
    %c0_9 = arith.constant 0 : index
    %c0_10 = arith.constant 0 : index
    %c0_11 = arith.constant 0 : index
    %7 = vector.load %arg4[%c0_9, %c0_10, %c0_11] : memref<3x1x384xf32, #tpu.memory_space<vmem>>, vector<1x1x384xf32>
    %8 = vector.shape_cast %7 : vector<1x1x384xf32> to vector<1x384xf32>
    %9 = vector.broadcast %8 : vector<1x384xf32> to vector<64x384xf32>
    %10 = arith.addf %6, %9 : vector<64x384xf32>
    %c0_12 = arith.constant 0 : index
    %c0_13 = arith.constant 0 : index
    %c0_14 = arith.constant 0 : index
    %11 = vector.load %arg7[%c0_12, %c0_13, %c0_14] : memref<3x64x384xf32, #tpu.memory_space<vmem>>, vector<1x64x384xf32>
    %12 = vector.shape_cast %11 : vector<1x64x384xf32> to vector<64x384xf32>
    %13 = vector.shape_cast %10 : vector<64x384xf32> to vector<1x64x384xf32>
    tpu.vector_store %arg7[%c0_12, %c0_13, %c0_14], %13 {strides = array<i32>} : memref<3x64x384xf32, #tpu.memory_space<vmem>>, vector<1x64x384xf32>,
    %c1 = arith.constant 1 : index
    %c0_15 = arith.constant 0 : index
    %c0_16 = arith.constant 0 : index
    %14 = vector.load %arg1[%c1, %c0_15, %c0_16] : memref<3x64x16xf32, #tpu.memory_space<vmem>>, vector<1x64x16xf32>
    %15 = vector.shape_cast %14 : vector<1x64x16xf32> to vector<64x16xf32>
    %c1_17 = arith.constant 1 : index
    %c0_18 = arith.constant 0 : index
    %c0_19 = arith.constant 0 : index
    %16 = vector.load %arg2[%c1_17, %c0_18, %c0_19] : memref<3x16x384xf32, #tpu.memory_space<vmem>>, vector<1x16x384xf32>
    %17 = vector.shape_cast %16 : vector<1x16x384xf32> to vector<16x384xf32>
    %cst_20 = arith.constant dense<0.000000e+00> : vector<64x384xf32>
    %18 = tpu.matmul %15, %17, %cst_20 {dimension_numbers = #tpu.dot_dimension_numbers<[1], [0], [0], [1], [0, 0, 1, 1], [], []>} : vector<64x16xf32>, vector<16x384xf32>, vector<64x384xf32> -> vector<64x384xf32>
    %c1_21 = arith.constant 1 : index
    %c0_22 = arith.constant 0 : index
    %c0_23 = arith.constant 0 : index
    %19 = vector.load %arg4[%c1_21, %c0_22, %c0_23] : memref<3x1x384xf32, #tpu.memory_space<vmem>>, vector<1x1x384xf32>
    %20 = vector.shape_cast %19 : vector<1x1x384xf32> to vector<1x384xf32>
    %21 = vector.broadcast %20 : vector<1x384xf32> to vector<64x384xf32>
    %22 = arith.addf %18, %21 : vector<64x384xf32>
    %c1_24 = arith.constant 1 : index
    %c0_25 = arith.constant 0 : index
    %c0_26 = arith.constant 0 : index
    %23 = vector.load %arg7[%c1_24, %c0_25, %c0_26] : memref<3x64x384xf32, #tpu.memory_space<vmem>>, vector<1x64x384xf32>
    %24 = vector.shape_cast %23 : vector<1x64x384xf32> to vector<64x384xf32>
    %25 = vector.shape_cast %22 : vector<64x384xf32> to vector<1x64x384xf32>
    tpu.vector_store %arg7[%c1_24, %c0_25, %c0_26], %25 {strides = array<i32>} : memref<3x64x384xf32, #tpu.memory_space<vmem>>, vector<1x64x384xf32>,
    %c2 = arith.constant 2 : index
    %c0_27 = arith.constant 0 : index
    %c0_28 = arith.constant 0 : index
    %26 = vector.load %arg1[%c2, %c0_27, %c0_28] : memref<3x64x16xf32, #tpu.memory_space<vmem>>, vector<1x64x16xf32>
    %27 = vector.shape_cast %26 : vector<1x64x16xf32> to vector<64x16xf32>
    %c2_29 = arith.constant 2 : index
    %c0_30 = arith.constant 0 : index
    %c0_31 = arith.constant 0 : index
    %28 = vector.load %arg2[%c2_29, %c0_30, %c0_31] : memref<3x16x384xf32, #tpu.memory_space<vmem>>, vector<1x16x384xf32>
    %29 = vector.shape_cast %28 : vector<1x16x384xf32> to vector<16x384xf32>
    %cst_32 = arith.constant dense<0.000000e+00> : vector<64x384xf32>
    %30 = tpu.matmul %27, %29, %cst_32 {dimension_numbers = #tpu.dot_dimension_numbers<[1], [0], [0], [1], [0, 0, 1, 1], [], []>} : vector<64x16xf32>, vector<16x384xf32>, vector<64x384xf32> -> vector<64x384xf32>
    %c2_33 = arith.constant 2 : index
    %c0_34 = arith.constant 0 : index
    %c0_35 = arith.constant 0 : index
    %31 = vector.load %arg4[%c2_33, %c0_34, %c0_35] : memref<3x1x384xf32, #tpu.memory_space<vmem>>, vector<1x1x384xf32>
    %32 = vector.shape_cast %31 : vector<1x1x384xf32> to vector<1x384xf32>
    %33 = vector.broadcast %32 : vector<1x384xf32> to vector<64x384xf32>
    %34 = arith.addf %30, %33 : vector<64x384xf32>
    %c2_36 = arith.constant 2 : index
    %c0_37 = arith.constant 0 : index
    %c0_38 = arith.constant 0 : index
    %35 = vector.load %arg7[%c2_36, %c0_37, %c0_38] : memref<3x64x384xf32, #tpu.memory_space<vmem>>, vector<1x64x384xf32>
    %36 = vector.shape_cast %35 : vector<1x64x384xf32> to vector<64x384xf32>
    %37 = vector.shape_cast %34 : vector<64x384xf32> to vector<1x64x384xf32>
    tpu.vector_store %arg7[%c2_36, %c0_37, %c0_38], %37 {strides = array<i32>} : memref<3x64x384xf32, #tpu.memory_space<vmem>>, vector<1x64x384xf32>,
    %c0_39 = arith.constant 0 : index
    %c0_40 = arith.constant 0 : index
    %c0_41 = arith.constant 0 : index
    %38 = vector.load %arg3[%c0_39, %c0_40, %c0_41] : memref<3x32x384xf32, #tpu.memory_space<vmem>>, vector<1x32x384xf32>
    %39 = vector.shape_cast %38 : vector<1x32x384xf32> to vector<32x384xf32>
    %c1_42 = arith.constant 1 : index
    %c0_43 = arith.constant 0 : index
    %c0_44 = arith.constant 0 : index
    %40 = vector.load %arg3[%c1_42, %c0_43, %c0_44] : memref<3x32x384xf32, #tpu.memory_space<vmem>>, vector<1x32x384xf32>
    %41 = vector.shape_cast %40 : vector<1x32x384xf32> to vector<32x384xf32>
    %c2_45 = arith.constant 2 : index
    %c0_46 = arith.constant 0 : index
    %c0_47 = arith.constant 0 : index
    %42 = vector.load %arg3[%c2_45, %c0_46, %c0_47] : memref<3x32x384xf32, #tpu.memory_space<vmem>>, vector<1x32x384xf32>
    %43 = vector.shape_cast %42 : vector<1x32x384xf32> to vector<32x384xf32>
    %c0_48 = arith.constant 0 : index
    %c0_49 = arith.constant 0 : index
    %c0_50 = arith.constant 0 : index
    %44 = vector.load %arg5[%c0_48, %c0_49, %c0_50] : memref<3x1x32xf32, #tpu.memory_space<vmem>>, vector<1x1x32xf32>
    %45 = vector.shape_cast %44 : vector<1x1x32xf32> to vector<1x32xf32>
    %46 = vector.shape_cast %45 : vector<1x32xf32> to vector<1x32xf32>
    %47 = vector.broadcast %46 : vector<1x32xf32> to vector<8x32xf32>
    %c1_51 = arith.constant 1 : index
    %c0_52 = arith.constant 0 : index
    %c0_53 = arith.constant 0 : index
    %48 = vector.load %arg5[%c1_51, %c0_52, %c0_53] : memref<3x1x32xf32, #tpu.memory_space<vmem>>, vector<1x1x32xf32>
    %49 = vector.shape_cast %48 : vector<1x1x32xf32> to vector<1x32xf32>
    %50 = vector.shape_cast %49 : vector<1x32xf32> to vector<1x32xf32>
    %51 = vector.broadcast %50 : vector<1x32xf32> to vector<8x32xf32>
    %c2_54 = arith.constant 2 : index
    %c0_55 = arith.constant 0 : index
    %c0_56 = arith.constant 0 : index
    %52 = vector.load %arg5[%c2_54, %c0_55, %c0_56] : memref<3x1x32xf32, #tpu.memory_space<vmem>>, vector<1x1x32xf32>
    %53 = vector.shape_cast %52 : vector<1x1x32xf32> to vector<1x32xf32>
    %54 = vector.shape_cast %53 : vector<1x32xf32> to vector<1x32xf32>
    %55 = vector.broadcast %54 : vector<1x32xf32> to vector<8x32xf32>
    %cst_57 = arith.constant 0.000000e+00 : f32
    %56 = vector.broadcast %cst_57 : f32 to vector<8x32xf32>
    %cst_58 = arith.constant 0.000000e+00 : f32
    %57 = vector.broadcast %cst_58 : f32 to vector<8x32xf32>
    %cst_59 = arith.constant 0.000000e+00 : f32
    %58 = vector.broadcast %cst_59 : f32 to vector<8x32xf32>
    %c0_60 = arith.constant 0 : index
    %c0_61 = arith.constant 0 : index
    %c0_62 = arith.constant 0 : index
    %59 = vector.load %arg7[%c0_60, %c0_61, %c0_62] : memref<3x64x384xf32, #tpu.memory_space<vmem>>, vector<1x8x384xf32>
    %60 = vector.shape_cast %59 : vector<1x8x384xf32> to vector<8x384xf32>
    %cst_63 = arith.constant dense<0.000000e+00> : vector<8x384xf32>
    %61 = tpu.matmul %56, %39, %cst_63 {dimension_numbers = #tpu.dot_dimension_numbers<[1], [0], [0], [1], [0, 0, 1, 1], [], []>} : vector<8x32xf32>, vector<32x384xf32>, vector<8x384xf32> -> vector<8x384xf32>
    %62 = vector.extract_strided_slice %60 {offsets = [0, 0], sizes = [8, 32], strides = [1, 1]} : vector<8x384xf32> to vector<8x32xf32>
    %63 = vector.extract_strided_slice %61 {offsets = [0, 0], sizes = [8, 32], strides = [1, 1]} : vector<8x384xf32> to vector<8x32xf32>
    %64 = arith.addf %62, %63 : vector<8x32xf32>
    %65 = arith.negf %64 : vector<8x32xf32>
    %66 = math.exp %65 : vector<8x32xf32>
    %cst_64 = arith.constant 1.000000e+00 : f32
    %67 = vector.broadcast %cst_64 : f32 to vector<8x32xf32>
    %68 = arith.addf %67, %66 : vector<8x32xf32>
    %69 = arith.divf %67, %68 : vector<8x32xf32>
    %70 = vector.extract_strided_slice %60 {offsets = [0, 128], sizes = [8, 32], strides = [1, 1]} : vector<8x384xf32> to vector<8x32xf32>
    %71 = vector.extract_strided_slice %61 {offsets = [0, 128], sizes = [8, 32], strides = [1, 1]} : vector<8x384xf32> to vector<8x32xf32>
    %72 = arith.addf %70, %71 : vector<8x32xf32>
    %73 = arith.negf %72 : vector<8x32xf32>
    %74 = math.exp %73 : vector<8x32xf32>
    %cst_65 = arith.constant 1.000000e+00 : f32
    %75 = vector.broadcast %cst_65 : f32 to vector<8x32xf32>
    %76 = arith.addf %75, %74 : vector<8x32xf32>
    %77 = arith.divf %75, %76 : vector<8x32xf32>
    %78 = vector.extract_strided_slice %60 {offsets = [0, 256], sizes = [8, 32], strides = [1, 1]} : vector<8x384xf32> to vector<8x32xf32>
    %79 = vector.extract_strided_slice %61 {offsets = [0, 256], sizes = [8, 32], strides = [1, 1]} : vector<8x384xf32> to vector<8x32xf32>
    %80 = arith.addf %79, %47 : vector<8x32xf32>
    %81 = arith.mulf %69, %80 : vector<8x32xf32>
    %82 = arith.addf %78, %81 : vector<8x32xf32>
    %83 = math.tanh %82 : vector<8x32xf32>
    %cst_66 = arith.constant 1.000000e+00 : f32
    %84 = vector.broadcast %cst_66 : f32 to vector<8x32xf32>
    %85 = arith.subf %84, %77 : vector<8x32xf32>
    %86 = arith.mulf %85, %83 : vector<8x32xf32>
    %87 = arith.mulf %77, %56 : vector<8x32xf32>
    %88 = arith.addf %86, %87 : vector<8x32xf32>
    %c0_67 = arith.constant 0 : index
    %c0_68 = arith.constant 0 : index
    %c0_69 = arith.constant 0 : index
    %89 = vector.load %arg6[%c0_67, %c0_68, %c0_69] : memref<3x64x32xf32, #tpu.memory_space<vmem>>, vector<1x8x32xf32>
    %90 = vector.shape_cast %89 : vector<1x8x32xf32> to vector<8x32xf32>
    %91 = vector.shape_cast %88 : vector<8x32xf32> to vector<1x8x32xf32>
    tpu.vector_store %arg6[%c0_67, %c0_68, %c0_69], %91 {strides = array<i32>} : memref<3x64x32xf32, #tpu.memory_space<vmem>>, vector<1x8x32xf32>,
    %c1_70 = arith.constant 1 : index
    %c0_71 = arith.constant 0 : index
    %c0_72 = arith.constant 0 : index
    %92 = vector.load %arg7[%c1_70, %c0_71, %c0_72] : memref<3x64x384xf32, #tpu.memory_space<vmem>>, vector<1x8x384xf32>
    %93 = vector.shape_cast %92 : vector<1x8x384xf32> to vector<8x384xf32>
    %cst_73 = arith.constant dense<0.000000e+00> : vector<8x384xf32>
    %94 = tpu.matmul %57, %41, %cst_73 {dimension_numbers = #tpu.dot_dimension_numbers<[1], [0], [0], [1], [0, 0, 1, 1], [], []>} : vector<8x32xf32>, vector<32x384xf32>, vector<8x384xf32> -> vector<8x384xf32>
    %95 = vector.extract_strided_slice %93 {offsets = [0, 0], sizes = [8, 32], strides = [1, 1]} : vector<8x384xf32> to vector<8x32xf32>
    %96 = vector.extract_strided_slice %94 {offsets = [0, 0], sizes = [8, 32], strides = [1, 1]} : vector<8x384xf32> to vector<8x32xf32>
    %97 = arith.addf %95, %96 : vector<8x32xf32>
    %98 = arith.negf %97 : vector<8x32xf32>
    %99 = math.exp %98 : vector<8x32xf32>
    %cst_74 = arith.constant 1.000000e+00 : f32
    %100 = vector.broadcast %cst_74 : f32 to vector<8x32xf32>
    %101 = arith.addf %100, %99 : vector<8x32xf32>
    %102 = arith.divf %100, %101 : vector<8x32xf32>
    %103 = vector.extract_strided_slice %93 {offsets = [0, 128], sizes = [8, 32], strides = [1, 1]} : vector<8x384xf32> to vector<8x32xf32>
    %104 = vector.extract_strided_slice %94 {offsets = [0, 128], sizes = [8, 32], strides = [1, 1]} : vector<8x384xf32> to vector<8x32xf32>
    %105 = arith.addf %103, %104 : vector<8x32xf32>
    %106 = arith.negf %105 : vector<8x32xf32>
    %107 = math.exp %106 : vector<8x32xf32>
    %cst_75 = arith.constant 1.000000e+00 : f32
    %108 = vector.broadcast %cst_75 : f32 to vector<8x32xf32>
    %109 = arith.addf %108, %107 : vector<8x32xf32>
    %110 = arith.divf %108, %109 : vector<8x32xf32>
    %111 = vector.extract_strided_slice %93 {offsets = [0, 256], sizes = [8, 32], strides = [1, 1]} : vector<8x384xf32> to vector<8x32xf32>
    %112 = vector.extract_strided_slice %94 {offsets = [0, 256], sizes = [8, 32], strides = [1, 1]} : vector<8x384xf32> to vector<8x32xf32>
    %113 = arith.addf %112, %51 : vector<8x32xf32>
    %114 = arith.mulf %102, %113 : vector<8x32xf32>
    %115 = arith.addf %111, %114 : vector<8x32xf32>
    %116 = math.tanh %115 : vector<8x32xf32>
    %cst_76 = arith.constant 1.000000e+00 : f32
    %117 = vector.broadcast %cst_76 : f32 to vector<8x32xf32>
    %118 = arith.subf %117, %110 : vector<8x32xf32>
    %119 = arith.mulf %118, %116 : vector<8x32xf32>
    %120 = arith.mulf %110, %57 : vector<8x32xf32>
    %121 = arith.addf %119, %120 : vector<8x32xf32>
    %c1_77 = arith.constant 1 : index
    %c0_78 = arith.constant 0 : index
    %c0_79 = arith.constant 0 : index
    %122 = vector.load %arg6[%c1_77, %c0_78, %c0_79] : memref<3x64x32xf32, #tpu.memory_space<vmem>>, vector<1x8x32xf32>
    %123 = vector.shape_cast %122 : vector<1x8x32xf32> to vector<8x32xf32>
    %124 = vector.shape_cast %121 : vector<8x32xf32> to vector<1x8x32xf32>
    tpu.vector_store %arg6[%c1_77, %c0_78, %c0_79], %124 {strides = array<i32>} : memref<3x64x32xf32, #tpu.memory_space<vmem>>, vector<1x8x32xf32>,
    %c2_80 = arith.constant 2 : index
    %c0_81 = arith.constant 0 : index
    %c0_82 = arith.constant 0 : index
    %125 = vector.load %arg7[%c2_80, %c0_81, %c0_82] : memref<3x64x384xf32, #tpu.memory_space<vmem>>, vector<1x8x384xf32>
    %126 = vector.shape_cast %125 : vector<1x8x384xf32> to vector<8x384xf32>
    %cst_83 = arith.constant dense<0.000000e+00> : vector<8x384xf32>
    %127 = tpu.matmul %58, %43, %cst_83 {dimension_numbers = #tpu.dot_dimension_numbers<[1], [0], [0], [1], [0, 0, 1, 1], [], []>} : vector<8x32xf32>, vector<32x384xf32>, vector<8x384xf32> -> vector<8x384xf32>
    %128 = vector.extract_strided_slice %126 {offsets = [0, 0], sizes = [8, 32], strides = [1, 1]} : vector<8x384xf32> to vector<8x32xf32>
    %129 = vector.extract_strided_slice %127 {offsets = [0, 0], sizes = [8, 32], strides = [1, 1]} : vector<8x384xf32> to vector<8x32xf32>
    %130 = arith.addf %128, %129 : vector<8x32xf32>
    %131 = arith.negf %130 : vector<8x32xf32>
    %132 = math.exp %131 : vector<8x32xf32>
    %cst_84 = arith.constant 1.000000e+00 : f32
    %133 = vector.broadcast %cst_84 : f32 to vector<8x32xf32>
    %134 = arith.addf %133, %132 : vector<8x32xf32>
    %135 = arith.divf %133, %134 : vector<8x32xf32>
    %136 = vector.extract_strided_slice %126 {offsets = [0, 128], sizes = [8, 32], strides = [1, 1]} : vector<8x384xf32> to vector<8x32xf32>
    %137 = vector.extract_strided_slice %127 {offsets = [0, 128], sizes = [8, 32], strides = [1, 1]} : vector<8x384xf32> to vector<8x32xf32>
    %138 = arith.addf %136, %137 : vector<8x32xf32>
    %139 = arith.negf %138 : vector<8x32xf32>
    %140 = math.exp %139 : vector<8x32xf32>
    %cst_85 = arith.constant 1.000000e+00 : f32
    %141 = vector.broadcast %cst_85 : f32 to vector<8x32xf32>
    %142 = arith.addf %141, %140 : vector<8x32xf32>
    %143 = arith.divf %141, %142 : vector<8x32xf32>
    %144 = vector.extract_strided_slice %126 {offsets = [0, 256], sizes = [8, 32], strides = [1, 1]} : vector<8x384xf32> to vector<8x32xf32>
    %145 = vector.extract_strided_slice %127 {offsets = [0, 256], sizes = [8, 32], strides = [1, 1]} : vector<8x384xf32> to vector<8x32xf32>
    %146 = arith.addf %145, %55 : vector<8x32xf32>
    %147 = arith.mulf %135, %146 : vector<8x32xf32>
    %148 = arith.addf %144, %147 : vector<8x32xf32>
    %149 = math.tanh %148 : vector<8x32xf32>
    %cst_86 = arith.constant 1.000000e+00 : f32
    %150 = vector.broadcast %cst_86 : f32 to vector<8x32xf32>
    %151 = arith.subf %150, %143 : vector<8x32xf32>
    %152 = arith.mulf %151, %149 : vector<8x32xf32>
    %153 = arith.mulf %143, %58 : vector<8x32xf32>
    %154 = arith.addf %152, %153 : vector<8x32xf32>
    %c2_87 = arith.constant 2 : index
    %c0_88 = arith.constant 0 : index
    %c0_89 = arith.constant 0 : index
    %155 = vector.load %arg6[%c2_87, %c0_88, %c0_89] : memref<3x64x32xf32, #tpu.memory_space<vmem>>, vector<1x8x32xf32>
    %156 = vector.shape_cast %155 : vector<1x8x32xf32> to vector<8x32xf32>
    %157 = vector.shape_cast %154 : vector<8x32xf32> to vector<1x8x32xf32>
    tpu.vector_store %arg6[%c2_87, %c0_88, %c0_89], %157 {strides = array<i32>} : memref<3x64x32xf32, #tpu.memory_space<vmem>>, vector<1x8x32xf32>,
    %c0_90 = arith.constant 0 : index
    %c8 = arith.constant 8 : index
    %c0_91 = arith.constant 0 : index
    %158 = vector.load %arg7[%c0_90, %c8, %c0_91] : memref<3x64x384xf32, #tpu.memory_space<vmem>>, vector<1x8x384xf32>
    %159 = vector.shape_cast %158 : vector<1x8x384xf32> to vector<8x384xf32>
    %cst_92 = arith.constant dense<0.000000e+00> : vector<8x384xf32>
    %160 = tpu.matmul %88, %39, %cst_92 {dimension_numbers = #tpu.dot_dimension_numbers<[1], [0], [0], [1], [0, 0, 1, 1], [], []>} : vector<8x32xf32>, vector<32x384xf32>, vector<8x384xf32> -> vector<8x384xf32>
    %161 = vector.extract_strided_slice %159 {offsets = [0, 0], sizes = [8, 32], strides = [1, 1]} : vector<8x384xf32> to vector<8x32xf32>
    %162 = vector.extract_strided_slice %160 {offsets = [0, 0], sizes = [8, 32], strides = [1, 1]} : vector<8x384xf32> to vector<8x32xf32>
    %163 = arith.addf %161, %162 : vector<8x32xf32>
    %164 = arith.negf %163 : vector<8x32xf32>
    %165 = math.exp %164 : vector<8x32xf32>
    %cst_93 = arith.constant 1.000000e+00 : f32
    %166 = vector.broadcast %cst_93 : f32 to vector<8x32xf32>
    %167 = arith.addf %166, %165 : vector<8x32xf32>
    %168 = arith.divf %166, %167 : vector<8x32xf32>
    %169 = vector.extract_strided_slice %159 {offsets = [0, 128], sizes = [8, 32], strides = [1, 1]} : vector<8x384xf32> to vector<8x32xf32>
    %170 = vector.extract_strided_slice %160 {offsets = [0, 128], sizes = [8, 32], strides = [1, 1]} : vector<8x384xf32> to vector<8x32xf32>
    %171 = arith.addf %169, %170 : vector<8x32xf32>
    %172 = arith.negf %171 : vector<8x32xf32>
    %173 = math.exp %172 : vector<8x32xf32>
    %cst_94 = arith.constant 1.000000e+00 : f32
    %174 = vector.broadcast %cst_94 : f32 to vector<8x32xf32>
    %175 = arith.addf %174, %173 : vector<8x32xf32>
    %176 = arith.divf %174, %175 : vector<8x32xf32>
    %177 = vector.extract_strided_slice %159 {offsets = [0, 256], sizes = [8, 32], strides = [1, 1]} : vector<8x384xf32> to vector<8x32xf32>
    %178 = vector.extract_strided_slice %160 {offsets = [0, 256], sizes = [8, 32], strides = [1, 1]} : vector<8x384xf32> to vector<8x32xf32>
    %179 = arith.addf %178, %47 : vector<8x32xf32>
    %180 = arith.mulf %168, %179 : vector<8x32xf32>
    %181 = arith.addf %177, %180 : vector<8x32xf32>
    %182 = math.tanh %181 : vector<8x32xf32>
    %cst_95 = arith.constant 1.000000e+00 : f32
    %183 = vector.broadcast %cst_95 : f32 to vector<8x32xf32>
    %184 = arith.subf %183, %176 : vector<8x32xf32>
    %185 = arith.mulf %184, %182 : vector<8x32xf32>
    %186 = arith.mulf %176, %88 : vector<8x32xf32>
    %187 = arith.addf %185, %186 : vector<8x32xf32>
    %c0_96 = arith.constant 0 : index
    %c8_97 = arith.constant 8 : index
    %c0_98 = arith.constant 0 : index
    %188 = vector.load %arg6[%c0_96, %c8_97, %c0_98] : memref<3x64x32xf32, #tpu.memory_space<vmem>>, vector<1x8x32xf32>
    %189 = vector.shape_cast %188 : vector<1x8x32xf32> to vector<8x32xf32>
    %190 = vector.shape_cast %187 : vector<8x32xf32> to vector<1x8x32xf32>
    tpu.vector_store %arg6[%c0_96, %c8_97, %c0_98], %190 {strides = array<i32>} : memref<3x64x32xf32, #tpu.memory_space<vmem>>, vector<1x8x32xf32>,
    %c1_99 = arith.constant 1 : index
    %c8_100 = arith.constant 8 : index
    %c0_101 = arith.constant 0 : index
    %191 = vector.load %arg7[%c1_99, %c8_100, %c0_101] : memref<3x64x384xf32, #tpu.memory_space<vmem>>, vector<1x8x384xf32>
    %192 = vector.shape_cast %191 : vector<1x8x384xf32> to vector<8x384xf32>
    %cst_102 = arith.constant dense<0.000000e+00> : vector<8x384xf32>
    %193 = tpu.matmul %121, %41, %cst_102 {dimension_numbers = #tpu.dot_dimension_numbers<[1], [0], [0], [1], [0, 0, 1, 1], [], []>} : vector<8x32xf32>, vector<32x384xf32>, vector<8x384xf32> -> vector<8x384xf32>
    %194 = vector.extract_strided_slice %192 {offsets = [0, 0], sizes = [8, 32], strides = [1, 1]} : vector<8x384xf32> to vector<8x32xf32>
    %195 = vector.extract_strided_slice %193 {offsets = [0, 0], sizes = [8, 32], strides = [1, 1]} : vector<8x384xf32> to vector<8x32xf32>
    %196 = arith.addf %194, %195 : vector<8x32xf32>
    %197 = arith.negf %196 : vector<8x32xf32>
    %198 = math.exp %197 : vector<8x32xf32>
    %cst_103 = arith.constant 1.000000e+00 : f32
    %199 = vector.broadcast %cst_103 : f32 to vector<8x32xf32>
    %200 = arith.addf %199, %198 : vector<8x32xf32>
    %201 = arith.divf %199, %200 : vector<8x32xf32>
    %202 = vector.extract_strided_slice %192 {offsets = [0, 128], sizes = [8, 32], strides = [1, 1]} : vector<8x384xf32> to vector<8x32xf32>
    %203 = vector.extract_strided_slice %193 {offsets = [0, 128], sizes = [8, 32], strides = [1, 1]} : vector<8x384xf32> to vector<8x32xf32>
    %204 = arith.addf %202, %203 : vector<8x32xf32>
    %205 = arith.negf %204 : vector<8x32xf32>
    %206 = math.exp %205 : vector<8x32xf32>
    %cst_104 = arith.constant 1.000000e+00 : f32
    %207 = vector.broadcast %cst_104 : f32 to vector<8x32xf32>
    %208 = arith.addf %207, %206 : vector<8x32xf32>
    %209 = arith.divf %207, %208 : vector<8x32xf32>
    %210 = vector.extract_strided_slice %192 {offsets = [0, 256], sizes = [8, 32], strides = [1, 1]} : vector<8x384xf32> to vector<8x32xf32>
    %211 = vector.extract_strided_slice %193 {offsets = [0, 256], sizes = [8, 32], strides = [1, 1]} : vector<8x384xf32> to vector<8x32xf32>
    %212 = arith.addf %211, %51 : vector<8x32xf32>
    %213 = arith.mulf %201, %212 : vector<8x32xf32>
    %214 = arith.addf %210, %213 : vector<8x32xf32>
    %215 = math.tanh %214 : vector<8x32xf32>
    %cst_105 = arith.constant 1.000000e+00 : f32
    %216 = vector.broadcast %cst_105 : f32 to vector<8x32xf32>
    %217 = arith.subf %216, %209 : vector<8x32xf32>
    %218 = arith.mulf %217, %215 : vector<8x32xf32>
    %219 = arith.mulf %209, %121 : vector<8x32xf32>
    %220 = arith.addf %218, %219 : vector<8x32xf32>
    %c1_106 = arith.constant 1 : index
    %c8_107 = arith.constant 8 : index
    %c0_108 = arith.constant 0 : index
    %221 = vector.load %arg6[%c1_106, %c8_107, %c0_108] : memref<3x64x32xf32, #tpu.memory_space<vmem>>, vector<1x8x32xf32>
    %222 = vector.shape_cast %221 : vector<1x8x32xf32> to vector<8x32xf32>
    %223 = vector.shape_cast %220 : vector<8x32xf32> to vector<1x8x32xf32>
    tpu.vector_store %arg6[%c1_106, %c8_107, %c0_108], %223 {strides = array<i32>} : memref<3x64x32xf32, #tpu.memory_space<vmem>>, vector<1x8x32xf32>,
    %c2_109 = arith.constant 2 : index
    %c8_110 = arith.constant 8 : index
    %c0_111 = arith.constant 0 : index
    %224 = vector.load %arg7[%c2_109, %c8_110, %c0_111] : memref<3x64x384xf32, #tpu.memory_space<vmem>>, vector<1x8x384xf32>
    %225 = vector.shape_cast %224 : vector<1x8x384xf32> to vector<8x384xf32>
    %cst_112 = arith.constant dense<0.000000e+00> : vector<8x384xf32>
    %226 = tpu.matmul %154, %43, %cst_112 {dimension_numbers = #tpu.dot_dimension_numbers<[1], [0], [0], [1], [0, 0, 1, 1], [], []>} : vector<8x32xf32>, vector<32x384xf32>, vector<8x384xf32> -> vector<8x384xf32>
    %227 = vector.extract_strided_slice %225 {offsets = [0, 0], sizes = [8, 32], strides = [1, 1]} : vector<8x384xf32> to vector<8x32xf32>
    %228 = vector.extract_strided_slice %226 {offsets = [0, 0], sizes = [8, 32], strides = [1, 1]} : vector<8x384xf32> to vector<8x32xf32>
    %229 = arith.addf %227, %228 : vector<8x32xf32>
    %230 = arith.negf %229 : vector<8x32xf32>
    %231 = math.exp %230 : vector<8x32xf32>
    %cst_113 = arith.constant 1.000000e+00 : f32
    %232 = vector.broadcast %cst_113 : f32 to vector<8x32xf32>
    %233 = arith.addf %232, %231 : vector<8x32xf32>
    %234 = arith.divf %232, %233 : vector<8x32xf32>
    %235 = vector.extract_strided_slice %225 {offsets = [0, 128], sizes = [8, 32], strides = [1, 1]} : vector<8x384xf32> to vector<8x32xf32>
    %236 = vector.extract_strided_slice %226 {offsets = [0, 128], sizes = [8, 32], strides = [1, 1]} : vector<8x384xf32> to vector<8x32xf32>
    %237 = arith.addf %235, %236 : vector<8x32xf32>
    %238 = arith.negf %237 : vector<8x32xf32>
    %239 = math.exp %238 : vector<8x32xf32>
    %cst_114 = arith.constant 1.000000e+00 : f32
    %240 = vector.broadcast %cst_114 : f32 to vector<8x32xf32>
    %241 = arith.addf %240, %239 : vector<8x32xf32>
    %242 = arith.divf %240, %241 : vector<8x32xf32>
    %243 = vector.extract_strided_slice %225 {offsets = [0, 256], sizes = [8, 32], strides = [1, 1]} : vector<8x384xf32> to vector<8x32xf32>
    %244 = vector.extract_strided_slice %226 {offsets = [0, 256], sizes = [8, 32], strides = [1, 1]} : vector<8x384xf32> to vector<8x32xf32>
    %245 = arith.addf %244, %55 : vector<8x32xf32>
    %246 = arith.mulf %234, %245 : vector<8x32xf32>
    %247 = arith.addf %243, %246 : vector<8x32xf32>
    %248 = math.tanh %247 : vector<8x32xf32>
    %cst_115 = arith.constant 1.000000e+00 : f32
    %249 = vector.broadcast %cst_115 : f32 to vector<8x32xf32>
    %250 = arith.subf %249, %242 : vector<8x32xf32>
    %251 = arith.mulf %250, %248 : vector<8x32xf32>
    %252 = arith.mulf %242, %154 : vector<8x32xf32>
    %253 = arith.addf %251, %252 : vector<8x32xf32>
    %c2_116 = arith.constant 2 : index
    %c8_117 = arith.constant 8 : index
    %c0_118 = arith.constant 0 : index
    %254 = vector.load %arg6[%c2_116, %c8_117, %c0_118] : memref<3x64x32xf32, #tpu.memory_space<vmem>>, vector<1x8x32xf32>
    %255 = vector.shape_cast %254 : vector<1x8x32xf32> to vector<8x32xf32>
    %256 = vector.shape_cast %253 : vector<8x32xf32> to vector<1x8x32xf32>
    tpu.vector_store %arg6[%c2_116, %c8_117, %c0_118], %256 {strides = array<i32>} : memref<3x64x32xf32, #tpu.memory_space<vmem>>, vector<1x8x32xf32>,
    %c0_119 = arith.constant 0 : index
    %c16 = arith.constant 16 : index
    %c0_120 = arith.constant 0 : index
    %257 = vector.load %arg7[%c0_119, %c16, %c0_120] : memref<3x64x384xf32, #tpu.memory_space<vmem>>, vector<1x8x384xf32>
    %258 = vector.shape_cast %257 : vector<1x8x384xf32> to vector<8x384xf32>
    %cst_121 = arith.constant dense<0.000000e+00> : vector<8x384xf32>
    %259 = tpu.matmul %187, %39, %cst_121 {dimension_numbers = #tpu.dot_dimension_numbers<[1], [0], [0], [1], [0, 0, 1, 1], [], []>} : vector<8x32xf32>, vector<32x384xf32>, vector<8x384xf32> -> vector<8x384xf32>
    %260 = vector.extract_strided_slice %258 {offsets = [0, 0], sizes = [8, 32], strides = [1, 1]} : vector<8x384xf32> to vector<8x32xf32>
    %261 = vector.extract_strided_slice %259 {offsets = [0, 0], sizes = [8, 32], strides = [1, 1]} : vector<8x384xf32> to vector<8x32xf32>
    %262 = arith.addf %260, %261 : vector<8x32xf32>
    %263 = arith.negf %262 : vector<8x32xf32>
    %264 = math.exp %263 : vector<8x32xf32>
    %cst_122 = arith.constant 1.000000e+00 : f32
    %265 = vector.broadcast %cst_122 : f32 to vector<8x32xf32>
    %266 = arith.addf %265, %264 : vector<8x32xf32>
    %267 = arith.divf %265, %266 : vector<8x32xf32>
    %268 = vector.extract_strided_slice %258 {offsets = [0, 128], sizes = [8, 32], strides = [1, 1]} : vector<8x384xf32> to vector<8x32xf32>
    %269 = vector.extract_strided_slice %259 {offsets = [0, 128], sizes = [8, 32], strides = [1, 1]} : vector<8x384xf32> to vector<8x32xf32>
    %270 = arith.addf %268, %269 : vector<8x32xf32>
    %271 = arith.negf %270 : vector<8x32xf32>
    %272 = math.exp %271 : vector<8x32xf32>
    %cst_123 = arith.constant 1.000000e+00 : f32
    %273 = vector.broadcast %cst_123 : f32 to vector<8x32xf32>
    %274 = arith.addf %273, %272 : vector<8x32xf32>
    %275 = arith.divf %273, %274 : vector<8x32xf32>
    %276 = vector.extract_strided_slice %258 {offsets = [0, 256], sizes = [8, 32], strides = [1, 1]} : vector<8x384xf32> to vector<8x32xf32>
    %277 = vector.extract_strided_slice %259 {offsets = [0, 256], sizes = [8, 32], strides = [1, 1]} : vector<8x384xf32> to vector<8x32xf32>
    %278 = arith.addf %277, %47 : vector<8x32xf32>
    %279 = arith.mulf %267, %278 : vector<8x32xf32>
    %280 = arith.addf %276, %279 : vector<8x32xf32>
    %281 = math.tanh %280 : vector<8x32xf32>
    %cst_124 = arith.constant 1.000000e+00 : f32
    %282 = vector.broadcast %cst_124 : f32 to vector<8x32xf32>
    %283 = arith.subf %282, %275 : vector<8x32xf32>
    %284 = arith.mulf %283, %281 : vector<8x32xf32>
    %285 = arith.mulf %275, %187 : vector<8x32xf32>
    %286 = arith.addf %284, %285 : vector<8x32xf32>
    %c0_125 = arith.constant 0 : index
    %c16_126 = arith.constant 16 : index
    %c0_127 = arith.constant 0 : index
    %287 = vector.load %arg6[%c0_125, %c16_126, %c0_127] : memref<3x64x32xf32, #tpu.memory_space<vmem>>, vector<1x8x32xf32>
    %288 = vector.shape_cast %287 : vector<1x8x32xf32> to vector<8x32xf32>
    %289 = vector.shape_cast %286 : vector<8x32xf32> to vector<1x8x32xf32>
    tpu.vector_store %arg6[%c0_125, %c16_126, %c0_127], %289 {strides = array<i32>} : memref<3x64x32xf32, #tpu.memory_space<vmem>>, vector<1x8x32xf32>,
    %c1_128 = arith.constant 1 : index
    %c16_129 = arith.constant 16 : index
    %c0_130 = arith.constant 0 : index
    %290 = vector.load %arg7[%c1_128, %c16_129, %c0_130] : memref<3x64x384xf32, #tpu.memory_space<vmem>>, vector<1x8x384xf32>
    %291 = vector.shape_cast %290 : vector<1x8x384xf32> to vector<8x384xf32>
    %cst_131 = arith.constant dense<0.000000e+00> : vector<8x384xf32>
    %292 = tpu.matmul %220, %41, %cst_131 {dimension_numbers = #tpu.dot_dimension_numbers<[1], [0], [0], [1], [0, 0, 1, 1], [], []>} : vector<8x32xf32>, vector<32x384xf32>, vector<8x384xf32> -> vector<8x384xf32>
    %293 = vector.extract_strided_slice %291 {offsets = [0, 0], sizes = [8, 32], strides = [1, 1]} : vector<8x384xf32> to vector<8x32xf32>
    %294 = vector.extract_strided_slice %292 {offsets = [0, 0], sizes = [8, 32], strides = [1, 1]} : vector<8x384xf32> to vector<8x32xf32>
    %295 = arith.addf %293, %294 : vector<8x32xf32>
    %296 = arith.negf %295 : vector<8x32xf32>
    %297 = math.exp %296 : vector<8x32xf32>
    %cst_132 = arith.constant 1.000000e+00 : f32
    %298 = vector.broadcast %cst_132 : f32 to vector<8x32xf32>
    %299 = arith.addf %298, %297 : vector<8x32xf32>
    %300 = arith.divf %298, %299 : vector<8x32xf32>
    %301 = vector.extract_strided_slice %291 {offsets = [0, 128], sizes = [8, 32], strides = [1, 1]} : vector<8x384xf32> to vector<8x32xf32>
    %302 = vector.extract_strided_slice %292 {offsets = [0, 128], sizes = [8, 32], strides = [1, 1]} : vector<8x384xf32> to vector<8x32xf32>
    %303 = arith.addf %301, %302 : vector<8x32xf32>
    %304 = arith.negf %303 : vector<8x32xf32>
    %305 = math.exp %304 : vector<8x32xf32>
    %cst_133 = arith.constant 1.000000e+00 : f32
    %306 = vector.broadcast %cst_133 : f32 to vector<8x32xf32>
    %307 = arith.addf %306, %305 : vector<8x32xf32>
    %308 = arith.divf %306, %307 : vector<8x32xf32>
    %309 = vector.extract_strided_slice %291 {offsets = [0, 256], sizes = [8, 32], strides = [1, 1]} : vector<8x384xf32> to vector<8x32xf32>
    %310 = vector.extract_strided_slice %292 {offsets = [0, 256], sizes = [8, 32], strides = [1, 1]} : vector<8x384xf32> to vector<8x32xf32>
    %311 = arith.addf %310, %51 : vector<8x32xf32>
    %312 = arith.mulf %300, %311 : vector<8x32xf32>
    %313 = arith.addf %309, %312 : vector<8x32xf32>
    %314 = math.tanh %313 : vector<8x32xf32>
    %cst_134 = arith.constant 1.000000e+00 : f32
    %315 = vector.broadcast %cst_134 : f32 to vector<8x32xf32>
    %316 = arith.subf %315, %308 : vector<8x32xf32>
    %317 = arith.mulf %316, %314 : vector<8x32xf32>
    %318 = arith.mulf %308, %220 : vector<8x32xf32>
    %319 = arith.addf %317, %318 : vector<8x32xf32>
    %c1_135 = arith.constant 1 : index
    %c16_136 = arith.constant 16 : index
    %c0_137 = arith.constant 0 : index
    %320 = vector.load %arg6[%c1_135, %c16_136, %c0_137] : memref<3x64x32xf32, #tpu.memory_space<vmem>>, vector<1x8x32xf32>
    %321 = vector.shape_cast %320 : vector<1x8x32xf32> to vector<8x32xf32>
    %322 = vector.shape_cast %319 : vector<8x32xf32> to vector<1x8x32xf32>
    tpu.vector_store %arg6[%c1_135, %c16_136, %c0_137], %322 {strides = array<i32>} : memref<3x64x32xf32, #tpu.memory_space<vmem>>, vector<1x8x32xf32>,
    %c0_138 = arith.constant 0 : index
    %c24 = arith.constant 24 : index
    %c0_139 = arith.constant 0 : index
    %323 = vector.load %arg7[%c0_138, %c24, %c0_139] : memref<3x64x384xf32, #tpu.memory_space<vmem>>, vector<1x8x384xf32>
    %324 = vector.shape_cast %323 : vector<1x8x384xf32> to vector<8x384xf32>
    %cst_140 = arith.constant dense<0.000000e+00> : vector<8x384xf32>
    %325 = tpu.matmul %286, %39, %cst_140 {dimension_numbers = #tpu.dot_dimension_numbers<[1], [0], [0], [1], [0, 0, 1, 1], [], []>} : vector<8x32xf32>, vector<32x384xf32>, vector<8x384xf32> -> vector<8x384xf32>
    %326 = vector.extract_strided_slice %324 {offsets = [0, 0], sizes = [8, 32], strides = [1, 1]} : vector<8x384xf32> to vector<8x32xf32>
    %327 = vector.extract_strided_slice %325 {offsets = [0, 0], sizes = [8, 32], strides = [1, 1]} : vector<8x384xf32> to vector<8x32xf32>
    %328 = arith.addf %326, %327 : vector<8x32xf32>
    %329 = arith.negf %328 : vector<8x32xf32>
    %330 = math.exp %329 : vector<8x32xf32>
    %cst_141 = arith.constant 1.000000e+00 : f32
    %331 = vector.broadcast %cst_141 : f32 to vector<8x32xf32>
    %332 = arith.addf %331, %330 : vector<8x32xf32>
    %333 = arith.divf %331, %332 : vector<8x32xf32>
    %334 = vector.extract_strided_slice %324 {offsets = [0, 128], sizes = [8, 32], strides = [1, 1]} : vector<8x384xf32> to vector<8x32xf32>
    %335 = vector.extract_strided_slice %325 {offsets = [0, 128], sizes = [8, 32], strides = [1, 1]} : vector<8x384xf32> to vector<8x32xf32>
    %336 = arith.addf %334, %335 : vector<8x32xf32>
    %337 = arith.negf %336 : vector<8x32xf32>
    %338 = math.exp %337 : vector<8x32xf32>
    %cst_142 = arith.constant 1.000000e+00 : f32
    %339 = vector.broadcast %cst_142 : f32 to vector<8x32xf32>
    %340 = arith.addf %339, %338 : vector<8x32xf32>
    %341 = arith.divf %339, %340 : vector<8x32xf32>
    %342 = vector.extract_strided_slice %324 {offsets = [0, 256], sizes = [8, 32], strides = [1, 1]} : vector<8x384xf32> to vector<8x32xf32>
    %343 = vector.extract_strided_slice %325 {offsets = [0, 256], sizes = [8, 32], strides = [1, 1]} : vector<8x384xf32> to vector<8x32xf32>
    %344 = arith.addf %343, %47 : vector<8x32xf32>
    %345 = arith.mulf %333, %344 : vector<8x32xf32>
    %346 = arith.addf %342, %345 : vector<8x32xf32>
    %347 = math.tanh %346 : vector<8x32xf32>
    %cst_143 = arith.constant 1.000000e+00 : f32
    %348 = vector.broadcast %cst_143 : f32 to vector<8x32xf32>
    %349 = arith.subf %348, %341 : vector<8x32xf32>
    %350 = arith.mulf %349, %347 : vector<8x32xf32>
    %351 = arith.mulf %341, %286 : vector<8x32xf32>
    %352 = arith.addf %350, %351 : vector<8x32xf32>
    %c0_144 = arith.constant 0 : index
    %c24_145 = arith.constant 24 : index
    %c0_146 = arith.constant 0 : index
    %353 = vector.load %arg6[%c0_144, %c24_145, %c0_146] : memref<3x64x32xf32, #tpu.memory_space<vmem>>, vector<1x8x32xf32>
    %354 = vector.shape_cast %353 : vector<1x8x32xf32> to vector<8x32xf32>
    %355 = vector.shape_cast %352 : vector<8x32xf32> to vector<1x8x32xf32>
    tpu.vector_store %arg6[%c0_144, %c24_145, %c0_146], %355 {strides = array<i32>} : memref<3x64x32xf32, #tpu.memory_space<vmem>>, vector<1x8x32xf32>,
    %c1_147 = arith.constant 1 : index
    %c24_148 = arith.constant 24 : index
    %c0_149 = arith.constant 0 : index
    %356 = vector.load %arg7[%c1_147, %c24_148, %c0_149] : memref<3x64x384xf32, #tpu.memory_space<vmem>>, vector<1x8x384xf32>
    %357 = vector.shape_cast %356 : vector<1x8x384xf32> to vector<8x384xf32>
    %cst_150 = arith.constant dense<0.000000e+00> : vector<8x384xf32>
    %358 = tpu.matmul %319, %41, %cst_150 {dimension_numbers = #tpu.dot_dimension_numbers<[1], [0], [0], [1], [0, 0, 1, 1], [], []>} : vector<8x32xf32>, vector<32x384xf32>, vector<8x384xf32> -> vector<8x384xf32>
    %359 = vector.extract_strided_slice %357 {offsets = [0, 0], sizes = [8, 32], strides = [1, 1]} : vector<8x384xf32> to vector<8x32xf32>
    %360 = vector.extract_strided_slice %358 {offsets = [0, 0], sizes = [8, 32], strides = [1, 1]} : vector<8x384xf32> to vector<8x32xf32>
    %361 = arith.addf %359, %360 : vector<8x32xf32>
    %362 = arith.negf %361 : vector<8x32xf32>
    %363 = math.exp %362 : vector<8x32xf32>
    %cst_151 = arith.constant 1.000000e+00 : f32
    %364 = vector.broadcast %cst_151 : f32 to vector<8x32xf32>
    %365 = arith.addf %364, %363 : vector<8x32xf32>
    %366 = arith.divf %364, %365 : vector<8x32xf32>
    %367 = vector.extract_strided_slice %357 {offsets = [0, 128], sizes = [8, 32], strides = [1, 1]} : vector<8x384xf32> to vector<8x32xf32>
    %368 = vector.extract_strided_slice %358 {offsets = [0, 128], sizes = [8, 32], strides = [1, 1]} : vector<8x384xf32> to vector<8x32xf32>
    %369 = arith.addf %367, %368 : vector<8x32xf32>
    %370 = arith.negf %369 : vector<8x32xf32>
    %371 = math.exp %370 : vector<8x32xf32>
    %cst_152 = arith.constant 1.000000e+00 : f32
    %372 = vector.broadcast %cst_152 : f32 to vector<8x32xf32>
    %373 = arith.addf %372, %371 : vector<8x32xf32>
    %374 = arith.divf %372, %373 : vector<8x32xf32>
    %375 = vector.extract_strided_slice %357 {offsets = [0, 256], sizes = [8, 32], strides = [1, 1]} : vector<8x384xf32> to vector<8x32xf32>
    %376 = vector.extract_strided_slice %358 {offsets = [0, 256], sizes = [8, 32], strides = [1, 1]} : vector<8x384xf32> to vector<8x32xf32>
    %377 = arith.addf %376, %51 : vector<8x32xf32>
    %378 = arith.mulf %366, %377 : vector<8x32xf32>
    %379 = arith.addf %375, %378 : vector<8x32xf32>
    %380 = math.tanh %379 : vector<8x32xf32>
    %cst_153 = arith.constant 1.000000e+00 : f32
    %381 = vector.broadcast %cst_153 : f32 to vector<8x32xf32>
    %382 = arith.subf %381, %374 : vector<8x32xf32>
    %383 = arith.mulf %382, %380 : vector<8x32xf32>
    %384 = arith.mulf %374, %319 : vector<8x32xf32>
    %385 = arith.addf %383, %384 : vector<8x32xf32>
    %c1_154 = arith.constant 1 : index
    %c24_155 = arith.constant 24 : index
    %c0_156 = arith.constant 0 : index
    %386 = vector.load %arg6[%c1_154, %c24_155, %c0_156] : memref<3x64x32xf32, #tpu.memory_space<vmem>>, vector<1x8x32xf32>
    %387 = vector.shape_cast %386 : vector<1x8x32xf32> to vector<8x32xf32>
    %388 = vector.shape_cast %385 : vector<8x32xf32> to vector<1x8x32xf32>
    tpu.vector_store %arg6[%c1_154, %c24_155, %c0_156], %388 {strides = array<i32>} : memref<3x64x32xf32, #tpu.memory_space<vmem>>, vector<1x8x32xf32>,
    %c0_157 = arith.constant 0 : index
    %c32 = arith.constant 32 : index
    %c0_158 = arith.constant 0 : index
    %389 = vector.load %arg7[%c0_157, %c32, %c0_158] : memref<3x64x384xf32, #tpu.memory_space<vmem>>, vector<1x8x384xf32>
    %390 = vector.shape_cast %389 : vector<1x8x384xf32> to vector<8x384xf32>
    %cst_159 = arith.constant dense<0.000000e+00> : vector<8x384xf32>
    %391 = tpu.matmul %352, %39, %cst_159 {dimension_numbers = #tpu.dot_dimension_numbers<[1], [0], [0], [1], [0, 0, 1, 1], [], []>} : vector<8x32xf32>, vector<32x384xf32>, vector<8x384xf32> -> vector<8x384xf32>
    %392 = vector.extract_strided_slice %390 {offsets = [0, 0], sizes = [8, 32], strides = [1, 1]} : vector<8x384xf32> to vector<8x32xf32>
    %393 = vector.extract_strided_slice %391 {offsets = [0, 0], sizes = [8, 32], strides = [1, 1]} : vector<8x384xf32> to vector<8x32xf32>
    %394 = arith.addf %392, %393 : vector<8x32xf32>
    %395 = arith.negf %394 : vector<8x32xf32>
    %396 = math.exp %395 : vector<8x32xf32>
    %cst_160 = arith.constant 1.000000e+00 : f32
    %397 = vector.broadcast %cst_160 : f32 to vector<8x32xf32>
    %398 = arith.addf %397, %396 : vector<8x32xf32>
    %399 = arith.divf %397, %398 : vector<8x32xf32>
    %400 = vector.extract_strided_slice %390 {offsets = [0, 128], sizes = [8, 32], strides = [1, 1]} : vector<8x384xf32> to vector<8x32xf32>
    %401 = vector.extract_strided_slice %391 {offsets = [0, 128], sizes = [8, 32], strides = [1, 1]} : vector<8x384xf32> to vector<8x32xf32>
    %402 = arith.addf %400, %401 : vector<8x32xf32>
    %403 = arith.negf %402 : vector<8x32xf32>
    %404 = math.exp %403 : vector<8x32xf32>
    %cst_161 = arith.constant 1.000000e+00 : f32
    %405 = vector.broadcast %cst_161 : f32 to vector<8x32xf32>
    %406 = arith.addf %405, %404 : vector<8x32xf32>
    %407 = arith.divf %405, %406 : vector<8x32xf32>
    %408 = vector.extract_strided_slice %390 {offsets = [0, 256], sizes = [8, 32], strides = [1, 1]} : vector<8x384xf32> to vector<8x32xf32>
    %409 = vector.extract_strided_slice %391 {offsets = [0, 256], sizes = [8, 32], strides = [1, 1]} : vector<8x384xf32> to vector<8x32xf32>
    %410 = arith.addf %409, %47 : vector<8x32xf32>
    %411 = arith.mulf %399, %410 : vector<8x32xf32>
    %412 = arith.addf %408, %411 : vector<8x32xf32>
    %413 = math.tanh %412 : vector<8x32xf32>
    %cst_162 = arith.constant 1.000000e+00 : f32
    %414 = vector.broadcast %cst_162 : f32 to vector<8x32xf32>
    %415 = arith.subf %414, %407 : vector<8x32xf32>
    %416 = arith.mulf %415, %413 : vector<8x32xf32>
    %417 = arith.mulf %407, %352 : vector<8x32xf32>
    %418 = arith.addf %416, %417 : vector<8x32xf32>
    %c0_163 = arith.constant 0 : index
    %c32_164 = arith.constant 32 : index
    %c0_165 = arith.constant 0 : index
    %419 = vector.load %arg6[%c0_163, %c32_164, %c0_165] : memref<3x64x32xf32, #tpu.memory_space<vmem>>, vector<1x8x32xf32>
    %420 = vector.shape_cast %419 : vector<1x8x32xf32> to vector<8x32xf32>
    %421 = vector.shape_cast %418 : vector<8x32xf32> to vector<1x8x32xf32>
    tpu.vector_store %arg6[%c0_163, %c32_164, %c0_165], %421 {strides = array<i32>} : memref<3x64x32xf32, #tpu.memory_space<vmem>>, vector<1x8x32xf32>,
    %c0_166 = arith.constant 0 : index
    %c40 = arith.constant 40 : index
    %c0_167 = arith.constant 0 : index
    %422 = vector.load %arg7[%c0_166, %c40, %c0_167] : memref<3x64x384xf32, #tpu.memory_space<vmem>>, vector<1x8x384xf32>
    %423 = vector.shape_cast %422 : vector<1x8x384xf32> to vector<8x384xf32>
    %cst_168 = arith.constant dense<0.000000e+00> : vector<8x384xf32>
    %424 = tpu.matmul %418, %39, %cst_168 {dimension_numbers = #tpu.dot_dimension_numbers<[1], [0], [0], [1], [0, 0, 1, 1], [], []>} : vector<8x32xf32>, vector<32x384xf32>, vector<8x384xf32> -> vector<8x384xf32>
    %425 = vector.extract_strided_slice %423 {offsets = [0, 0], sizes = [8, 32], strides = [1, 1]} : vector<8x384xf32> to vector<8x32xf32>
    %426 = vector.extract_strided_slice %424 {offsets = [0, 0], sizes = [8, 32], strides = [1, 1]} : vector<8x384xf32> to vector<8x32xf32>
    %427 = arith.addf %425, %426 : vector<8x32xf32>
    %428 = arith.negf %427 : vector<8x32xf32>
    %429 = math.exp %428 : vector<8x32xf32>
    %cst_169 = arith.constant 1.000000e+00 : f32
    %430 = vector.broadcast %cst_169 : f32 to vector<8x32xf32>
    %431 = arith.addf %430, %429 : vector<8x32xf32>
    %432 = arith.divf %430, %431 : vector<8x32xf32>
    %433 = vector.extract_strided_slice %423 {offsets = [0, 128], sizes = [8, 32], strides = [1, 1]} : vector<8x384xf32> to vector<8x32xf32>
    %434 = vector.extract_strided_slice %424 {offsets = [0, 128], sizes = [8, 32], strides = [1, 1]} : vector<8x384xf32> to vector<8x32xf32>
    %435 = arith.addf %433, %434 : vector<8x32xf32>
    %436 = arith.negf %435 : vector<8x32xf32>
    %437 = math.exp %436 : vector<8x32xf32>
    %cst_170 = arith.constant 1.000000e+00 : f32
    %438 = vector.broadcast %cst_170 : f32 to vector<8x32xf32>
    %439 = arith.addf %438, %437 : vector<8x32xf32>
    %440 = arith.divf %438, %439 : vector<8x32xf32>
    %441 = vector.extract_strided_slice %423 {offsets = [0, 256], sizes = [8, 32], strides = [1, 1]} : vector<8x384xf32> to vector<8x32xf32>
    %442 = vector.extract_strided_slice %424 {offsets = [0, 256], sizes = [8, 32], strides = [1, 1]} : vector<8x384xf32> to vector<8x32xf32>
    %443 = arith.addf %442, %47 : vector<8x32xf32>
    %444 = arith.mulf %432, %443 : vector<8x32xf32>
    %445 = arith.addf %441, %444 : vector<8x32xf32>
    %446 = math.tanh %445 : vector<8x32xf32>
    %cst_171 = arith.constant 1.000000e+00 : f32
    %447 = vector.broadcast %cst_171 : f32 to vector<8x32xf32>
    %448 = arith.subf %447, %440 : vector<8x32xf32>
    %449 = arith.mulf %448, %446 : vector<8x32xf32>
    %450 = arith.mulf %440, %418 : vector<8x32xf32>
    %451 = arith.addf %449, %450 : vector<8x32xf32>
    %c0_172 = arith.constant 0 : index
    %c40_173 = arith.constant 40 : index
    %c0_174 = arith.constant 0 : index
    %452 = vector.load %arg6[%c0_172, %c40_173, %c0_174] : memref<3x64x32xf32, #tpu.memory_space<vmem>>, vector<1x8x32xf32>
    %453 = vector.shape_cast %452 : vector<1x8x32xf32> to vector<8x32xf32>
    %454 = vector.shape_cast %451 : vector<8x32xf32> to vector<1x8x32xf32>
    tpu.vector_store %arg6[%c0_172, %c40_173, %c0_174], %454 {strides = array<i32>} : memref<3x64x32xf32, #tpu.memory_space<vmem>>, vector<1x8x32xf32>,
    %c0_175 = arith.constant 0 : index
    %c48 = arith.constant 48 : index
    %c0_176 = arith.constant 0 : index
    %455 = vector.load %arg7[%c0_175, %c48, %c0_176] : memref<3x64x384xf32, #tpu.memory_space<vmem>>, vector<1x8x384xf32>
    %456 = vector.shape_cast %455 : vector<1x8x384xf32> to vector<8x384xf32>
    %cst_177 = arith.constant dense<0.000000e+00> : vector<8x384xf32>
    %457 = tpu.matmul %451, %39, %cst_177 {dimension_numbers = #tpu.dot_dimension_numbers<[1], [0], [0], [1], [0, 0, 1, 1], [], []>} : vector<8x32xf32>, vector<32x384xf32>, vector<8x384xf32> -> vector<8x384xf32>
    %458 = vector.extract_strided_slice %456 {offsets = [0, 0], sizes = [8, 32], strides = [1, 1]} : vector<8x384xf32> to vector<8x32xf32>
    %459 = vector.extract_strided_slice %457 {offsets = [0, 0], sizes = [8, 32], strides = [1, 1]} : vector<8x384xf32> to vector<8x32xf32>
    %460 = arith.addf %458, %459 : vector<8x32xf32>
    %461 = arith.negf %460 : vector<8x32xf32>
    %462 = math.exp %461 : vector<8x32xf32>
    %cst_178 = arith.constant 1.000000e+00 : f32
    %463 = vector.broadcast %cst_178 : f32 to vector<8x32xf32>
    %464 = arith.addf %463, %462 : vector<8x32xf32>
    %465 = arith.divf %463, %464 : vector<8x32xf32>
    %466 = vector.extract_strided_slice %456 {offsets = [0, 128], sizes = [8, 32], strides = [1, 1]} : vector<8x384xf32> to vector<8x32xf32>
    %467 = vector.extract_strided_slice %457 {offsets = [0, 128], sizes = [8, 32], strides = [1, 1]} : vector<8x384xf32> to vector<8x32xf32>
    %468 = arith.addf %466, %467 : vector<8x32xf32>
    %469 = arith.negf %468 : vector<8x32xf32>
    %470 = math.exp %469 : vector<8x32xf32>
    %cst_179 = arith.constant 1.000000e+00 : f32
    %471 = vector.broadcast %cst_179 : f32 to vector<8x32xf32>
    %472 = arith.addf %471, %470 : vector<8x32xf32>
    %473 = arith.divf %471, %472 : vector<8x32xf32>
    %474 = vector.extract_strided_slice %456 {offsets = [0, 256], sizes = [8, 32], strides = [1, 1]} : vector<8x384xf32> to vector<8x32xf32>
    %475 = vector.extract_strided_slice %457 {offsets = [0, 256], sizes = [8, 32], strides = [1, 1]} : vector<8x384xf32> to vector<8x32xf32>
    %476 = arith.addf %475, %47 : vector<8x32xf32>
    %477 = arith.mulf %465, %476 : vector<8x32xf32>
    %478 = arith.addf %474, %477 : vector<8x32xf32>
    %479 = math.tanh %478 : vector<8x32xf32>
    %cst_180 = arith.constant 1.000000e+00 : f32
    %480 = vector.broadcast %cst_180 : f32 to vector<8x32xf32>
    %481 = arith.subf %480, %473 : vector<8x32xf32>
    %482 = arith.mulf %481, %479 : vector<8x32xf32>
    %483 = arith.mulf %473, %451 : vector<8x32xf32>
    %484 = arith.addf %482, %483 : vector<8x32xf32>
    %c0_181 = arith.constant 0 : index
    %c48_182 = arith.constant 48 : index
    %c0_183 = arith.constant 0 : index
    %485 = vector.load %arg6[%c0_181, %c48_182, %c0_183] : memref<3x64x32xf32, #tpu.memory_space<vmem>>, vector<1x8x32xf32>
    %486 = vector.shape_cast %485 : vector<1x8x32xf32> to vector<8x32xf32>
    %487 = vector.shape_cast %484 : vector<8x32xf32> to vector<1x8x32xf32>
    tpu.vector_store %arg6[%c0_181, %c48_182, %c0_183], %487 {strides = array<i32>} : memref<3x64x32xf32, #tpu.memory_space<vmem>>, vector<1x8x32xf32>,
    %c0_184 = arith.constant 0 : index
    %c56 = arith.constant 56 : index
    %c0_185 = arith.constant 0 : index
    %488 = vector.load %arg7[%c0_184, %c56, %c0_185] : memref<3x64x384xf32, #tpu.memory_space<vmem>>, vector<1x8x384xf32>
    %489 = vector.shape_cast %488 : vector<1x8x384xf32> to vector<8x384xf32>
    %cst_186 = arith.constant dense<0.000000e+00> : vector<8x384xf32>
    %490 = tpu.matmul %484, %39, %cst_186 {dimension_numbers = #tpu.dot_dimension_numbers<[1], [0], [0], [1], [0, 0, 1, 1], [], []>} : vector<8x32xf32>, vector<32x384xf32>, vector<8x384xf32> -> vector<8x384xf32>
    %491 = vector.extract_strided_slice %489 {offsets = [0, 0], sizes = [8, 32], strides = [1, 1]} : vector<8x384xf32> to vector<8x32xf32>
    %492 = vector.extract_strided_slice %490 {offsets = [0, 0], sizes = [8, 32], strides = [1, 1]} : vector<8x384xf32> to vector<8x32xf32>
    %493 = arith.addf %491, %492 : vector<8x32xf32>
    %494 = arith.negf %493 : vector<8x32xf32>
    %495 = math.exp %494 : vector<8x32xf32>
    %cst_187 = arith.constant 1.000000e+00 : f32
    %496 = vector.broadcast %cst_187 : f32 to vector<8x32xf32>
    %497 = arith.addf %496, %495 : vector<8x32xf32>
    %498 = arith.divf %496, %497 : vector<8x32xf32>
    %499 = vector.extract_strided_slice %489 {offsets = [0, 128], sizes = [8, 32], strides = [1, 1]} : vector<8x384xf32> to vector<8x32xf32>
    %500 = vector.extract_strided_slice %490 {offsets = [0, 128], sizes = [8, 32], strides = [1, 1]} : vector<8x384xf32> to vector<8x32xf32>
    %501 = arith.addf %499, %500 : vector<8x32xf32>
    %502 = arith.negf %501 : vector<8x32xf32>
    %503 = math.exp %502 : vector<8x32xf32>
    %cst_188 = arith.constant 1.000000e+00 : f32
    %504 = vector.broadcast %cst_188 : f32 to vector<8x32xf32>
    %505 = arith.addf %504, %503 : vector<8x32xf32>
    %506 = arith.divf %504, %505 : vector<8x32xf32>
    %507 = vector.extract_strided_slice %489 {offsets = [0, 256], sizes = [8, 32], strides = [1, 1]} : vector<8x384xf32> to vector<8x32xf32>
    %508 = vector.extract_strided_slice %490 {offsets = [0, 256], sizes = [8, 32], strides = [1, 1]} : vector<8x384xf32> to vector<8x32xf32>
    %509 = arith.addf %508, %47 : vector<8x32xf32>
    %510 = arith.mulf %498, %509 : vector<8x32xf32>
    %511 = arith.addf %507, %510 : vector<8x32xf32>
    %512 = math.tanh %511 : vector<8x32xf32>
    %cst_189 = arith.constant 1.000000e+00 : f32
    %513 = vector.broadcast %cst_189 : f32 to vector<8x32xf32>
    %514 = arith.subf %513, %506 : vector<8x32xf32>
    %515 = arith.mulf %514, %512 : vector<8x32xf32>
    %516 = arith.mulf %506, %484 : vector<8x32xf32>
    %517 = arith.addf %515, %516 : vector<8x32xf32>
    %c0_190 = arith.constant 0 : index
    %c56_191 = arith.constant 56 : index
    %c0_192 = arith.constant 0 : index
    %518 = vector.load %arg6[%c0_190, %c56_191, %c0_192] : memref<3x64x32xf32, #tpu.memory_space<vmem>>, vector<1x8x32xf32>
    %519 = vector.shape_cast %518 : vector<1x8x32xf32> to vector<8x32xf32>
    %520 = vector.shape_cast %517 : vector<8x32xf32> to vector<1x8x32xf32>
    tpu.vector_store %arg6[%c0_190, %c56_191, %c0_192], %520 {strides = array<i32>} : memref<3x64x32xf32, #tpu.memory_space<vmem>>, vector<1x8x32xf32>,
    return
  }
  func.func @transform_0(%arg0: i32) -> (i32, i32, i32) {
    %c0_i32 = arith.constant 0 : i32
    %c0_i32_0 = arith.constant 0 : i32
    %c0_i32_1 = arith.constant 0 : i32
    %c0_i32_2 = arith.constant 0 : i32
    return %c0_i32, %c0_i32_0, %c0_i32_1 : i32, i32, i32
  }
  func.func @transform_1(%arg0: i32) -> (i32, i32, i32) {
    %c0_i32 = arith.constant 0 : i32
    %c0_i32_0 = arith.constant 0 : i32
    %c0_i32_1 = arith.constant 0 : i32
    %c0_i32_2 = arith.constant 0 : i32
    return %c0_i32, %c0_i32_0, %c0_i32_1 : i32, i32, i32
  }
  func.func @transform_2(%arg0: i32) -> (i32, i32, i32) {
    %c0_i32 = arith.constant 0 : i32
    %c0_i32_0 = arith.constant 0 : i32
    %c0_i32_1 = arith.constant 0 : i32
    %c0_i32_2 = arith.constant 0 : i32
    return %c0_i32, %c0_i32_0, %c0_i32_1 : i32, i32, i32
  }
  func.func @transform_3(%arg0: i32) -> (i32, i32, i32) {
    %c0_i32 = arith.constant 0 : i32
    %c0_i32_0 = arith.constant 0 : i32
    %c0_i32_1 = arith.constant 0 : i32
    %c0_i32_2 = arith.constant 0 : i32
    return %c0_i32, %c0_i32_0, %c0_i32_1 : i32, i32, i32
  }
  func.func @transform_4(%arg0: i32) -> (i32, i32, i32) {
    %c0_i32 = arith.constant 0 : i32
    %c0_i32_0 = arith.constant 0 : i32
    %c0_i32_1 = arith.constant 0 : i32
    %c0_i32_2 = arith.constant 0 : i32
    return %c0_i32, %c0_i32_0, %c0_i32_1 : i32, i32, i32
  }
  func.func @transform_5(%arg0: i32) -> (i32, i32, i32) {
    %c0_i32 = arith.constant 0 : i32
    %c0_i32_0 = arith.constant 0 : i32
    %c0_i32_1 = arith.constant 0 : i32
    %c0_i32_2 = arith.constant 0 : i32
    return %c0_i32, %c0_i32_0, %c0_i32_1 : i32, i32, i32
  }
}

</mosaic_0001>

<bundles_post_ra>
// kernel: drnn_forward.1
= control target key start
LH: loop header
LB: loop body
LE: loop exit
PB: predicated region body
PF: predicated region fallthrough
CT: control target
= control target key end

     0   :  { %vm67_vm0 = vcmask 130048   ;;  %vm20_vm1 = vcmask 261120   ;;  %s4045_s1 = inlined_call_operand.vmem [shape: f32[3,16,384], index: 1, kind: input, shape index: {}]   ;;  %s4046_s0 = inlined_call_operand.vmem [shape: f32[3,64,16], index: 0, kind: input, shape index: {}]   ;;  %s4047_s2 = inlined_call_operand.vmem [shape: f32[3,32,384], index: 2, kind: input, shape index: {}]   ;;  %s4048_s4 = inlined_call_operand.vmem [shape: f32[3,1,32], index: 4, kind: input, shape index: {}]   ;;  %s4049_s3 = inlined_call_operand.vmem [shape: f32[3,1,384], index: 3, kind: input, shape index: {}]   ;;  %s4050_s5 = inlined_call_operand.vmem [shape: f32[3,64,32], index: 5, kind: output, shape index: {}]  }
   0x1   :  { %v57_v0 = vld [vmem:[%s4045_s1 + $0x20] sm:$0xff]  ;;  %v58_v1 = vld [vmem:[%s4045_s1 + $0x28] sm:$0xff]  ;;  %v55_v3 = vld [vmem:[%s4045_s1 + $0x10] sm:$0xff] }
   0x2   :  { %v54_v2 = vld [vmem:[%s4045_s1 + $0x8] sm:$0xff]  ;;  %147 = vmatpush.msra.mxu1 %v57_v0  ;;  %188 = vmatpush.msra.mxu2 %v58_v1  ;;  %v45_v4 = vld [vmem:[%s4046_s0] sm:$0xff]  ;;  %v2332_v5 = vld [vmem:[%s4045_s1 + $0x58] sm:$0xff] }
   0x3   :  { %v2369_v6 = vld [vmem:[%s4045_s1 + $0x78] sm:$0xff]  ;;  %v2330_v7 = vld [vmem:[%s4045_s1 + $0x48] sm:$0xff]  ;;  %v2327_v8 = vld [vmem:[%s4045_s1 + $0x30] sm:$0xff] }
   0x4   :  { %148 = vmatpush.msra.mxu1 %v54_v2  ;;  %189 = vmatpush.msra.mxu2 %v55_v3  ;;  %v2329_v9 = vld [vmem:[%s4045_s1 + $0x40] sm:$0xff]  ;;  %v46_v13 = vld [vmem:[%s4046_s0 + $0x8] sm:$0xff]  ;;  %v56_v14 = vld [vmem:[%s4045_s1 + $0x18] sm:$0xff]  ;;  %v4051_v3 = vmov 0.0  }
   0x5   :  { %2303 = vmatmul.msk.f32.vlgmr.msra.gmra.mxu1 %vm67_vm0, %v45_v4  ;;  %2311 = vmatmul.msk.f32.vlgmr.msra.gmra.mxu2 %vm67_vm0, %v45_v4  ;;  %v2366_v10 = vld [vmem:[%s4045_s1 + $0x60] sm:$0xff]  ;;  %v2746_v16 = vld [vmem:[%s4046_s0 + $0x48] sm:$0xff]  ;;  %v47_v17 = vld [vmem:[%s4046_s0 + $0x10] sm:$0xff] }
   0x6   :  { %384 = vmatpush.msrb.mxu1 %v2332_v5  ;;  %499 = vmatpush.msrb.mxu2 %v2369_v6  ;;  %v2725_v11 = vld [vmem:[%s4046_s0 + $0x40] sm:$0xff]  ;;  %v2367_v18 = vld [vmem:[%s4045_s1 + $0x68] sm:$0xff]  ;;  %v2762_v19 = vld [vmem:[%s4046_s0 + $0x50] sm:$0xff] }
   0x7   :  { %302 = vmatpush.msra.mxu3 %v2330_v7  ;;  %v2370_v12 = vld [vmem:[%s4045_s1 + $0x80] sm:$0xff]  ;;  %106 = vmatpush.msra.mxu0 %v56_v14  ;;  %v48_v20 = vld [vmem:[%s4046_s0 + $0x18] sm:$0xff]  ;;  %v2788_v23 = vld [vmem:[%s4047_s2 + $0x48] sm:$0xff] }
   0x8   :  { %385 = vmatpush.msrb.mxu1 %v2329_v9  ;;  %500 = vmatpush.msrb.mxu2 %v2366_v10  ;;  %v53_v15 = vld [vmem:[%s4045_s1] sm:$0xff]  ;;  %v2775_v21 = vld [vmem:[%s4046_s0 + $0x58] sm:$0xff]  ;;  %v2793_v24 = vld [vmem:[%s4047_s2 + $0x50] sm:$0xff] }
   0x9   :  { %303 = vmatpush.msra.mxu3 %v2327_v8  ;;  %107 = vmatpush.msra.mxu0 %v53_v15  ;;  %v49_v22 = vld [vmem:[%s4046_s0 + $0x20] sm:$0xff]  ;;  %v50_v26 = vld [vmem:[%s4046_s0 + $0x28] sm:$0xff]  ;;  %v51_v28 = vld [vmem:[%s4046_s0 + $0x30] sm:$0xff] }
   0xa   :  { %2334 = vmatmul.msk.f32.vlgmr.msra.gmra.mxu3 %vm67_vm0, %v2725_v11  ;;  %2295 = vmatmul.msk.f32.vlgmr.msra.gmra.mxu0 %vm67_vm0, %v45_v4  ;;  %v2800_v25 = vld [vmem:[%s4046_s0 + $0x60] sm:$0xff]  ;;  %v2813_v27 = vld [vmem:[%s4046_s0 + $0x68] sm:$0xff]  ;;  %v2826_v29 = vld [vmem:[%s4047_s2 + $0x30] sm:$0xff] }
   0xb   :  { %540 = vmatpush.msrb.mxu3 %v2370_v12  ;;  %703 = vmatpush.msra.mxu1 %v2788_v23  ;;  %v2831_v30 = vld [vmem:[%s4047_s2 + $0x38] sm:$0xff]  ;;  %v2843_v32 = vld [vmem:[%s4046_s0 + $0x70] sm:$0xff]  ;;  %v2863_v35 = vld [vmem:[%s4046_s0 + $0x80] sm:$0xff] }
   0xc   :  { %723 = vmatpush.msra.mxu2 %v2793_v24  ;;  %v2836_v31 = vld [vmem:[%s4047_s2 + $0x58] sm:$0xff]  ;;  %v2879_v37 = vld [vmem:[%s4047_s2 + $0x20] sm:$0xff]  ;;  %v2893_v39 = vld [vmem:[%s4046_s0 + $0x88] sm:$0xff] }
   0xd   :  { %2304 = vmatmul.msk.f32.gmra.mxu1 %vm67_vm0, %v46_v13  ;;  %2312 = vmatmul.msk.f32.gmra.mxu2 %vm67_vm0, %v46_v13  ;;  %v52_v33 = vld [vmem:[%s4046_s0 + $0x38] sm:$0xff]  ;;  %v2884_v38 = vld [vmem:[%s4047_s2 + $0x40] sm:$0xff]  ;;  %v2331_v40 = vld [vmem:[%s4045_s1 + $0x50] sm:$0xff] }
   0xe   :  { %541 = vmatpush.msrb.mxu3 %v2367_v18  ;;  %704 = vmatpush.msra.mxu1 %v2826_v29  ;;  %v2857_v34 = vld [vmem:[%s4046_s0 + $0x78] sm:$0xff]  ;;  %v2912_v42 = vld [vmem:[%s4046_s0 + $0x90] sm:$0xff]  ;;  %v2923_v43 = vld [vmem:[%s4047_s2] sm:$0xff] }
   0xf   :  { %724 = vmatpush.msra.mxu2 %v2831_v30  ;;  %v2874_v36 = vld [vmem:[%s4047_s2 + $0x18] sm:$0xff]  ;;  %343 = vmatpush.msrb.mxu0 %v2331_v40  ;;  %v2928_v44 = vld [vmem:[%s4047_s2 + $0x8] sm:$0xff]  ;;  %v2956_v47 = vld [vmem:[%s4046_s0 + $0xa0] sm:$0xff] }
  0x10   :  { %743 = vmatpush.msra.mxu3 %v2836_v31  ;;  %705 = vmatpush.msra.mxu1 %v2874_v36  ;;  %v2328_v41 = vld [vmem:[%s4045_s1 + $0x38] sm:$0xff]  ;;  %v2933_v45 = vld [vmem:[%s4047_s2 + $0x28] sm:$0xff]  ;;  %v2972_v49 = vld [vmem:[%s4047_s2 + $0xb0] sm:$0xff] }
  0x11   :  { %725 = vmatpush.msra.mxu2 %v2879_v37  ;;  %344 = vmatpush.msrb.mxu0 %v2328_v41  ;;  %v2943_v46 = vld [vmem:[%s4046_s0 + $0x98] sm:$0xff]  ;;  %v2967_v48 = vld [vmem:[%s4047_s2 + $0xa8] sm:$0xff]  ;;  %v2979_v50 = vld [vmem:[%s4047_s2 + $0x90] sm:$0xff] }
  0x12   :  { %2335 = vmatmul.msk.f32.gmra.mxu3 %vm67_vm0, %v2746_v16  ;;  %2296 = vmatmul.msk.f32.gmra.mxu0 %vm67_vm0, %v46_v13  ;;  %v2984_v51 = vld [vmem:[%s4047_s2 + $0x98] sm:$0xff]  ;;  %v2996_v53 = vld [vmem:[%s4047_s2 + $0x80] sm:$0xff]  ;;  %v3003_v54 = vld [vmem:[%s4046_s0 + $0xa8] sm:$0xff] }
  0x13   :  { %744 = vmatpush.msra.mxu3 %v2884_v38  ;;  %706 = vmatpush.msra.mxu1 %v2923_v43  ;;  %v2991_v52 = vld [vmem:[%s4047_s2 + $0x78] sm:$0xff]  ;;  %4067 = vst [vmem:[#allocation4_spill] sm:$0xff] %v2996_v53  ;;  %v3012_v55 = vld [vmem:[%s4047_s2 + $0x10] sm:$0xff]  ;;  %v3017_v56 = vld [vmem:[%s4047_s2 + $0x60] sm:$0xff] }
  0x14   :  { %726 = vmatpush.msra.mxu2 %v2928_v44  ;;  %4066 = vst [vmem:[#allocation3_spill] sm:$0xff] %v2991_v52  ;;  %v3022_v57 = vld [vmem:[%s4047_s2 + $0x68] sm:$0xff]  ;;  %v3036_v58 = vld [vmem:[%s4046_s0 + $0xb0] sm:$0xff]  ;;  %v3049_v59 = vld [vmem:[%s4046_s0 + $0xb8] sm:$0xff] }
  0x15   :  { %2305 = vmatmul.msk.f32.gmra.mxu1 %vm67_vm0, %v47_v17  ;;  %2313 = vmatmul.msk.f32.gmra.mxu2 %vm67_vm0, %v47_v17  ;;  %4068 = vst [vmem:[#allocation5_spill] sm:$0xff] %v3017_v56  ;;  %v3056_v60 = vld [vmem:[%s4047_s2 + $0xb8] sm:$0xff]  ;;  %v3061_v61 = vld [vmem:[%s4047_s2 + $0xa0] sm:$0xff]  ;;  %v3072_v62 = vld [vmem:[%s4047_s2 + $0x88] sm:$0xff] }
  0x16   :  { %745 = vmatpush.msra.mxu3 %v2933_v45  ;;  %4069 = vst [vmem:[#allocation6_spill] sm:$0xff] %v3022_v57  ;;  %v3078_v63 = vld [vmem:[%s4047_s2 + $0x70] sm:$0xff]  ;;  %v3089_v1 = vld [vmem:[%s4047_s2 + $0x108] sm:$0xff]  ;;  %v3107_v5 = vld [vmem:[%s4047_s2 + $0xf8] sm:$0xff] }
  0x17   :  { %4070 = vst [vmem:[#allocation7_spill] sm:$0xff] %v3072_v62  ;;  %v3094_v2 = vld [vmem:[%s4047_s2 + $0x110] sm:$0xff]  ;;  %v3114_v6 = vld [vmem:[%s4047_s2 + $0xd8] sm:$0xff]  ;;  %v3119_v7 = vld [vmem:[%s4047_s2 + $0xe0] sm:$0xff] }
  0x18   :  { %746 = vmatpush.msra.mxu3 %v3012_v55  ;;  %4071 = vst [vmem:[#allocation8_spill] sm:$0xff] %v3078_v63  ;;  %v3102_v4 = vld [vmem:[%s4047_s2 + $0xf0] sm:$0xff]  ;;  %v3128_v9 = vld [vmem:[%s4047_s2 + $0xc0] sm:$0xff]  ;;  %v3133_v10 = vld [vmem:[%s4047_s2 + $0xc8] sm:$0xff] }
  0x19   :  { %v3145_v12 = vld [vmem:[%s4047_s2 + $0x118] sm:$0xff]  ;;  %v3156_v14 = vld [vmem:[%s4047_s2 + $0x100] sm:$0xff] }
  0x1a   :  { %2336 = vmatmul.msk.f32.gmra.mxu3 %vm67_vm0, %v2762_v19  ;;  %2297 = vmatmul.msk.f32.gmra.mxu0 %vm67_vm0, %v47_v17  ;;  %v2371_v17 = vld [vmem:[%s4045_s1 + $0x88] sm:$0xff] }
  0x1b   :  { %581 = vmatpush.msra.mxu0 %v2371_v17 }
  0x1d   :  { %2306 = vmatmul.msk.f32.gmra.mxu1 %vm67_vm0, %v48_v20  ;;  %2314 = vmatmul.msk.f32.gmra.mxu2 %vm67_vm0, %v48_v20 }
  0x22   :  { %2337 = vmatmul.msk.f32.gmra.mxu3 %vm67_vm0, %v2775_v21  ;;  %2298 = vmatmul.msk.f32.gmra.mxu0 %vm67_vm0, %v48_v20  ;;  %v2368_v20 = vld [vmem:[%s4045_s1 + $0x70] sm:$0xff] }
  0x23   :  { %582 = vmatpush.msra.mxu0 %v2368_v20 }
  0x25   :  { %2307 = vmatmul.msk.f32.gmra.mxu1 %vm67_vm0, %v49_v22  ;;  %2315 = vmatmul.msk.f32.gmra.mxu2 %vm67_vm0, %v49_v22 }
  0x2a   :  { %2338 = vmatmul.msk.f32.gmra.mxu3 %vm67_vm0, %v2800_v25  ;;  %2299 = vmatmul.msk.f32.gmra.mxu0 %vm67_vm0, %v49_v22 }
  0x2d   :  { %2308 = vmatmul.msk.f32.gmra.mxu1 %vm67_vm0, %v50_v26  ;;  %2316 = vmatmul.msk.f32.gmra.mxu2 %vm67_vm0, %v50_v26 }
  0x32   :  { %2339 = vmatmul.msk.f32.gmra.mxu3 %vm67_vm0, %v2813_v27  ;;  %2300 = vmatmul.msk.f32.gmra.mxu0 %vm67_vm0, %v50_v26 }
  0x35   :  { %2309 = vmatmul.msk.f32.gmra.mxu1 %vm67_vm0, %v51_v28  ;;  %2317 = vmatmul.msk.f32.gmra.mxu2 %vm67_vm0, %v51_v28 }
  0x3a   :  { %2340 = vmatmul.msk.f32.gmra.mxu3 %vm67_vm0, %v2843_v32  ;;  %2301 = vmatmul.msk.f32.gmra.mxu0 %vm67_vm0, %v51_v28 }
  0x3d   :  { %2310 = vmatmul.msk.f32.gmra.mxu1 %vm67_vm0, %v52_v33  ;;  %2318 = vmatmul.msk.f32.gmra.mxu2 %vm67_vm0, %v52_v33 }
  0x42   :  { %2341 = vmatmul.msk.f32.gmra.mxu3 %vm67_vm0, %v2857_v34  ;;  %2302 = vmatmul.msk.f32.gmra.mxu0 %vm67_vm0, %v52_v33 }
  0x45   :  { %2350 = vmatmul.msk.f32.vlgmr.msrb.gmra.mxu1 %vm67_vm0, %v2725_v11  ;;  %2373 = vmatmul.msk.f32.vlgmr.msrb.gmra.mxu2 %vm67_vm0, %v2863_v35 }
  0x46   :  { %815 = vmatpush.msrb.mxu1 %v2967_v48  ;;  %835 = vmatpush.msrb.mxu2 %v2972_v49 }
  0x48   :  { %816 = vmatpush.msrb.mxu1 %v2979_v50  ;;  %836 = vmatpush.msrb.mxu2 %v2984_v51 }
  0x4a   :  { %2381 = vmatmul.msk.f32.vlgmr.msrb.gmra.mxu3 %vm67_vm0, %v2863_v35  ;;  %2342 = vmatmul.msk.f32.vlgmr.msrb.gmra.mxu0 %vm67_vm0, %v2725_v11 }
  0x4b   :  { %817 = vmatpush.msrb.mxu1 %v2991_v52  ;;  %837 = vmatpush.msrb.mxu2 %v2996_v53 }
  0x4c   :  { %855 = vmatpush.msrb.mxu3 %v3056_v60  ;;  %1619 = vmatpush.msrb.mxu0 %v2788_v23 }
  0x4d   :  { %2351 = vmatmul.msk.f32.gmra.mxu1 %vm67_vm0, %v2746_v16  ;;  %2374 = vmatmul.msk.f32.gmra.mxu2 %vm67_vm0, %v2893_v39 }
  0x4e   :  { %818 = vmatpush.msrb.mxu1 %v3017_v56  ;;  %838 = vmatpush.msrb.mxu2 %v3022_v57 }
  0x4f   :  { %856 = vmatpush.msrb.mxu3 %v3061_v61  ;;  %1620 = vmatpush.msrb.mxu0 %v2826_v29 }
  0x51   :  { %857 = vmatpush.msrb.mxu3 %v3072_v62  ;;  %1621 = vmatpush.msrb.mxu0 %v2874_v36 }
  0x52   :  { %2382 = vmatmul.msk.f32.gmra.mxu3 %vm67_vm0, %v2893_v39  ;;  %2343 = vmatmul.msk.f32.gmra.mxu0 %vm67_vm0, %v2746_v16  ;;  %v3165_v16 = vld [vmem:[%s4047_s2 + $0xe8] sm:$0xff] }
  0x53   :  { %858 = vmatpush.msrb.mxu3 %v3078_v63  ;;  %1622 = vmatpush.msrb.mxu0 %v2923_v43 }
  0x55   :  { %2352 = vmatmul.msk.f32.gmra.mxu1 %vm67_vm0, %v2762_v19  ;;  %2375 = vmatmul.msk.f32.gmra.mxu2 %vm67_vm0, %v2912_v42 }
  0x5a   :  { %2383 = vmatmul.msk.f32.gmra.mxu3 %vm67_vm0, %v2912_v42  ;;  %2344 = vmatmul.msk.f32.gmra.mxu0 %vm67_vm0, %v2762_v19  ;;  %v3177_v19 = vld [vmem:[%s4047_s2 + $0xd0] sm:$0xff] }
  0x5d   :  { %2353 = vmatmul.msk.f32.gmra.mxu1 %vm67_vm0, %v2775_v21  ;;  %2376 = vmatmul.msk.f32.gmra.mxu2 %vm67_vm0, %v2943_v46 }
  0x62   :  { %2384 = vmatmul.msk.f32.gmra.mxu3 %vm67_vm0, %v2943_v46  ;;  %2345 = vmatmul.msk.f32.gmra.mxu0 %vm67_vm0, %v2775_v21 }
  0x65   :  { %2354 = vmatmul.msk.f32.gmra.mxu1 %vm67_vm0, %v2800_v25  ;;  %2377 = vmatmul.msk.f32.gmra.mxu2 %vm67_vm0, %v2956_v47 }
  0x6a   :  { %2385 = vmatmul.msk.f32.gmra.mxu3 %vm67_vm0, %v2956_v47  ;;  %2346 = vmatmul.msk.f32.gmra.mxu0 %vm67_vm0, %v2800_v25 }
  0x6d   :  { %2355 = vmatmul.msk.f32.gmra.mxu1 %vm67_vm0, %v2813_v27  ;;  %2378 = vmatmul.msk.f32.gmra.mxu2 %vm67_vm0, %v3003_v54 }
  0x72   :  { %2386 = vmatmul.msk.f32.gmra.mxu3 %vm67_vm0, %v3003_v54  ;;  %2347 = vmatmul.msk.f32.gmra.mxu0 %vm67_vm0, %v2813_v27 }
  0x75   :  { %2356 = vmatmul.msk.f32.gmra.mxu1 %vm67_vm0, %v2843_v32  ;;  %2379 = vmatmul.msk.f32.gmra.mxu2 %vm67_vm0, %v3036_v58 }
  0x7a   :  { %2387 = vmatmul.msk.f32.gmra.mxu3 %vm67_vm0, %v3036_v58  ;;  %2348 = vmatmul.msk.f32.gmra.mxu0 %vm67_vm0, %v2843_v32 }
  0x7d   :  { %2357 = vmatmul.msk.f32.gmra.mxu1 %vm67_vm0, %v2857_v34  ;;  %2380 = vmatmul.msk.f32.gmra.mxu2 %vm67_vm0, %v3049_v59 }
  0x82   :  { %v3082_v0 = vpop.f32.mrf.mxu1  ;;  %2388 = vmatmul.msk.f32.gmra.mxu3 %vm67_vm0, %v3049_v59  ;;  %2349 = vmatmul.msk.f32.gmra.mxu0 %vm67_vm0, %v2857_v34 }
  0x85   :  { %707 = vmatmul.f32.vlgmr.msra.gmra.mxu1 %v4051_v3  ;;  %727 = vmatmul.f32.vlgmr.msra.gmra.mxu2 %v4051_v3 }
  0x86   :  { %928 = vmatpush.msra.mxu1 %v3089_v1  ;;  %948 = vmatpush.msra.mxu2 %v3094_v2 }
  0x87   :  { %v3159_v15 = vpop.f32.mrf.mxu0 }
  0x88   :  { %v3121_v8 = vpop.f32.mrf.mxu2  ;;  %929 = vmatpush.msra.mxu1 %v3102_v4  ;;  %949 = vmatpush.msra.mxu2 %v3107_v5 }
  0x8a   :  { %v3137_v11 = vpop.f32.mrf.mxu1  ;;  %930 = vmatpush.msra.mxu1 %v3114_v6  ;;  %950 = vmatpush.msra.mxu2 %v3119_v7 }
  0x8b   :  { %4072 = vst [vmem:[#allocation9_spill] sm:$0xff] %v3137_v11  ;;  %747 = vmatmul.f32.vlgmr.msra.gmra.mxu3 %v4051_v3  ;;  %2389 = vmatmul.msk.f32.vlgmr.msra.gmra.mxu0 %vm67_vm0, %v2863_v35 }
  0x8c   :  { %931 = vmatpush.msra.mxu1 %v3128_v9  ;;  %951 = vmatpush.msra.mxu2 %v3133_v10 }
  0x8d   :  { %819 = vmatmul.f32.vlgmr.msrb.gmra.mxu1 %v4051_v3  ;;  %839 = vmatmul.f32.vlgmr.msrb.gmra.mxu2 %v4051_v3  ;;  %v3151_v13 = vpop.f32.mrf.mxu3 }
  0x8e   :  { %968 = vmatpush.msra.mxu3 %v3145_v12  ;;  %1044 = vmatpush.msrb.mxu1 %v2788_v23 }
  0x8f   :  { %1064 = vmatpush.msrb.mxu2 %v2793_v24  ;;  %v3196_v25 = vpop.f32.mrf.mxu0  ;;  %1754 = vmatpush.msra.mxu0 %v2972_v49 }
  0x90   :  { %v3171_v18 = vpop.f32.mrf.mxu2  ;;  %969 = vmatpush.msra.mxu3 %v3156_v14  ;;  %1045 = vmatpush.msrb.mxu1 %v2826_v29  ;;  %4076 = vst [vmem:[#allocation13_spill] sm:$0xff] %v3196_v25 }
  0x91   :  { %4073 = vst [vmem:[#allocation10_spill] sm:$0xff] %v3171_v18  ;;  %1065 = vmatpush.msrb.mxu2 %v2831_v30  ;;  %1755 = vmatpush.msra.mxu0 %v2984_v51 }
  0x92   :  { %v3184_v21 = vpop.f32.mrf.mxu1  ;;  %970 = vmatpush.msra.mxu3 %v3165_v16  ;;  %1046 = vmatpush.msrb.mxu1 %v2874_v36 }
  0x93   :  { %4074 = vst [vmem:[#allocation11_spill] sm:$0xff] %v3184_v21  ;;  %859 = vmatmul.f32.vlgmr.msrb.gmra.mxu3 %v4051_v3  ;;  %1066 = vmatpush.msrb.mxu2 %v2879_v37 }
  0x94   :  { %971 = vmatpush.msra.mxu3 %v3177_v19  ;;  %1047 = vmatpush.msrb.mxu1 %v2923_v43 }
  0x95   :  { %932 = vmatmul.f32.vlgmr.msra.gmra.mxu1 %v4051_v3  ;;  %952 = vmatmul.f32.vlgmr.msra.gmra.mxu2 %v4051_v3  ;;  %v3194_v22 = vpop.f32.mrf.mxu3 }
  0x96   :  { %4075 = vst [vmem:[#allocation12_spill] sm:$0xff] %v3194_v22  ;;  %1084 = vmatpush.msrb.mxu3 %v2836_v31  ;;  %1067 = vmatpush.msrb.mxu2 %v2928_v44 }
  0x97   :  { %1159 = vmatpush.msra.mxu1 %v2967_v48  ;;  %v3220_v32 = vpop.f32.mrf.mxu0  ;;  %2390 = vmatmul.msk.f32.gmra.mxu0 %vm67_vm0, %v2893_v39  ;;  %v59_v39 = vld [vmem:[%s4049_s3] sm:$0x7] }
  0x98   :  { %v3202_v26 = vpop.f32.mrf.mxu2  ;;  %1085 = vmatpush.msrb.mxu3 %v2884_v38  ;;  %1179 = vmatpush.msra.mxu2 %v2972_v49  ;;  %4080 = vst [vmem:[#allocation17_spill] sm:$0xff] %v3220_v32  ;;  %v3247_v41 = vperm.slane %v59_v39, 2  ;;  %v3250_v20 = vperm.slane %v59_v39, 1 }
  0x99   :  { %4077 = vst [vmem:[#allocation14_spill] sm:$0xff] %v3202_v26  ;;  %1160 = vmatpush.msra.mxu1 %v2979_v50  ;;  %1756 = vmatpush.msra.mxu0 %v2996_v53 }
  0x9a   :  { %v3208_v27 = vpop.f32.mrf.mxu1  ;;  %1086 = vmatpush.msrb.mxu3 %v2933_v45  ;;  %1180 = vmatpush.msra.mxu2 %v2984_v51  ;;  %4085 = vst [vmem:[#allocation22_spill] sm:$0xff] %v3247_v41 }
  0x9b   :  { %4078 = vst [vmem:[#allocation15_spill] sm:$0xff] %v3208_v27  ;;  %972 = vmatmul.f32.vlgmr.msra.gmra.mxu3 %v4051_v3  ;;  %1161 = vmatpush.msra.mxu1 %v2991_v52 }
  0x9c   :  { %1087 = vmatpush.msrb.mxu3 %v3012_v55  ;;  %1181 = vmatpush.msra.mxu2 %v2996_v53 }
  0x9d   :  { %v3216_v28 = vpop.f32.mrf.mxu3  ;;  %1162 = vmatpush.msra.mxu1 %v3017_v56  ;;  %1757 = vmatpush.msra.mxu0 %v3022_v57 }
  0x9e   :  { %4079 = vst [vmem:[#allocation16_spill] sm:$0xff] %v3216_v28  ;;  %1199 = vmatpush.msra.mxu3 %v3056_v60  ;;  %1182 = vmatpush.msra.mxu2 %v3022_v57 }
  0x9f   :  { %v3243_v40 = vpop.f32.mrf.mxu0  ;;  %2391 = vmatmul.msk.f32.gmra.mxu0 %vm67_vm0, %v2912_v42 }
  0xa0   :  { %1200 = vmatpush.msra.mxu3 %v3061_v61  ;;  %v3227_v33 = vpop.f32.mrf.mxu2  ;;  %4084 = vst [vmem:[#allocation21_spill] sm:$0xff] %v3243_v40 }
  0xa1   :  { %4081 = vst [vmem:[#allocation18_spill] sm:$0xff] %v3227_v33 }
  0xa2   :  { %1201 = vmatpush.msra.mxu3 %v3072_v62  ;;  %v3232_v34 = vpop.f32.mrf.mxu1 }
  0xa3   :  { %4082 = vst [vmem:[#allocation19_spill] sm:$0xff] %v3232_v34 }
  0xa4   :  { %1202 = vmatpush.msra.mxu3 %v3078_v63 }
  0xa5   :  { %v3237_v35 = vpop.f32.mrf.mxu3 }
  0xa6   :  { %4083 = vst [vmem:[#allocation20_spill] sm:$0xff] %v3237_v35 }
  0xa7   :  { %v3259_v40 = vpop.f32.mrf.mxu0  ;;  %2392 = vmatmul.msk.f32.gmra.mxu0 %vm67_vm0, %v2943_v46 }
  0xa8   :  { %v203_v17 = vpop.f32.mrf.mxu2  ;;  %4088 = vst [vmem:[#allocation25_spill] sm:$0xff] %v3259_v40 }
  0xa9   :  { %v3253_v3 = vadd.f32 %v203_v17, %v3247_v41 }
  0xaa   :  { %v165_v34 = vpop.f32.mrf.mxu1 }
  0xab   :  { %4086 = vst [vmem:[#allocation23_spill] sm:$0xff] %v3253_v3  ;;  %v3257_v33 = vadd.f32 %v165_v34, %v3250_v20  ;;  %v3269_v3 = vperm.slane %v59_v39, 0 }
  0xad   :  { %4087 = vst [vmem:[#allocation24_spill] sm:$0xff] %v3257_v33  ;;  %v317_v35 = vpop.f32.mrf.mxu3 }
  0xaf   :  { %v124_v21 = vpop.f32.mrf.mxu0  ;;  %2393 = vmatmul.msk.f32.gmra.mxu0 %vm67_vm0, %v2956_v47 }
  0xb0   :  { %v206_v42 = vpop.f32.mrf.mxu2  ;;  %v3274_v34 = vadd.f32 %v124_v21, %v3269_v3 }
  0xb1   :  { %v3264_v27 = vadd.f32 %v206_v42, %v3247_v41 }
  0xb2   :  { %v168_v26 = vpop.f32.mrf.mxu1  ;;  %4091 = vst [vmem:[#allocation28_spill] sm:$0xff] %v3274_v34 }
  0xb3   :  { %4089 = vst [vmem:[#allocation26_spill] sm:$0xff] %v3264_v27  ;;  %v3267_v17 = vadd.f32 %v168_v26, %v3250_v20 }
  0xb5   :  { %4090 = vst [vmem:[#allocation27_spill] sm:$0xff] %v3267_v17  ;;  %v320_v28 = vpop.f32.mrf.mxu3 }
  0xb7   :  { %v127_v17 = vpop.f32.mrf.mxu0  ;;  %2394 = vmatmul.msk.f32.gmra.mxu0 %vm67_vm0, %v3003_v54  ;;  %v2333_v54 = vld [vmem:[%s4049_s3 + $0x3] sm:$0x7] }
  0xb8   :  { %v209_v35 = vpop.f32.mrf.mxu2  ;;  %v3285_v28 = vadd.f32 %v127_v17, %v3269_v3  ;;  %v259_v32 = vperm.slane %v2333_v54, 1 }
  0xb9   :  { %v3277_v46 = vadd.f32 %v209_v35, %v3247_v41 }
  0xba   :  { %v171_v42 = vpop.f32.mrf.mxu1  ;;  %4094 = vst [vmem:[#allocation31_spill] sm:$0xff] %v3285_v28 }
  0xbb   :  { %4092 = vst [vmem:[#allocation29_spill] sm:$0xff] %v3277_v46  ;;  %v3280_v27 = vadd.f32 %v171_v42, %v3250_v20 }
  0xbd   :  { %4093 = vst [vmem:[#allocation30_spill] sm:$0xff] %v3280_v27  ;;  %v323_v26 = vpop.f32.mrf.mxu3 }
  0xbe   :  { %v3302_v26 = vperm.slane %v2333_v54, 2 }
  0xbf   :  { %v130_v46 = vpop.f32.mrf.mxu0  ;;  %2395 = vmatmul.msk.f32.gmra.mxu0 %vm67_vm0, %v3036_v58 }
  0xc0   :  { %v212_v47 = vpop.f32.mrf.mxu2  ;;  %v3295_v42 = vadd.f32 %v130_v46, %v3269_v3 }
  0xc1   :  { %v3288_v21 = vadd.f32 %v212_v47, %v3247_v41 }
  0xc2   :  { %v3290_v39 = vpop.f32.mrf.mxu1  ;;  %4096 = vst [vmem:[#allocation33_spill] sm:$0xff] %v3295_v42 }
  0xc3   :  { %4095 = vst [vmem:[#allocation32_spill] sm:$0xff] %v3288_v21 }
  0xc5   :  { %v326_v35 = vpop.f32.mrf.mxu3 }
  0xc6   :  { %v3310_v35 = vld [vmem:[%s4049_s3 + $0x6] sm:$0x7] }
  0xc7   :  { %v346_v46 = vpop.f32.mrf.mxu0  ;;  %2396 = vmatmul.msk.f32.gmra.mxu0 %vm67_vm0, %v3049_v59  ;;  %v455_v42 = vperm.slane %v3310_v35, 0  ;;  %v4058_v34 = vperm.slane %v3310_v35, 1 }
  0xc8   :  { %v3300_v17 = vpop.f32.mrf.mxu2 }
  0xca   :  { %v390_v47 = vpop.f32.mrf.mxu1 }
  0xcb   :  { %v3305_v21 = vadd.f32 %v390_v47, %v3302_v26 }
  0xcd   :  { %4097 = vst [vmem:[#allocation34_spill] sm:$0xff] %v3305_v21  ;;  %v3312_v58 = vpop.f32.mrf.mxu3 }
  0xcf   :  { %v349_v18 = vpop.f32.mrf.mxu0 }
  0xd0   :  { %v505_v27 = vpop.f32.mrf.mxu2  ;;  %v3327_v22 = vadd.f32 %v349_v18, %v259_v32 }
  0xd1   :  { %v3317_v28 = vadd.f32 %v505_v27, %v455_v42 }
  0xd2   :  { %v393_v33 = vpop.f32.mrf.mxu1  ;;  %4101 = vst [vmem:[#allocation38_spill] sm:$0xff] %v3327_v22 }
  0xd3   :  { %4098 = vst [vmem:[#allocation35_spill] sm:$0xff] %v3317_v28  ;;  %v3320_v47 = vadd.f32 %v393_v33, %v3302_v26 }
  0xd5   :  { %4099 = vst [vmem:[#allocation36_spill] sm:$0xff] %v3320_v47  ;;  %v546_v40 = vpop.f32.mrf.mxu3 }
  0xd6   :  { %v3325_v21 = vadd.f32 %v546_v40, %v4058_v34 }
  0xd7   :  { %v352_v25 = vpop.f32.mrf.mxu0 }
  0xd8   :  { %4100 = vst [vmem:[#allocation37_spill] sm:$0xff] %v3325_v21  ;;  %v508_v59 = vpop.f32.mrf.mxu2  ;;  %v3332_v33 = vadd.f32 %v352_v25, %v259_v32  ;;  %v110_v25 = vadd.f32 %v3159_v15, %v3269_v3 }
  0xda   :  { %v396_v11 = vpop.f32.mrf.mxu1  ;;  %4103 = vst [vmem:[#allocation40_spill] sm:$0xff] %v3332_v33  ;;  %v3338_v33 = vperm.slane %v2333_v54, 0 }
  0xdb   :  { %v3330_v27 = vadd.f32 %v396_v11, %v3302_v26 }
  0xdd   :  { %4102 = vst [vmem:[#allocation39_spill] sm:$0xff] %v3330_v27  ;;  %v549_v28 = vpop.f32.mrf.mxu3 }
  0xdf   :  { %v355_v62 = vpop.f32.mrf.mxu0 }
  0xe0   :  { %v511_v47 = vpop.f32.mrf.mxu2  ;;  %v3334_v21 = vadd.f32 %v355_v62, %v259_v32  ;;  %v151_v62 = vadd.f32 %v3082_v0, %v3250_v20 }
  0xe2   :  { %v399_v63 = vpop.f32.mrf.mxu1  ;;  %4104 = vst [vmem:[#allocation41_spill] sm:$0xff] %v3334_v21 }
  0xe5   :  { %v552_v57 = vpop.f32.mrf.mxu3 }
  0xe7   :  { %v358_v18 = vpop.f32.mrf.mxu0 }
  0xe8   :  { %v514_v56 = vpop.f32.mrf.mxu2 }
  0xea   :  { %v402_v53 = vpop.f32.mrf.mxu1 }
  0xed   :  { %v555_v40 = vpop.f32.mrf.mxu3 }
  0xef   :  { %v361_v11 = vpop.f32.mrf.mxu0 }
  0xf0   :  { %v517_v34 = vpop.f32.mrf.mxu2 }
  0xf2   :  { %v405_v59 = vpop.f32.mrf.mxu1 }
  0xf5   :  { %v558_v22 = vpop.f32.mrf.mxu3 }
  0xf7   :  { %v364_v63 = vpop.f32.mrf.mxu0 }
  0xf8   :  { %v520_v52 = vpop.f32.mrf.mxu2 }
  0xfa   :  { %v408_v27 = vpop.f32.mrf.mxu1 }
  0xfb   :  { %v306_v27 = vadd.f32 %v3151_v13, %v3338_v33  ;;  %v4105_v13 = vmov 0.0  }
  0xfc   :  { %21 = vst.msk [vmem:[%s4050_s5] sm:$0xff] %vm20_vm1, %v4105_v13 }
  0xfd   :  { %v561_v28 = vpop.f32.mrf.mxu3  ;;  %33 = vst.msk [vmem:[%s4050_s5 + $0x60] sm:$0xff] %vm20_vm1, %v4105_v13 }
  0xfe   :  { %v347_v28 = vadd.f32 %v346_v46, %v259_v32  ;;  %34 = vst.msk [vmem:[%s4050_s5 + $0x68] sm:$0xff] %vm20_vm1, %v4105_v13 }
  0xff   :  { %v367_v52 = vpop.f32.mrf.mxu0  ;;  %35 = vst.msk [vmem:[%s4050_s5 + $0x70] sm:$0xff] %vm20_vm1, %v4105_v13 }
 0x100   :  { %v523_v47 = vpop.f32.mrf.mxu2  ;;  %36 = vst.msk [vmem:[%s4050_s5 + $0x78] sm:$0xff] %vm20_vm1, %v4105_v13 }
 0x101   :  { %v503_v47 = vadd.f32 %v3300_v17, %v455_v42  ;;  %39 = vst.msk [vmem:[%s4050_s5 + $0x90] sm:$0xff] %vm20_vm1, %v4105_v13 }
 0x102   :  { %v708_v57 = vpop.f32.mrf.mxu1  ;;  %40 = vst.msk [vmem:[%s4050_s5 + $0x98] sm:$0xff] %vm20_vm1, %v4105_v13 }
 0x103   :  { %v751_v56 = vadd.f32 %v708_v57, %v110_v25  ;;  %41 = vst.msk [vmem:[%s4050_s5 + $0xa0] sm:$0xff] %vm20_vm1, %v4105_v13 }
 0x104   :  { %42 = vst.msk [vmem:[%s4050_s5 + $0xa8] sm:$0xff] %vm20_vm1, %v4105_v13 }
 0x105   :  { %v2423_v53 = vmul.f32 -1.442695, %v751_v56  ;;  %v564_v34 = vpop.f32.mrf.mxu3  ;;  %43 = vst.msk [vmem:[%s4050_s5 + $0xb0] sm:$0xff] %vm20_vm1, %v4105_v13 }
 0x106   :  { %44 = vst.msk [vmem:[%s4050_s5 + $0xb8] sm:$0xff] %vm20_vm1, %v4105_v13 }
 0x107   :  { %2494 = vpow2.f32 %v2423_v53  ;;  %22 = vst.msk [vmem:[%s4050_s5 + $0x8] sm:$0xff] %vm20_vm1, %v4105_v13 }
 0x108   :  { %v728_v22 = vpop.f32.mrf.mxu2  ;;  %23 = vst.msk [vmem:[%s4050_s5 + $0x10] sm:$0xff] %vm20_vm1, %v4105_v13 }
 0x109   :  { %v771_v40 = vadd.f32 %v728_v22, %v151_v62  ;;  %v4106_v22 = vperm.slane %v3310_v35, 1  ;;  %24 = vst.msk [vmem:[%s4050_s5 + $0x18] sm:$0xff] %vm20_vm1, %v4105_v13 }
 0x10a   :  { %v820_v18 = vpop.f32.mrf.mxu1  ;;  %25 = vst.msk [vmem:[%s4050_s5 + $0x20] sm:$0xff] %vm20_vm1, %v4105_v13 }
 0x10b   :  { %v2424_v15 = vmul.f32 -1.442695, %v771_v40  ;;  %v863_v59 = vadd.f32 %v820_v18, %v306_v27  ;;  %v544_v52 = vadd.f32 %v3312_v58, %v4106_v22  ;;  %26 = vst.msk [vmem:[%s4050_s5 + $0x28] sm:$0xff] %vm20_vm1, %v4105_v13 }
 0x10c   :  { %27 = vst.msk [vmem:[%s4050_s5 + $0x30] sm:$0xff] %vm20_vm1, %v4105_v13 }
 0x10d   :  { %v2495_v11 = vpop.eup %2494  ;;  %2496 = vpow2.f32 %v2424_v15  ;;  %v2425_v54 = vmul.f32 -1.442695, %v863_v59  ;;  %v3390_v15 = vld [vmem:[%s4048_s4] ss:$0 sm:$0xff]  ;;  %28 = vst.msk [vmem:[%s4050_s5 + $0x38] sm:$0xff] %vm20_vm1, %v4105_v13 }
 0x10e   :  { %v3344_v25 = vadd.f32 1.0, %v2495_v11  ;;  %v748_v62 = vpop.f32.mrf.mxu3  ;;  %4107 = vst [vmem:[#allocation42_spill] sm:$0xff] %v3390_v15 }
 0x10f   :  { %2498 = vpow2.f32 %v2425_v54  ;;  %29 = vst.msk [vmem:[%s4050_s5 + $0x40] sm:$0xff] %vm20_vm1, %v4105_v13 }
 0x110   :  { %2500 = vrcp.f32 %v3344_v25  ;;  %v840_v0 = vpop.f32.mrf.mxu2  ;;  %v767_v11 = vand.u32 2147483648, %v3344_v25  ;;  %vm761_vm3 = vweird.f32 %v3344_v25  ;;  %30 = vst.msk [vmem:[%s4050_s5 + $0x48] sm:$0xff] %vm20_vm1, %v4105_v13 }
 0x111   :  { %v883_v63 = vadd.f32 %v840_v0, %v347_v28  ;;  %31 = vst.msk [vmem:[%s4050_s5 + $0x50] sm:$0xff] %vm20_vm1, %v4105_v13 }
 0x112   :  { %v933_v57 = vpop.f32.mrf.mxu1  ;;  %v768_v22 = vor.u32 1.1754944e-38, %v767_v11  ;;  %32 = vst.msk [vmem:[%s4050_s5 + $0x58] sm:$0xff] %vm20_vm1, %v4105_v13 }
 0x113   :  { %v2497_v32 = vpop.eup %2496  ;;  %v2426_v46 = vmul.f32 -1.442695, %v883_v63  ;;  %v976_v56 = vadd.f32 %v933_v57, %v503_v47  ;;  %v765_v47 = vand.u32 2147483647, %v3344_v25  ;;  %37 = vst.msk [vmem:[%s4050_s5 + $0x80] sm:$0xff] %vm20_vm1, %v4105_v13 }
 0x114   :  { %v3358_v53 = vadd.f32 1.0, %v2497_v32  ;;  %v791_v32 = vadd.f32 %v3390_v15, %v748_v62  ;;  %38 = vst.msk [vmem:[%s4050_s5 + $0x88] sm:$0xff] %vm20_vm1, %v4105_v13 }
 0x115   :  { %v2499_v42 = vpop.eup %2498  ;;  %2502 = vpow2.f32 %v2426_v46  ;;  %v2428_v17 = vmul.f32 -1.442695, %v976_v56  ;;  %vm766_vm5 = vcmp.eq.f32.partialorder %v765_v47, 8.507059e+37 }
 0x116   :  { %v2501_v34 = vpop.eup %2500  ;;  %2504 = vrcp.f32 %v3358_v53  ;;  %v3379_v27 = vadd.f32 1.0, %v2499_v42  ;;  %v787_v62 = vand.u32 2147483648, %v3358_v53  ;;  %vm781_vm7 = vweird.f32 %v3358_v53 }
 0x117   :  { %2506 = vpow2.f32 %v2428_v17  ;;  %v757_v40 = vmul.f32 %v2501_v34, %v3344_v25  ;;  %vm762_vm2 = vweird.f32 %v2501_v34  ;;  %v785_v17 = vand.u32 2147483647, %v3358_v53 }
 0x118   :  { %v953_v18 = vpop.f32.mrf.mxu2  ;;  %2508 = vrcp.f32 %v3379_v27  ;;  %vm763_vm4 = vmor %vm761_vm3, %vm762_vm2  ;;  %v788_v47 = vor.u32 1.1754944e-38, %v787_v62  ;;  %vm873_vm12 = vweird.f32 %v3379_v27 }
 0x119   :  { %v996_v58 = vadd.f32 %v953_v18, %v544_v52  ;;  %v758_v59 = vsub.f32 1.0, %v757_v40  ;;  %vm3474_vm8 = vcmp.eq.f32.partialorder %v785_v17, 8.507059e+37 }
 0x11b   :  { %v2503_v28 = vpop.eup %2502  ;;  %v2429_v54 = vmul.f32 -1.442695, %v996_v58  ;;  %v759_v0 = vmul.f32 %v2501_v34, %v758_v59  ;;  %v3449_v58 = vld [vmem:[%s4048_s4 + $0x1] ss:$0 sm:$0xff]  ;;  %v192_v59 = vadd.f32 %v3121_v8, %v3247_v41 }
 0x11c   :  { %v3415_v63 = vpop.eup %2504  ;;  %v3417_v57 = vadd.f32 1.0, %v2503_v28  ;;  %4108 = vst [vmem:[#allocation43_spill] sm:$0xff] %v3449_v58  ;;  %v860_v28 = vpop.f32.mrf.mxu3 }
 0x11d   :  { %v2507_v46 = vpop.eup %2506  ;;  %v777_v56 = vmul.f32 %v3415_v63, %v3358_v53  ;;  %2510 = vpow2.f32 %v2429_v54  ;;  %v760_v42 = vadd.f32 %v2501_v34, %v759_v0  ;;  %vm782_vm6 = vweird.f32 %v3415_v63 }
 0x11e   :  { %2512 = vrcp.f32 %v3417_v57  ;;  %v3442_v25 = vpop.eup %2508  ;;  %v3444_v40 = vadd.f32 1.0, %v2507_v46  ;;  %v903_v53 = vadd.f32 %v3449_v58, %v860_v28  ;;  %vm3493_vm9 = vmor %vm781_vm7, %vm782_vm6  ;;  %vm893_vm11 = vweird.f32 %v3417_v57 }
 0x11f   :  { %v778_v52 = vsub.f32 1.0, %v777_v56  ;;  %v764_v18 = vsel %vm763_vm4, %v2501_v34, %v760_v42  ;;  %v869_v34 = vmul.f32 %v3442_v25, %v3379_v27  ;;  %vm874_vm10 = vweird.f32 %v3442_v25 }
 0x120   :  { %v769_v11 = vsel %vm766_vm5, %v768_v22, %v764_v18  ;;  %2514 = vrcp.f32 %v3444_v40  ;;  %v877_v22 = vand.u32 2147483647, %v3379_v27  ;;  %vm875_vm14 = vmor %vm873_vm12, %vm874_vm10  ;;  %vm986_vm4 = vweird.f32 %v3444_v40 }
 0x121   :  { %v779_v54 = vmul.f32 %v3415_v63, %v778_v52  ;;  %v792_v0 = vmul.f32 %v791_v32, %v769_v11  ;;  %v870_v46 = vsub.f32 1.0, %v869_v34  ;;  %v897_v52 = vand.u32 2147483647, %v3417_v57 }
 0x122   :  { %v879_v11 = vand.u32 2147483648, %v3379_v27  ;;  %v388_v27 = vadd.f32 %v3290_v39, %v3302_v26  ;;  %vm878_vm0 = vcmp.eq.f32.partialorder %v877_v22, 8.507059e+37  ;;  %v4131_v39 = vld [vmem:[#allocation37_spill] sm:$0xff] }
 0x123   :  { %v2511_v32 = vpop.eup %2510  ;;  %v780_v56 = vadd.f32 %v3415_v63, %v779_v54  ;;  %v793_v42 = vadd.f32 %v792_v0, %v192_v59  ;;  %v871_v59 = vmul.f32 %v3442_v25, %v870_v46  ;;  %v899_v54 = vand.u32 2147483648, %v3417_v57 }
 0x124   :  { %v2513_v17 = vpop.eup %2512  ;;  %v3498_v18 = vadd.f32 1.0, %v2511_v32  ;;  %vm3543_vm15 = vcmp.eq.f32.partialorder %v897_v52, 8.507059e+37  ;;  %v973_v13 = vpop.f32.mrf.mxu3 }
 0x125   :  { %v889_v28 = vmul.f32 %v2513_v17, %v3417_v57  ;;  %v784_v34 = vsel %vm3493_vm9, %v3415_v63, %v780_v56  ;;  %2516 = vtanh.f32 %v793_v42  ;;  %vm894_vm13 = vweird.f32 %v2513_v17 }
 0x126   :  { %2518 = vrcp.f32 %v3498_v18  ;;  %v2515_v63 = vpop.eup %2514  ;;  %v789_v46 = vsel %vm3474_vm8, %v788_v47, %v784_v34  ;;  %v872_v32 = vadd.f32 %v3442_v25, %v871_v59  ;;  %v880_v56 = vor.u32 1.1754944e-38, %v879_v11  ;;  %vm3556_vm2 = vmor %vm893_vm11, %vm894_vm13 }
 0x127   :  { %v890_v0 = vsub.f32 1.0, %v889_v28  ;;  %v982_v42 = vmul.f32 %v2515_v63, %v3444_v40  ;;  %v900_v26 = vor.u32 1.1754944e-38, %v899_v54  ;;  %v795_v52 = vsub.f32 1.0, %v789_v46 }
 0x128   :  { %v876_v59 = vsel %vm875_vm14, %v3442_v25, %v872_v32  ;;  %v3563_v25 = vld [vmem:[%s4048_s4 + $0x2] ss:$0 sm:$0xff]  ;;  %v990_v32 = vand.u32 2147483647, %v3444_v40  ;;  %v992_v57 = vand.u32 2147483648, %v3444_v40  ;;  %vm987_vm3 = vweird.f32 %v2515_v63 }
 0x129   :  { %v891_v8 = vmul.f32 %v2513_v17, %v890_v0  ;;  %v881_v11 = vsel %vm878_vm0, %v880_v56, %v876_v59  ;;  %v983_v22 = vsub.f32 1.0, %v982_v42  ;;  %v797_v54 = vmul.f32 0.0, %v789_v46  ;;  %v584_v42 = vpop.f32.mrf.mxu0  ;;  %vm988_vm5 = vmor %vm986_vm4, %vm987_vm3 }
 0x12a   :  { %v904_v0 = vmul.f32 %v903_v53, %v881_v11  ;;  %v1016_v53 = vadd.f32 %v3563_v25, %v973_v13  ;;  %v993_v46 = vor.u32 1.1754944e-38, %v992_v57  ;;  %vm991_vm6 = vcmp.eq.f32.partialorder %v990_v32, 8.507059e+37  ;;  %v4129_v57 = vld [vmem:[#allocation38_spill] sm:$0xff] }
 0x12b   :  { %v2517_v28 = vpop.eup %2516  ;;  %v892_v34 = vadd.f32 %v2513_v17, %v891_v8  ;;  %v984_v58 = vmul.f32 %v2515_v63, %v983_v22  ;;  %vm1006_vm8 = vweird.f32 %v3498_v18  ;;  %v1010_v47 = vand.u32 2147483647, %v3498_v18 }
 0x12c   :  { %v2519_v62 = vpop.eup %2518  ;;  %v796_v21 = vmul.f32 %v2517_v28, %v795_v52  ;;  %v905_v41 = vadd.f32 %v904_v0, %v388_v27 }
 0x12d   :  { %v1002_v56 = vmul.f32 %v2519_v62, %v3498_v18  ;;  %v896_v59 = vsel %vm3556_vm2, %v2513_v17, %v892_v34  ;;  %v985_v15 = vadd.f32 %v2515_v63, %v984_v58  ;;  %v4117_v17 = vperm.slane %v3310_v35, 2 }
 0x12e   :  { %v3572_v8 = vadd.f32 %v797_v54, %v796_v21  ;;  %v901_v52 = vsel %vm3543_vm15, %v900_v26, %v896_v59  ;;  %2520 = vtanh.f32 %v905_v41  ;;  %vm1007_vm7 = vweird.f32 %v2519_v62 }
 0x12f   :  { %v1003_v11 = vsub.f32 1.0, %v1002_v56  ;;  %v989_v22 = vsel %vm988_vm5, %v2515_v63, %v985_v15  ;;  %v585_v27 = vadd.f32 %v584_v42, %v4117_v17  ;;  %v1012_v15 = vand.u32 2147483648, %v3498_v18  ;;  %vm3596_vm9 = vmor %vm1006_vm8, %vm1007_vm7 }
 0x130   :  { %799 = vst.msk [vmem:[%s4050_s5] sm:$0xff] %vm20_vm1, %v3572_v8  ;;  %2431 = vmatmul.msk.f32.vlgmr.msrb.gmra.mxu1 %vm20_vm1, %v3572_v8  ;;  %2432 = vmatmul.msk.f32.vlgmr.msrb.gmra.mxu2 %vm20_vm1, %v3572_v8  ;;  %v994_v21 = vsel %vm991_vm6, %v993_v46, %v989_v22  ;;  %v907_v40 = vsub.f32 1.0, %v901_v52  ;;  %v909_v26 = vmul.f32 0.0, %v901_v52  ;;  %vm1011_vm10 = vcmp.eq.f32.partialorder %v1010_v47, 8.507059e+37 }
 0x131   :  { %v1004_v41 = vmul.f32 %v2519_v62, %v1003_v11  ;;  %2433 = vmatmul.msk.f32.vlgmr.msrb.gmra.mxu3 %vm20_vm1, %v3572_v8  ;;  %1274 = vmatpush.msrb.mxu1 %v3089_v1  ;;  %v1017_v58 = vmul.f32 %v1016_v53, %v994_v21  ;;  %v1013_v28 = vor.u32 1.1754944e-38, %v1012_v15  ;;  %v4130_v53 = vld [vmem:[#allocation35_spill] sm:$0xff]  ;;  %v3670_v52 = vpop.f32.mrf.mxu0 }
 0x132   :  { %1294 = vmatpush.msrb.mxu2 %v3094_v2  ;;  %1314 = vmatpush.msrb.mxu3 %v3145_v12 }
 0x133   :  { %v1005_v63 = vadd.f32 %v2519_v62, %v1004_v41  ;;  %1275 = vmatpush.msrb.mxu1 %v3102_v4  ;;  %v1018_v1 = vadd.f32 %v1017_v58, %v585_v27 }
 0x134   :  { %1295 = vmatpush.msrb.mxu2 %v3107_v5  ;;  %1315 = vmatpush.msrb.mxu3 %v3156_v14  ;;  %v2521_v2 = vpop.eup %2520 }
 0x135   :  { %v1009_v12 = vsel %vm3596_vm9, %v2519_v62, %v1005_v63  ;;  %1276 = vmatpush.msrb.mxu1 %v3114_v6  ;;  %v908_v18 = vmul.f32 %v2521_v2, %v907_v40  ;;  %2522 = vtanh.f32 %v1018_v1 }
 0x136   :  { %1296 = vmatpush.msrb.mxu2 %v3119_v7  ;;  %1316 = vmatpush.msrb.mxu3 %v3165_v16  ;;  %v1014_v4 = vsel %vm1011_vm10, %v1013_v28, %v1009_v12 }
 0x137   :  { %1277 = vmatpush.msrb.mxu1 %v3128_v9  ;;  %v3608_v5 = vadd.f32 %v909_v26, %v908_v18  ;;  %v1020_v6 = vsub.f32 1.0, %v1014_v4 }
 0x138   :  { %1297 = vmatpush.msrb.mxu2 %v3133_v10  ;;  %1317 = vmatpush.msrb.mxu3 %v3177_v19  ;;  %v1022_v10 = vmul.f32 0.0, %v1014_v4 }
 0x139   :  { %2427 = vst.msk [vmem:[%s4050_s5 + $0x40] sm:$0xff] %vm20_vm1, %v3608_v5  ;;  %2436 = vmatmul.msk.f32.vlgmr.msra.gmra.mxu1 %vm20_vm1, %v3608_v5  ;;  %2437 = vmatmul.msk.f32.vlgmr.msra.gmra.mxu2 %vm20_vm1, %v3608_v5  ;;  %v590_v4 = vpop.f32.mrf.mxu0 }
 0x13a   :  { %2438 = vmatmul.msk.f32.vlgmr.msra.gmra.mxu3 %vm20_vm1, %v3608_v5  ;;  %1389 = vmatpush.msra.mxu1 %v2788_v23  ;;  %v4120_v23 = vld [vmem:[#allocation3_spill] sm:$0xff] }
 0x13b   :  { %v2523_v7 = vpop.eup %2522  ;;  %1409 = vmatpush.msra.mxu2 %v2793_v24  ;;  %1429 = vmatpush.msra.mxu3 %v2836_v31  ;;  %v4121_v24 = vld [vmem:[#allocation4_spill] sm:$0xff]  ;;  %v4124_v31 = vld [vmem:[#allocation6_spill] sm:$0xff] }
 0x13c   :  { %v1021_v9 = vmul.f32 %v2523_v7, %v1020_v6  ;;  %1390 = vmatpush.msra.mxu1 %v2826_v29  ;;  %v4122_v29 = vld [vmem:[#allocation7_spill] sm:$0xff]  ;;  %v4132_v7 = vld [vmem:[#allocation42_spill] sm:$0xff] }
 0x13d   :  { %1410 = vmatpush.msra.mxu2 %v2831_v30  ;;  %1430 = vmatpush.msra.mxu3 %v2884_v38  ;;  %v4123_v30 = vld [vmem:[#allocation5_spill] sm:$0xff] }
 0x13e   :  { %v3629_v14 = vadd.f32 %v1022_v10, %v1021_v9  ;;  %1391 = vmatpush.msra.mxu1 %v2874_v36  ;;  %v4125_v36 = vld [vmem:[#allocation8_spill] sm:$0xff] }
 0x13f   :  { %1411 = vmatpush.msra.mxu2 %v2879_v37  ;;  %1431 = vmatpush.msra.mxu3 %v2933_v45  ;;  %v4126_v37 = vld [vmem:[#allocation13_spill] sm:$0xff] }
 0x140   :  { %2430 = vst.msk [vmem:[%s4050_s5 + $0x80] sm:$0xff] %vm20_vm1, %v3629_v14  ;;  %1392 = vmatpush.msra.mxu1 %v2923_v43  ;;  %v113_v38 = vadd.f32 %v4126_v37, %v3269_v3 }
 0x141   :  { %2442 = vmatmul.msk.f32.vlgmr.msrb.gmra.mxu1 %vm20_vm1, %v3629_v14  ;;  %2443 = vmatmul.msk.f32.vlgmr.msrb.gmra.mxu2 %vm20_vm1, %v3629_v14 }
 0x142   :  { %2444 = vmatmul.msk.f32.vlgmr.msrb.gmra.mxu3 %vm20_vm1, %v3629_v14  ;;  %1412 = vmatpush.msra.mxu2 %v2928_v44 }
 0x143   :  { %1432 = vmatpush.msra.mxu3 %v3012_v55  ;;  %1504 = vmatpush.msrb.mxu1 %v2967_v48  ;;  %v4127_v48 = vld [vmem:[#allocation9_spill] sm:$0xff]  ;;  %v4128_v55 = vld [vmem:[#allocation12_spill] sm:$0xff] }
 0x144   :  { %1524 = vmatpush.msrb.mxu2 %v2972_v49  ;;  %v154_v49 = vadd.f32 %v4127_v48, %v3250_v20 }
 0x145   :  { %1544 = vmatpush.msrb.mxu3 %v3056_v60  ;;  %1505 = vmatpush.msrb.mxu1 %v2979_v50  ;;  %v309_v60 = vadd.f32 %v4128_v55, %v3338_v33 }
 0x146   :  { %1525 = vmatpush.msrb.mxu2 %v2984_v51 }
 0x147   :  { %1545 = vmatpush.msrb.mxu3 %v3061_v61  ;;  %1506 = vmatpush.msrb.mxu1 %v4120_v23 }
 0x148   :  { %1526 = vmatpush.msrb.mxu2 %v4121_v24 }
 0x149   :  { %1546 = vmatpush.msrb.mxu3 %v4122_v29  ;;  %1507 = vmatpush.msrb.mxu1 %v4123_v30 }
 0x14a   :  { %1527 = vmatpush.msrb.mxu2 %v4124_v31  ;;  %v4133_v31 = vld [vmem:[#allocation22_spill] sm:$0xff] }
 0x14b   :  { %1547 = vmatpush.msrb.mxu3 %v4125_v36  ;;  %v4134_v36 = vld [vmem:[#allocation10_spill] sm:$0xff] }
 0x14c   :  { %v195_v37 = vadd.f32 %v4134_v36, %v4133_v31 }
 0x1ad   :  { %v1049_v43 = vpop.f32.mrf.mxu1 }
 0x1ae   :  { %v1092_v44 = vadd.f32 %v1049_v43, %v113_v38 }
 0x1b0   :  { %v2434_v45 = vmul.f32 -1.442695, %v1092_v44 }
 0x1b2   :  { %2524 = vpow2.f32 %v2434_v45 }
 0x1b3   :  { %v1069_v50 = vpop.f32.mrf.mxu2 }
 0x1b4   :  { %v1112_v51 = vadd.f32 %v1069_v50, %v154_v49  ;;  %v1089_v58 = vpop.f32.mrf.mxu3 }
 0x1b5   :  { %v1132_v9 = vadd.f32 %v4132_v7, %v1089_v58 }
 0x1b6   :  { %v2435_v61 = vmul.f32 -1.442695, %v1112_v51  ;;  %v1164_v16 = vpop.f32.mrf.mxu1 }
 0x1b7   :  { %v1207_v62 = vadd.f32 %v1164_v16, %v309_v60 }
 0x1b8   :  { %v2525_v19 = vpop.eup %2524  ;;  %2526 = vpow2.f32 %v2435_v61 }
 0x1b9   :  { %v1096_v34 = vadd.f32 1.0, %v2525_v19  ;;  %v2439_v0 = vmul.f32 -1.442695, %v1207_v62 }
 0x1bb   :  { %2528 = vrcp.f32 %v1096_v34  ;;  %v1108_v15 = vand.u32 2147483648, %v1096_v34  ;;  %v1106_v47 = vand.u32 2147483647, %v1096_v34  ;;  %vm1102_vm12 = vweird.f32 %v1096_v34 }
 0x1bc   :  { %2530 = vpow2.f32 %v2439_v0  ;;  %v1184_v13 = vpop.f32.mrf.mxu2 }
 0x1bd   :  { %v1227_v54 = vadd.f32 %v1184_v13, %v4129_v57  ;;  %v1109_v6 = vor.u32 1.1754944e-38, %v1108_v15  ;;  %vm1107_vm14 = vcmp.eq.f32.partialorder %v1106_v47, 8.507059e+37 }
 0x1be   :  { %v2527_v32 = vpop.eup %2526  ;;  %v1279_v59 = vpop.f32.mrf.mxu1 }
 0x1bf   :  { %v3667_v56 = vadd.f32 1.0, %v2527_v32  ;;  %v2440_v42 = vmul.f32 -1.442695, %v1227_v54  ;;  %v1322_v11 = vadd.f32 %v1279_v59, %v4130_v53  ;;  %v593_v32 = vpop.f32.mrf.mxu0  ;;  %v1204_v54 = vpop.f32.mrf.mxu3 }
 0x1c1   :  { %v2529_v46 = vpop.eup %2528  ;;  %2532 = vrcp.f32 %v3667_v56  ;;  %v2445_v27 = vmul.f32 -1.442695, %v1322_v11  ;;  %v1128_v38 = vand.u32 2147483648, %v3667_v56  ;;  %v1126_v49 = vand.u32 2147483647, %v3667_v56 }
 0x1c2   :  { %v2531_v22 = vpop.eup %2530  ;;  %v1098_v17 = vmul.f32 %v2529_v46, %v1096_v34  ;;  %2534 = vpow2.f32 %v2440_v42  ;;  %vm1103_vm11 = vweird.f32 %v2529_v46  ;;  %vm1122_vm0 = vweird.f32 %v3667_v56 }
 0x1c3   :  { %v3673_v41 = vadd.f32 1.0, %v2531_v22  ;;  %2536 = vpow2.f32 %v2445_v27  ;;  %vm1104_vm13 = vmor %vm1102_vm12, %vm1103_vm11  ;;  %v1129_v16 = vor.u32 1.1754944e-38, %v1128_v38  ;;  %vm1127_vm4 = vcmp.eq.f32.partialorder %v1126_v49, 8.507059e+37  ;;  %v2636_v49 = vld [vmem:[%s4047_s2 + $0xa8] sm:$0xff] }
 0x1c4   :  { %v1099_v21 = vsub.f32 1.0, %v1098_v17  ;;  %v1299_v40 = vpop.f32.mrf.mxu2  ;;  %v4137_v17 = vld [vmem:[#allocation43_spill] sm:$0xff] }
 0x1c5   :  { %2538 = vrcp.f32 %v3673_v41  ;;  %v1342_v1 = vadd.f32 %v1299_v40, %v4131_v39  ;;  %v1221_v19 = vand.u32 2147483647, %v3673_v41  ;;  %v1223_v62 = vand.u32 2147483648, %v3673_v41 }
 0x1c6   :  { %v1100_v63 = vmul.f32 %v2529_v46, %v1099_v21  ;;  %vm1217_vm5 = vweird.f32 %v3673_v41  ;;  %v1247_v27 = vadd.f32 %v4137_v17, %v1204_v54 }
 0x1c7   :  { %v2533_v26 = vpop.eup %2532  ;;  %v2446_v18 = vmul.f32 -1.442695, %v1342_v1  ;;  %v1224_v11 = vor.u32 1.1754944e-38, %v1223_v62  ;;  %vm1222_vm7 = vcmp.eq.f32.partialorder %v1221_v19, 8.507059e+37 }
 0x1c8   :  { %v2535_v2 = vpop.eup %2534  ;;  %v1118_v12 = vmul.f32 %v2533_v26, %v3667_v56  ;;  %v1101_v28 = vadd.f32 %v2529_v46, %v1100_v63  ;;  %vm1123_vm15 = vweird.f32 %v2533_v26 }
 0x1c9   :  { %v3679_v10 = vadd.f32 1.0, %v2535_v2  ;;  %v2537_v23 = vpop.eup %2536  ;;  %2540 = vpow2.f32 %v2446_v18  ;;  %vm3690_vm2 = vmor %vm1122_vm0, %vm1123_vm15 }
 0x1ca   :  { %v1119_v24 = vsub.f32 1.0, %v1118_v12  ;;  %v1105_v29 = vsel %vm1104_vm13, %v2529_v46, %v1101_v28  ;;  %v3687_v50 = vadd.f32 1.0, %v2537_v23  ;;  %v4138_v28 = vld [vmem:[#allocation34_spill] sm:$0xff] }
 0x1cb   :  { %v2539_v30 = vpop.eup %2538  ;;  %v1110_v43 = vsel %vm1107_vm14, %v1109_v6, %v1105_v29  ;;  %2542 = vrcp.f32 %v3679_v10  ;;  %v1243_v40 = vand.u32 2147483648, %v3679_v10  ;;  %vm1237_vm9 = vweird.f32 %v3679_v10  ;;  %v596_v6 = vpop.f32.mrf.mxu0 }
 0x1cc   :  { %v1120_v44 = vmul.f32 %v2533_v26, %v1119_v24  ;;  %v1133_v45 = vmul.f32 %v1132_v9, %v1110_v43  ;;  %v1213_v48 = vmul.f32 %v2539_v30, %v3673_v41  ;;  %2544 = vrcp.f32 %v3687_v50  ;;  %v1319_v43 = vpop.f32.mrf.mxu3 }
 0x1cd   :  { %vm1218_vm3 = vweird.f32 %v2539_v30  ;;  %v1244_v23 = vor.u32 1.1754944e-38, %v1243_v40  ;;  %vm1332_vm13 = vweird.f32 %v3687_v50  ;;  %v2645_v40 = vld [vmem:[%s4047_s2 + $0x60] sm:$0xff] }
 0x1ce   :  { %v1121_v51 = vadd.f32 %v2533_v26, %v1120_v44  ;;  %v1134_v55 = vadd.f32 %v1133_v45, %v195_v37  ;;  %v1214_v60 = vsub.f32 1.0, %v1213_v48  ;;  %vm1219_vm6 = vmor %vm1217_vm5, %vm1218_vm3  ;;  %v3733_v44 = vld [vmem:[%s4047_s2 + $0x50] sm:$0xff]  ;;  %v3740_v48 = vld [vmem:[%s4047_s2 + $0x58] sm:$0xff] }
 0x1cf   :  { %v2541_v34 = vpop.eup %2540 }
 0x1d0   :  { %v1125_v0 = vsel %vm3690_vm2, %v2533_v26, %v1121_v51  ;;  %2546 = vtanh.f32 %v1134_v55  ;;  %v1215_v13 = vmul.f32 %v2539_v30, %v1214_v60  ;;  %v3699_v56 = vadd.f32 1.0, %v2541_v34  ;;  %v4146_v55 = vld [vmem:[#allocation16_spill] sm:$0xff] }
 0x1d1   :  { %v2543_v57 = vpop.eup %2542  ;;  %v1130_v59 = vsel %vm1127_vm4, %v1129_v16, %v1125_v0  ;;  %v1241_v26 = vand.u32 2147483647, %v3679_v10  ;;  %v4141_v60 = vperm.slane %v3310_v35, 2  ;;  %v3758_v16 = vld [vmem:[%s4047_s2 + $0x38] sm:$0xff]  ;;  %v1362_v34 = vadd.f32 %v3563_v25, %v1319_v43  ;;  %v3767_v35 = vld [vmem:[%s4047_s2 + $0x40] sm:$0xff] }
 0x1d2   :  { %v1233_v42 = vmul.f32 %v2543_v57, %v3679_v10  ;;  %v1216_v53 = vadd.f32 %v2539_v30, %v1215_v13  ;;  %2548 = vrcp.f32 %v3699_v56  ;;  %v2545_v21 = vpop.eup %2544  ;;  %v1136_v15 = vsub.f32 1.0, %v1130_v59  ;;  %v3778_v25 = vld [vmem:[%s4047_s2 + $0x20] sm:$0xff] }
 0x1d3   :  { %vm1238_vm8 = vweird.f32 %v2543_v57  ;;  %v1328_v41 = vmul.f32 %v2545_v21, %v3687_v50  ;;  %v1138_v2 = vmul.f32 %v1130_v59, %v3572_v8  ;;  %v1338_v8 = vand.u32 2147483648, %v3687_v50  ;;  %v4145_v43 = vld [vmem:[#allocation11_spill] sm:$0xff] }
 0x1d4   :  { %v1234_v46 = vsub.f32 1.0, %v1233_v42  ;;  %v1220_v22 = vsel %vm1219_vm6, %v2539_v30, %v1216_v53  ;;  %vm1239_vm10 = vmor %vm1237_vm9, %vm1238_vm8  ;;  %vm1242_vm11 = vcmp.eq.f32.partialorder %v1241_v26, 8.507059e+37  ;;  %vm1333_vm12 = vweird.f32 %v2545_v21 }
 0x1d5   :  { %v1225_v58 = vsel %vm1222_vm7, %v1224_v11, %v1220_v22  ;;  %v1329_v4 = vsub.f32 1.0, %v1328_v41  ;;  %v1336_v10 = vand.u32 2147483647, %v3687_v50  ;;  %vm3748_vm14 = vmor %vm1332_vm13, %vm1333_vm12  ;;  %v1339_v50 = vor.u32 1.1754944e-38, %v1338_v8  ;;  %v3786_v11 = vld [vmem:[%s4047_s2 + $0x28] sm:$0xff]  ;;  %v4144_v8 = vld [vmem:[#allocation17_spill] sm:$0xff] }
 0x1d6   :  { %v2547_v63 = vpop.eup %2546  ;;  %v1235_v47 = vmul.f32 %v2543_v57, %v1234_v46  ;;  %v1248_v39 = vmul.f32 %v1247_v27, %v1225_v58  ;;  %v588_v61 = vadd.f32 %v3670_v52, %v4141_v60  ;;  %v2639_v52 = vld [vmem:[%s4047_s2 + $0x90] sm:$0xff]  ;;  %v1358_v59 = vand.u32 2147483648, %v3699_v56  ;;  %v2642_v46 = vld [vmem:[%s4047_s2 + $0x78] sm:$0xff]  ;;  %v3837_v41 = vld [vmem:[%s4047_s2 + $0x48] sm:$0xff] }
 0x1d7   :  { %v1137_v1 = vmul.f32 %v2547_v63, %v1136_v15  ;;  %v1330_v36 = vmul.f32 %v2545_v21, %v1329_v4  ;;  %vm1337_vm15 = vcmp.eq.f32.partialorder %v1336_v10, 8.507059e+37  ;;  %vm1352_vm2 = vweird.f32 %v3699_v56  ;;  %v3857_v4 = vld [vmem:[%s4047_s2 + $0x18] sm:$0xff] }
 0x1d8   :  { %v1236_v12 = vadd.f32 %v2543_v57, %v1235_v47  ;;  %v1249_v18 = vadd.f32 %v1248_v39, %v4138_v28  ;;  %v3711_v9 = vpop.eup %2548  ;;  %v1356_v22 = vand.u32 2147483647, %v3699_v56  ;;  %v1359_v63 = vor.u32 1.1754944e-38, %v1358_v59  ;;  %v2646_v47 = vld [vmem:[%s4047_s2 + $0xb8] sm:$0xff]  ;;  %v2650_v28 = vld [vmem:[%s4047_s2 + $0x88] sm:$0xff] }
 0x1d9   :  { %v3713_v24 = vadd.f32 %v1138_v2, %v1137_v1  ;;  %v1348_v30 = vmul.f32 %v3711_v9, %v3699_v56  ;;  %v1331_v45 = vadd.f32 %v2545_v21, %v1330_v36  ;;  %vm1353_vm0 = vweird.f32 %v3711_v9  ;;  %v3811_v56 = vld [vmem:[%s4047_s2 + $0x10] sm:$0xff]  ;;  %v2648_v1 = vld [vmem:[%s4047_s2 + $0xa0] sm:$0xff] }
 0x1da   :  { %v1240_v29 = vsel %vm1239_vm10, %v2543_v57, %v1236_v12  ;;  %2550 = vtanh.f32 %v1249_v18  ;;  %v599_v57 = vpop.f32.mrf.mxu0  ;;  %vm3802_vm3 = vmor %vm1352_vm2, %vm1353_vm0  ;;  %vm1357_vm4 = vcmp.eq.f32.partialorder %v1356_v22, 8.507059e+37  ;;  %v3847_v2 = vld [vmem:[%s4047_s2 + $0x30] sm:$0xff]  ;;  %v116_v36 = vadd.f32 %v4144_v8, %v3269_v3 }
 0x1db   :  { %1140 = vst.msk [vmem:[%s4050_s5 + $0x8] sm:$0xff] %vm20_vm1, %v3713_v24  ;;  %2448 = vmatmul.msk.f32.vlgmr.msra.gmra.mxu1 %vm20_vm1, %v3713_v24  ;;  %2449 = vmatmul.msk.f32.vlgmr.msra.gmra.mxu2 %vm20_vm1, %v3713_v24  ;;  %v1245_v37 = vsel %vm1242_vm11, %v1244_v23, %v1240_v29  ;;  %v1349_v38 = vsub.f32 1.0, %v1348_v30  ;;  %v1335_v62 = vsel %vm3748_vm14, %v2545_v21, %v1331_v45  ;;  %v2652_v23 = vld [vmem:[%s4047_s2 + $0x70] sm:$0xff]  ;;  %v3868_v29 = vld [vmem:[%s4047_s2] sm:$0xff] }
 0x1dc   :  { %2450 = vmatmul.msk.f32.vlgmr.msra.gmra.mxu3 %vm20_vm1, %v3713_v24  ;;  %1639 = vmatpush.msra.mxu1 %v3733_v44  ;;  %v1251_v19 = vsub.f32 1.0, %v1245_v37  ;;  %v1340_v13 = vsel %vm1337_vm15, %v1339_v50, %v1335_v62  ;;  %v1253_v53 = vmul.f32 %v1245_v37, %v3608_v5  ;;  %v3797_v5 = vld [vmem:[%s4047_s2 + $0x8] sm:$0xff]  ;;  %v157_v45 = vadd.f32 %v4145_v43, %v3250_v20 }
 0x1dd   :  { %1659 = vmatpush.msra.mxu2 %v3740_v48  ;;  %1734 = vmatpush.msra.mxu3 %v2636_v49  ;;  %v1350_v51 = vmul.f32 %v3711_v9, %v1349_v38  ;;  %v1363_v42 = vmul.f32 %v1362_v34, %v1340_v13  ;;  %v312_v50 = vadd.f32 %v4146_v55, %v3338_v33 }
 0x1de   :  { %1640 = vmatpush.msra.mxu1 %v3758_v16 }
 0x1df   :  { %1660 = vmatpush.msra.mxu2 %v3767_v35  ;;  %1735 = vmatpush.msra.mxu3 %v2639_v52  ;;  %v1351_v32 = vadd.f32 %v3711_v9, %v1350_v51  ;;  %v1364_v21 = vadd.f32 %v1363_v42, %v588_v61 }
 0x1e0   :  { %v2551_v0 = vpop.eup %2550  ;;  %1641 = vmatpush.msra.mxu1 %v3778_v25 }
 0x1e1   :  { %v1252_v54 = vmul.f32 %v2551_v0, %v1251_v19  ;;  %1661 = vmatpush.msra.mxu2 %v3786_v11  ;;  %1736 = vmatpush.msra.mxu3 %v2642_v46  ;;  %v1355_v58 = vsel %vm3802_vm3, %v3711_v9, %v1351_v32  ;;  %2552 = vtanh.f32 %v1364_v21  ;;  %v4147_v32 = vld [vmem:[#allocation40_spill] sm:$0xff] }
 0x1e2   :  { %1642 = vmatpush.msra.mxu1 %v3797_v5  ;;  %v1360_v39 = vsel %vm1357_vm4, %v1359_v63, %v1355_v58  ;;  %v602_v26 = vpop.f32.mrf.mxu0 }
 0x1e3   :  { %v3806_v15 = vadd.f32 %v1253_v53, %v1252_v54  ;;  %1662 = vmatpush.msra.mxu2 %v3811_v56  ;;  %1737 = vmatpush.msra.mxu3 %v2645_v40  ;;  %v1366_v12 = vsub.f32 1.0, %v1360_v39  ;;  %v1368_v9 = vmul.f32 %v1360_v39, %v3629_v14 }
 0x1e5   :  { %2441 = vst.msk [vmem:[%s4050_s5 + $0x48] sm:$0xff] %vm20_vm1, %v3806_v15  ;;  %2453 = vmatmul.msk.f32.vlgmr.msrb.gmra.mxu1 %vm20_vm1, %v3806_v15  ;;  %2454 = vmatmul.msk.f32.vlgmr.msrb.gmra.mxu2 %vm20_vm1, %v3806_v15 }
 0x1e6   :  { %2455 = vmatmul.msk.f32.vlgmr.msrb.gmra.mxu3 %vm20_vm1, %v3806_v15  ;;  %1774 = vmatpush.msrb.mxu1 %v2646_v47 }
 0x1e7   :  { %1849 = vmatpush.msrb.mxu2 %v3837_v41  ;;  %1869 = vmatpush.msrb.mxu3 %v3733_v44  ;;  %v2553_v18 = vpop.eup %2552 }
 0x1e8   :  { %1775 = vmatpush.msrb.mxu1 %v2648_v1  ;;  %v1367_v6 = vmul.f32 %v2553_v18, %v1366_v12 }
 0x1e9   :  { %1850 = vmatpush.msrb.mxu2 %v3847_v2  ;;  %1870 = vmatpush.msrb.mxu3 %v3758_v16 }
 0x1ea   :  { %1776 = vmatpush.msrb.mxu1 %v2650_v28  ;;  %v1369_v30 = vadd.f32 %v1368_v9, %v1367_v6  ;;  %v605_v14 = vpop.f32.mrf.mxu0 }
 0x1eb   :  { %1851 = vmatpush.msrb.mxu2 %v3857_v4  ;;  %1871 = vmatpush.msrb.mxu3 %v3778_v25 }
 0x1ec   :  { %1777 = vmatpush.msrb.mxu1 %v2652_v23  ;;  %2447 = vst.msk [vmem:[%s4050_s5 + $0x88] sm:$0xff] %vm20_vm1, %v1369_v30  ;;  %v4148_v30 = vld [vmem:[#allocation14_spill] sm:$0xff] }
 0x1ed   :  { %1852 = vmatpush.msrb.mxu2 %v3868_v29  ;;  %1872 = vmatpush.msrb.mxu3 %v3797_v5  ;;  %v198_v14 = vadd.f32 %v4148_v30, %v4133_v31  ;;  %v4151_v30 = vld [vmem:[#allocation21_spill] sm:$0xff] }
 0x258   :  { %v1394_v10 = vpop.f32.mrf.mxu1 }
 0x259   :  { %v1437_v37 = vadd.f32 %v1394_v10, %v116_v36 }
 0x25b   :  { %v2451_v38 = vmul.f32 -1.442695, %v1437_v37 }
 0x25d   :  { %2554 = vpow2.f32 %v2451_v38 }
 0x25e   :  { %v1414_v49 = vpop.f32.mrf.mxu2 }
 0x25f   :  { %v1457_v51 = vadd.f32 %v1414_v49, %v157_v45  ;;  %v1434_v47 = vpop.f32.mrf.mxu3 }
 0x260   :  { %v1477_v9 = vadd.f32 %v4132_v7, %v1434_v47 }
 0x261   :  { %v2452_v60 = vmul.f32 -1.442695, %v1457_v51 }
 0x262   :  { %v1509_v61 = vpop.f32.mrf.mxu1 }
 0x263   :  { %v2555_v19 = vpop.eup %2554  ;;  %2556 = vpow2.f32 %v2452_v60  ;;  %v1552_v62 = vadd.f32 %v1509_v61, %v312_v50 }
 0x264   :  { %v1441_v34 = vadd.f32 1.0, %v2555_v19 }
 0x265   :  { %v2456_v52 = vmul.f32 -1.442695, %v1552_v62 }
 0x266   :  { %2558 = vrcp.f32 %v1441_v34  ;;  %v1453_v21 = vand.u32 2147483648, %v1441_v34  ;;  %v1451_v58 = vand.u32 2147483647, %v1441_v34  ;;  %vm1447_vm6 = vweird.f32 %v1441_v34 }
 0x267   :  { %2560 = vpow2.f32 %v2456_v52 }
 0x268   :  { %v1529_v0 = vpop.f32.mrf.mxu2  ;;  %v1454_v12 = vor.u32 1.1754944e-38, %v1453_v21  ;;  %vm1452_vm8 = vcmp.eq.f32.partialorder %v1451_v58, 8.507059e+37 }
 0x269   :  { %v2557_v13 = vpop.eup %2556  ;;  %v1572_v57 = vadd.f32 %v1529_v0, %v4147_v32  ;;  %v1549_v52 = vpop.f32.mrf.mxu3 }
 0x26a   :  { %v1461_v54 = vadd.f32 1.0, %v2557_v13 }
 0x26b   :  { %v2457_v59 = vmul.f32 -1.442695, %v1572_v57 }
 0x26c   :  { %v2559_v42 = vpop.eup %2558  ;;  %2562 = vrcp.f32 %v1461_v54  ;;  %v1473_v8 = vand.u32 2147483648, %v1461_v54  ;;  %v1471_v43 = vand.u32 2147483647, %v1461_v54  ;;  %vm1467_vm10 = vweird.f32 %v1461_v54 }
 0x26d   :  { %v2561_v53 = vpop.eup %2560  ;;  %v1443_v46 = vmul.f32 %v2559_v42, %v1441_v34  ;;  %2564 = vpow2.f32 %v2457_v59  ;;  %vm1448_vm5 = vweird.f32 %v2559_v42  ;;  %v1592_v59 = vadd.f32 %v4137_v17, %v1549_v52 }
 0x26e   :  { %v1556_v22 = vadd.f32 1.0, %v2561_v53  ;;  %vm1449_vm7 = vmor %vm1447_vm6, %vm1448_vm5  ;;  %v1474_v55 = vor.u32 1.1754944e-38, %v1473_v8  ;;  %vm1472_vm12 = vcmp.eq.f32.partialorder %v1471_v43, 8.507059e+37 }
 0x26f   :  { %v1444_v27 = vsub.f32 1.0, %v1443_v46 }
 0x270   :  { %2566 = vrcp.f32 %v1556_v22  ;;  %v1568_v60 = vand.u32 2147483648, %v1556_v22  ;;  %v1566_v19 = vand.u32 2147483647, %v1556_v22  ;;  %vm1562_vm14 = vweird.f32 %v1556_v22 }
 0x271   :  { %v1445_v40 = vmul.f32 %v2559_v42, %v1444_v27 }
 0x272   :  { %v2563_v63 = vpop.eup %2562  ;;  %v1569_v32 = vor.u32 1.1754944e-38, %v1568_v60  ;;  %vm1567_vm0 = vcmp.eq.f32.partialorder %v1566_v19, 8.507059e+37 }
 0x273   :  { %v2565_v39 = vpop.eup %2564  ;;  %v1463_v1 = vmul.f32 %v2563_v63, %v1461_v54  ;;  %v1446_v26 = vadd.f32 %v2559_v42, %v1445_v40  ;;  %vm1468_vm9 = vweird.f32 %v2563_v63 }
 0x274   :  { %v1576_v28 = vadd.f32 1.0, %v2565_v39  ;;  %vm1469_vm11 = vmor %vm1467_vm10, %vm1468_vm9  ;;  %v4149_v39 = vld [vmem:[#allocation36_spill] sm:$0xff] }
 0x275   :  { %v1464_v18 = vsub.f32 1.0, %v1463_v1  ;;  %v1450_v6 = vsel %vm1449_vm7, %v2559_v42, %v1446_v26 }
 0x276   :  { %v2567_v23 = vpop.eup %2566  ;;  %v1455_v36 = vsel %vm1452_vm8, %v1454_v12, %v1450_v6  ;;  %2568 = vrcp.f32 %v1576_v28  ;;  %v1588_v40 = vand.u32 2147483648, %v1576_v28  ;;  %vm1582_vm3 = vweird.f32 %v1576_v28 }
 0x277   :  { %v1465_v10 = vmul.f32 %v2563_v63, %v1464_v18  ;;  %v1478_v37 = vmul.f32 %v1477_v9, %v1455_v36  ;;  %v1558_v38 = vmul.f32 %v2567_v23, %v1556_v22  ;;  %vm1563_vm13 = vweird.f32 %v2567_v23 }
 0x278   :  { %vm1564_vm15 = vmor %vm1562_vm14, %vm1563_vm13  ;;  %v1586_v22 = vand.u32 2147483647, %v1576_v28  ;;  %v1589_v17 = vor.u32 1.1754944e-38, %v1588_v40 }
 0x279   :  { %v1466_v45 = vadd.f32 %v2563_v63, %v1465_v10  ;;  %v1479_v49 = vadd.f32 %v1478_v37, %v198_v14  ;;  %v1559_v51 = vsub.f32 1.0, %v1558_v38  ;;  %v119_v14 = vadd.f32 %v4151_v30, %v3269_v3 }
 0x27a   :  { %vm1587_vm5 = vcmp.eq.f32.partialorder %v1586_v22, 8.507059e+37 }
 0x27b   :  { %v1470_v50 = vsel %vm1469_vm11, %v2563_v63, %v1466_v45  ;;  %2570 = vtanh.f32 %v1479_v49  ;;  %v1560_v7 = vmul.f32 %v2567_v23, %v1559_v51 }
 0x27c   :  { %v2569_v61 = vpop.eup %2568  ;;  %v1475_v62 = vsel %vm1472_vm12, %v1474_v55, %v1470_v50  ;;  %v4152_v50 = vld [vmem:[#allocation41_spill] sm:$0xff] }
 0x27d   :  { %v1578_v34 = vmul.f32 %v2569_v61, %v1576_v28  ;;  %v1561_v0 = vadd.f32 %v2567_v23, %v1560_v7  ;;  %v1481_v57 = vsub.f32 1.0, %v1475_v62  ;;  %vm1583_vm2 = vweird.f32 %v2569_v61 }
 0x27e   :  { %v1483_v21 = vmul.f32 %v1475_v62, %v3713_v24  ;;  %vm1584_vm4 = vmor %vm1582_vm3, %vm1583_vm2 }
 0x27f   :  { %v1579_v13 = vsub.f32 1.0, %v1578_v34  ;;  %v1565_v54 = vsel %vm1564_vm15, %v2567_v23, %v1561_v0 }
 0x280   :  { %v1570_v46 = vsel %vm1567_vm0, %v1569_v32, %v1565_v54 }
 0x281   :  { %v2571_v42 = vpop.eup %2570  ;;  %v1580_v53 = vmul.f32 %v2569_v61, %v1579_v13  ;;  %v1593_v58 = vmul.f32 %v1592_v59, %v1570_v46 }
 0x282   :  { %v1482_v27 = vmul.f32 %v2571_v42, %v1481_v57 }
 0x283   :  { %v1581_v63 = vadd.f32 %v2569_v61, %v1580_v53  ;;  %v1594_v1 = vadd.f32 %v1593_v58, %v4149_v39 }
 0x284   :  { %v3888_v47 = vadd.f32 %v1483_v21, %v1482_v27 }
 0x285   :  { %v1585_v26 = vsel %vm1584_vm4, %v2569_v61, %v1581_v63  ;;  %2572 = vtanh.f32 %v1594_v1  ;;  %v4153_v61 = vld [vmem:[#allocation20_spill] sm:$0xff] }
 0x286   :  { %1485 = vst.msk [vmem:[%s4050_s5 + $0x10] sm:$0xff] %vm20_vm1, %v3888_v47  ;;  %2459 = vmatmul.msk.f32.vlgmr.msrb.gmra.mxu0 %vm20_vm1, %v3888_v47  ;;  %2460 = vmatmul.msk.f32.vlgmr.msra.gmra.mxu1 %vm20_vm1, %v3888_v47  ;;  %v1590_v24 = vsel %vm1587_vm5, %v1589_v17, %v1585_v26  ;;  %v315_v19 = vadd.f32 %v4153_v61, %v3338_v33  ;;  %v3953_v26 = vld [vmem:[%s4048_s4] ss:$0 sm:$0xff] }
 0x287   :  { %2461 = vmatmul.msk.f32.vlgmr.msra.gmra.mxu2 %vm20_vm1, %v3888_v47  ;;  %1889 = vmatpush.msrb.mxu0 %v3740_v48  ;;  %v1596_v12 = vsub.f32 1.0, %v1590_v24  ;;  %v1598_v6 = vmul.f32 %v1590_v24, %v3806_v15  ;;  %v4150_v15 = vld [vmem:[#allocation15_spill] sm:$0xff] }
 0x288   :  { %1964 = vmatpush.msra.mxu1 %v3837_v41  ;;  %1984 = vmatpush.msra.mxu2 %v3733_v44  ;;  %v160_v23 = vadd.f32 %v4150_v15, %v3250_v20 }
 0x289   :  { %1890 = vmatpush.msrb.mxu0 %v3767_v35 }
 0x28a   :  { %1965 = vmatpush.msra.mxu1 %v3847_v2  ;;  %1985 = vmatpush.msra.mxu2 %v3758_v16 }
 0x28b   :  { %1891 = vmatpush.msrb.mxu0 %v3786_v11  ;;  %v2573_v28 = vpop.eup %2572 }
 0x28c   :  { %1966 = vmatpush.msra.mxu1 %v3857_v4  ;;  %1986 = vmatpush.msra.mxu2 %v3778_v25  ;;  %v1597_v18 = vmul.f32 %v2573_v28, %v1596_v12 }
 0x28d   :  { %1892 = vmatpush.msrb.mxu0 %v3811_v56 }
 0x28e   :  { %1967 = vmatpush.msra.mxu1 %v3868_v29  ;;  %1987 = vmatpush.msra.mxu2 %v3797_v5  ;;  %v3915_v9 = vadd.f32 %v1598_v6, %v1597_v18  ;;  %v4154_v18 = vld [vmem:[#allocation18_spill] sm:$0xff] }
 0x28f   :  { %v201_v6 = vadd.f32 %v4154_v18, %v4133_v31 }
 0x290   :  { %2458 = vst.msk [vmem:[%s4050_s5 + $0x50] sm:$0xff] %vm20_vm1, %v3915_v9  ;;  %2464 = vmatmul.msk.f32.vlgmr.msra.gmra.mxu3 %vm20_vm1, %v3915_v9  ;;  %2465 = vmatmul.msk.f32.vlgmr.msra.gmra.mxu0 %vm20_vm1, %v3915_v9 }
 0x291   :  { %2466 = vmatmul.msk.f32.vlgmr.msrb.gmra.mxu1 %vm20_vm1, %v3915_v9  ;;  %2004 = vmatpush.msra.mxu3 %v3740_v48 }
 0x292   :  { %2079 = vmatpush.msra.mxu0 %v3837_v41  ;;  %2099 = vmatpush.msrb.mxu1 %v3733_v44 }
 0x293   :  { %2005 = vmatpush.msra.mxu3 %v3767_v35 }
 0x294   :  { %2080 = vmatpush.msra.mxu0 %v3847_v2  ;;  %2100 = vmatpush.msrb.mxu1 %v3758_v16 }
 0x295   :  { %2006 = vmatpush.msra.mxu3 %v3786_v11 }
 0x296   :  { %2081 = vmatpush.msra.mxu0 %v3857_v4  ;;  %2101 = vmatpush.msrb.mxu1 %v3778_v25 }
 0x297   :  { %2007 = vmatpush.msra.mxu3 %v3811_v56 }
 0x298   :  { %2082 = vmatpush.msra.mxu0 %v3868_v29  ;;  %2102 = vmatpush.msrb.mxu1 %v3797_v5 }
 0x303   :  { %v1624_v8 = vpop.f32.mrf.mxu0  ;;  %v1644_v36 = vpop.f32.mrf.mxu1 }
 0x304   :  { %v1667_v10 = vadd.f32 %v1624_v8, %v119_v14  ;;  %v1687_v37 = vadd.f32 %v1644_v36, %v160_v23 }
 0x306   :  { %v2462_v38 = vmul.f32 -1.442695, %v1667_v10  ;;  %v2463_v43 = vmul.f32 -1.442695, %v1687_v37 }
 0x308   :  { %2574 = vpow2.f32 %v2462_v38 }
 0x309   :  { %2576 = vpow2.f32 %v2463_v43 }
 0x30a   :  { %v1664_v58 = vpop.f32.mrf.mxu2 }
 0x30b   :  { %v1707_v17 = vadd.f32 %v3953_v26, %v1664_v58 }
 0x30d   :  { %v1759_v49 = vpop.f32.mrf.mxu0 }
 0x30e   :  { %v2575_v45 = vpop.eup %2574  ;;  %v1802_v7 = vadd.f32 %v1759_v49, %v4152_v50 }
 0x30f   :  { %v2577_v51 = vpop.eup %2576  ;;  %v1671_v55 = vadd.f32 1.0, %v2575_v45 }
 0x310   :  { %v1691_v60 = vadd.f32 1.0, %v2577_v51  ;;  %v2468_v62 = vmul.f32 -1.442695, %v1802_v7 }
 0x311   :  { %2578 = vrcp.f32 %v1671_v55  ;;  %v1683_v46 = vand.u32 2147483648, %v1671_v55  ;;  %v1681_v21 = vand.u32 2147483647, %v1671_v55  ;;  %vm1677_vm7 = vweird.f32 %v1671_v55 }
 0x312   :  { %2580 = vrcp.f32 %v1691_v60  ;;  %v1703_v15 = vand.u32 2147483648, %v1691_v60  ;;  %vm1697_vm11 = vweird.f32 %v1691_v60  ;;  %v1701_v30 = vand.u32 2147483647, %v1691_v60 }
 0x313   :  { %v1739_v34 = vpop.f32.mrf.mxu3  ;;  %2582 = vpow2.f32 %v2468_v62  ;;  %v1684_v39 = vor.u32 1.1754944e-38, %v1683_v46  ;;  %vm1682_vm9 = vcmp.eq.f32.partialorder %v1681_v21, 8.507059e+37 }
 0x314   :  { %v1782_v52 = vadd.f32 %v1739_v34, %v315_v19  ;;  %v1704_v10 = vor.u32 1.1754944e-38, %v1703_v15  ;;  %vm1702_vm13 = vcmp.eq.f32.partialorder %v1701_v30, 8.507059e+37  ;;  %v1779_v34 = vpop.f32.mrf.mxu1 }
 0x316   :  { %v2467_v13 = vmul.f32 -1.442695, %v1782_v52 }
 0x317   :  { %v2579_v0 = vpop.eup %2578 }
 0x318   :  { %v2581_v32 = vpop.eup %2580  ;;  %v1673_v57 = vmul.f32 %v2579_v0, %v1671_v55  ;;  %2584 = vpow2.f32 %v2467_v13  ;;  %vm1678_vm6 = vweird.f32 %v2579_v0 }
 0x319   :  { %v1693_v54 = vmul.f32 %v2581_v32, %v1691_v60  ;;  %v2583_v42 = vpop.eup %2582  ;;  %vm1679_vm8 = vmor %vm1677_vm7, %vm1678_vm6  ;;  %vm1698_vm10 = vweird.f32 %v2581_v32 }
 0x31a   :  { %v1674_v59 = vsub.f32 1.0, %v1673_v57  ;;  %v3947_v40 = vadd.f32 1.0, %v2583_v42  ;;  %vm1699_vm12 = vmor %vm1697_vm11, %vm1698_vm10 }
 0x31b   :  { %v1694_v53 = vsub.f32 1.0, %v1693_v54 }
 0x31c   :  { %v1675_v27 = vmul.f32 %v2579_v0, %v1674_v59  ;;  %2586 = vrcp.f32 %v3947_v40  ;;  %v1818_v42 = vand.u32 2147483648, %v3947_v40  ;;  %vm1812_vm4 = vweird.f32 %v3947_v40 }
 0x31d   :  { %v1695_v33 = vmul.f32 %v2581_v32, %v1694_v53  ;;  %v1816_v46 = vand.u32 2147483647, %v3947_v40 }
 0x31e   :  { %v1676_v63 = vadd.f32 %v2579_v0, %v1675_v27  ;;  %v2585_v22 = vpop.eup %2584  ;;  %v4155_v27 = vld [vmem:[#allocation39_spill] sm:$0xff]  ;;  %v1819_v58 = vor.u32 1.1754944e-38, %v1818_v42 }
 0x31f   :  { %v1786_v24 = vadd.f32 1.0, %v2585_v22  ;;  %v1696_v12 = vadd.f32 %v2581_v32, %v1695_v33  ;;  %vm1817_vm6 = vcmp.eq.f32.partialorder %v1816_v46, 8.507059e+37  ;;  %v4157_v22 = vld [vmem:[#allocation25_spill] sm:$0xff] }
 0x320   :  { %v1680_v1 = vsel %vm1679_vm8, %v2579_v0, %v1676_v63 }
 0x321   :  { %v1685_v28 = vsel %vm1682_vm9, %v1684_v39, %v1680_v1  ;;  %2588 = vrcp.f32 %v1786_v24  ;;  %v1700_v36 = vsel %vm1699_vm12, %v2581_v32, %v1696_v12  ;;  %v1798_v7 = vand.u32 2147483648, %v1786_v24 }
 0x322   :  { %v1708_v23 = vmul.f32 %v1707_v17, %v1685_v28  ;;  %v2587_v14 = vpop.eup %2586  ;;  %v1705_v43 = vsel %vm1702_vm13, %v1704_v10, %v1700_v36  ;;  %v1796_v19 = vand.u32 2147483647, %v1786_v24  ;;  %vm1792_vm15 = vweird.f32 %v1786_v24 }
 0x323   :  { %v1808_v37 = vmul.f32 %v2587_v14, %v3947_v40  ;;  %v1711_v51 = vsub.f32 1.0, %v1705_v43  ;;  %v1713_v50 = vmul.f32 %v1705_v43, %v3888_v47  ;;  %v1799_v13 = vor.u32 1.1754944e-38, %v1798_v7  ;;  %v2655_v47 = vld [vmem:[%s4048_s4 + $0x1] ss:$0 sm:$0xff] }
 0x324   :  { %v1709_v8 = vadd.f32 %v1708_v23, %v201_v6  ;;  %v1822_v32 = vadd.f32 %v2655_v47, %v1779_v34  ;;  %vm1797_vm2 = vcmp.eq.f32.partialorder %v1796_v19, 8.507059e+37  ;;  %vm1813_vm3 = vweird.f32 %v2587_v14 }
 0x325   :  { %v1809_v49 = vsub.f32 1.0, %v1808_v37  ;;  %vm1814_vm5 = vmor %vm1812_vm4, %vm1813_vm3  ;;  %v122_v39 = vadd.f32 %v4157_v22, %v3269_v3 }
 0x326   :  { %2590 = vtanh.f32 %v1709_v8 }
 0x327   :  { %v2589_v38 = vpop.eup %2588  ;;  %v1810_v62 = vmul.f32 %v2587_v14, %v1809_v49 }
 0x328   :  { %v1788_v45 = vmul.f32 %v2589_v38, %v1786_v24  ;;  %vm1793_vm14 = vweird.f32 %v2589_v38 }
 0x329   :  { %vm1794_vm0 = vmor %vm1792_vm15, %vm1793_vm14  ;;  %v1811_v54 = vadd.f32 %v2587_v14, %v1810_v62 }
 0x32a   :  { %v1789_v31 = vsub.f32 1.0, %v1788_v45 }
 0x32b   :  { %v1815_v33 = vsel %vm1814_vm5, %v2587_v14, %v1811_v54 }
 0x32c   :  { %v2591_v55 = vpop.eup %2590  ;;  %v1790_v61 = vmul.f32 %v2589_v38, %v1789_v31 }
 0x32d   :  { %v1712_v60 = vmul.f32 %v2591_v55, %v1711_v51 }
 0x32e   :  { %v1791_v0 = vadd.f32 %v2589_v38, %v1790_v61  ;;  %v4158_v61 = vld [vmem:[#allocation23_spill] sm:$0xff] }
 0x32f   :  { %v3960_v52 = vadd.f32 %v1713_v50, %v1712_v60 }
 0x330   :  { %v1795_v57 = vsel %vm1794_vm0, %v2589_v38, %v1791_v0 }
 0x331   :  { %1715 = vst.msk [vmem:[%s4050_s5 + $0x18] sm:$0xff] %vm20_vm1, %v3960_v52  ;;  %2470 = vmatmul.msk.f32.vlgmr.msrb.gmra.mxu2 %vm20_vm1, %v3960_v52  ;;  %2471 = vmatmul.msk.f32.vlgmr.msrb.gmra.mxu3 %vm20_vm1, %v3960_v52  ;;  %v1800_v59 = vsel %vm1797_vm2, %v1799_v13, %v1795_v57 }
 0x332   :  { %2472 = vmatmul.msk.f32.vlgmr.msrb.gmra.mxu0 %vm20_vm1, %v3960_v52  ;;  %2119 = vmatpush.msrb.mxu2 %v3740_v48  ;;  %v1823_v53 = vmul.f32 %v1822_v32, %v1800_v59  ;;  %v4159_v59 = vld [vmem:[#allocation28_spill] sm:$0xff] }
 0x333   :  { %2194 = vmatpush.msrb.mxu3 %v3837_v41  ;;  %2214 = vmatpush.msrb.mxu0 %v3733_v44  ;;  %v1820_v44 = vsel %vm1817_vm6, %v1819_v58, %v1815_v33 }
 0x334   :  { %2120 = vmatpush.msrb.mxu2 %v3767_v35  ;;  %v1824_v21 = vadd.f32 %v1823_v53, %v4155_v27  ;;  %v1826_v41 = vsub.f32 1.0, %v1820_v44  ;;  %v4160_v27 = vld [vmem:[#allocation24_spill] sm:$0xff] }
 0x335   :  { %2195 = vmatpush.msrb.mxu3 %v3847_v2  ;;  %2215 = vmatpush.msrb.mxu0 %v3758_v16  ;;  %v1828_v16 = vmul.f32 %v1820_v44, %v3915_v9 }
 0x336   :  { %2121 = vmatpush.msrb.mxu2 %v3786_v11  ;;  %2592 = vtanh.f32 %v1824_v21 }
 0x337   :  { %2196 = vmatpush.msrb.mxu3 %v3857_v4  ;;  %2216 = vmatpush.msrb.mxu0 %v3778_v25  ;;  %v4156_v25 = vld [vmem:[#allocation19_spill] sm:$0xff] }
 0x338   :  { %2122 = vmatpush.msrb.mxu2 %v3811_v56  ;;  %v163_v4 = vadd.f32 %v4156_v25, %v3250_v20 }
 0x339   :  { %2197 = vmatpush.msrb.mxu3 %v3868_v29  ;;  %2217 = vmatpush.msrb.mxu0 %v3797_v5 }
 0x33c   :  { %v2593_v2 = vpop.eup %2592 }
 0x33d   :  { %v1827_v40 = vmul.f32 %v2593_v2, %v1826_v41 }
 0x33f   :  { %v1829_v63 = vadd.f32 %v1828_v16, %v1827_v40 }
 0x341   :  { %2469 = vst.msk [vmem:[%s4050_s5 + $0x58] sm:$0xff] %vm20_vm1, %v1829_v63 }
 0x3af   :  { %v1894_v37 = vpop.f32.mrf.mxu0 }
 0x3b0   :  { %v1937_v49 = vadd.f32 %v3953_v26, %v1894_v37 }
 0x3b4   :  { %v1854_v29 = vpop.f32.mrf.mxu2  ;;  %v1874_v1 = vpop.f32.mrf.mxu3 }
 0x3b5   :  { %v1897_v5 = vadd.f32 %v1854_v29, %v122_v39  ;;  %v1917_v17 = vadd.f32 %v1874_v1, %v163_v4 }
 0x3b7   :  { %v2473_v24 = vmul.f32 -1.442695, %v1897_v5  ;;  %v2474_v12 = vmul.f32 -1.442695, %v1917_v17 }
 0x3b9   :  { %2594 = vpow2.f32 %v2473_v24 }
 0x3ba   :  { %2596 = vpow2.f32 %v2474_v12 }
 0x3bf   :  { %v2595_v9 = vpop.eup %2594 }
 0x3c0   :  { %v2597_v28 = vpop.eup %2596  ;;  %v1901_v18 = vadd.f32 1.0, %v2595_v9 }
 0x3c1   :  { %v1921_v6 = vadd.f32 1.0, %v2597_v28 }
 0x3c2   :  { %2598 = vrcp.f32 %v1901_v18  ;;  %v1913_v3 = vand.u32 2147483648, %v1901_v18  ;;  %v1911_v10 = vand.u32 2147483647, %v1901_v18  ;;  %vm1907_vm8 = vweird.f32 %v1901_v18 }
 0x3c3   :  { %2600 = vrcp.f32 %v1921_v6  ;;  %v1933_v7 = vand.u32 2147483648, %v1921_v6  ;;  %vm1927_vm12 = vweird.f32 %v1921_v6  ;;  %v1931_v60 = vand.u32 2147483647, %v1921_v6 }
 0x3c4   :  { %v1914_v45 = vor.u32 1.1754944e-38, %v1913_v3  ;;  %vm1912_vm10 = vcmp.eq.f32.partialorder %v1911_v10, 8.507059e+37 }
 0x3c5   :  { %v1934_v34 = vor.u32 1.1754944e-38, %v1933_v7  ;;  %vm1932_vm14 = vcmp.eq.f32.partialorder %v1931_v60, 8.507059e+37 }
 0x3c8   :  { %v2599_v15 = vpop.eup %2598 }
 0x3c9   :  { %v2601_v23 = vpop.eup %2600  ;;  %v1903_v20 = vmul.f32 %v2599_v15, %v1901_v18  ;;  %vm1908_vm7 = vweird.f32 %v2599_v15 }
 0x3ca   :  { %v1923_v30 = vmul.f32 %v2601_v23, %v1921_v6  ;;  %vm1909_vm9 = vmor %vm1907_vm8, %vm1908_vm7  ;;  %vm1928_vm11 = vweird.f32 %v2601_v23  ;;  %v4161_v6 = vld [vmem:[#allocation26_spill] sm:$0xff] }
 0x3cb   :  { %v1904_v14 = vsub.f32 1.0, %v1903_v20  ;;  %vm1929_vm13 = vmor %vm1927_vm12, %vm1928_vm11 }
 0x3cc   :  { %v1924_v8 = vsub.f32 1.0, %v1923_v30 }
 0x3cd   :  { %v1905_v36 = vmul.f32 %v2599_v15, %v1904_v14 }
 0x3ce   :  { %v1925_v38 = vmul.f32 %v2601_v23, %v1924_v8 }
 0x3cf   :  { %v1906_v43 = vadd.f32 %v2599_v15, %v1905_v36 }
 0x3d0   :  { %v1926_v55 = vadd.f32 %v2601_v23, %v1925_v38 }
 0x3d1   :  { %v1910_v51 = vsel %vm1909_vm9, %v2599_v15, %v1906_v43  ;;  %v4162_v43 = vld [vmem:[#allocation31_spill] sm:$0xff] }
 0x3d2   :  { %v1915_v31 = vsel %vm1912_vm10, %v1914_v45, %v1910_v51  ;;  %v1930_v62 = vsel %vm1929_vm13, %v2601_v23, %v1926_v55 }
 0x3d3   :  { %v1938_v50 = vmul.f32 %v1937_v49, %v1915_v31  ;;  %v1935_v0 = vsel %vm1932_vm14, %v1934_v34, %v1930_v62  ;;  %v4163_v49 = vld [vmem:[#allocation27_spill] sm:$0xff] }
 0x3d4   :  { %v1941_v13 = vsub.f32 1.0, %v1935_v0  ;;  %v1943_v57 = vmul.f32 %v1935_v0, %v3960_v52 }
 0x3d5   :  { %v1939_v19 = vadd.f32 %v1938_v50, %v4158_v61 }
 0x3d7   :  { %2602 = vtanh.f32 %v1939_v19 }
 0x3dd   :  { %v2603_v47 = vpop.eup %2602 }
 0x3de   :  { %v1942_v32 = vmul.f32 %v2603_v47, %v1941_v13 }
 0x3e0   :  { %v1944_v54 = vadd.f32 %v1943_v57, %v1942_v32 }
 0x3e2   :  { %1945 = vst.msk [vmem:[%s4050_s5 + $0x20] sm:$0xff] %vm20_vm1, %v1944_v54  ;;  %2475 = vmatmul.msk.f32.vlgmr.msra.gmra.mxu1 %vm20_vm1, %v1944_v54  ;;  %2476 = vmatmul.msk.f32.vlgmr.msra.gmra.mxu2 %vm20_vm1, %v1944_v54 }
 0x3e3   :  { %2477 = vmatmul.msk.f32.vlgmr.msra.gmra.mxu3 %vm20_vm1, %v1944_v54  ;;  %2234 = vmatpush.msra.mxu1 %v3740_v48 }
 0x3e5   :  { %2235 = vmatpush.msra.mxu1 %v3767_v35 }
 0x3e7   :  { %2236 = vmatpush.msra.mxu1 %v3786_v11 }
 0x3e9   :  { %2237 = vmatpush.msra.mxu1 %v3811_v56 }
 0x45f   :  { %v1969_v52 = vpop.f32.mrf.mxu1 }
 0x460   :  { %v2012_v42 = vadd.f32 %v1969_v52, %v4159_v59 }
 0x462   :  { %v2478_v53 = vmul.f32 -1.442695, %v2012_v42 }
 0x464   :  { %2604 = vpow2.f32 %v2478_v53 }
 0x465   :  { %v1989_v46 = vpop.f32.mrf.mxu2 }
 0x466   :  { %v2032_v21 = vadd.f32 %v1989_v46, %v4160_v27  ;;  %v2009_v25 = vpop.f32.mrf.mxu3 }
 0x467   :  { %v2052_v5 = vadd.f32 %v3953_v26, %v2009_v25 }
 0x468   :  { %v2479_v33 = vmul.f32 -1.442695, %v2032_v21 }
 0x46a   :  { %v2605_v58 = vpop.eup %2604  ;;  %2606 = vpow2.f32 %v2479_v33 }
 0x46b   :  { %v2016_v44 = vadd.f32 1.0, %v2605_v58 }
 0x46d   :  { %2608 = vrcp.f32 %v2016_v44  ;;  %v2028_v56 = vand.u32 2147483648, %v2016_v44  ;;  %v2026_v40 = vand.u32 2147483647, %v2016_v44  ;;  %vm2022_vm0 = vweird.f32 %v2016_v44 }
 0x46f   :  { %v2029_v39 = vor.u32 1.1754944e-38, %v2028_v56  ;;  %vm2027_vm3 = vcmp.eq.f32.partialorder %v2026_v40, 8.507059e+37 }
 0x470   :  { %v2607_v48 = vpop.eup %2606 }
 0x471   :  { %v2036_v41 = vadd.f32 1.0, %v2607_v48 }
 0x473   :  { %v2609_v35 = vpop.eup %2608  ;;  %2610 = vrcp.f32 %v2036_v41  ;;  %v2048_v12 = vand.u32 2147483648, %v2036_v41  ;;  %v2046_v28 = vand.u32 2147483647, %v2036_v41  ;;  %vm2042_vm5 = vweird.f32 %v2036_v41 }
 0x474   :  { %v2018_v11 = vmul.f32 %v2609_v35, %v2016_v44  ;;  %vm2023_vm15 = vweird.f32 %v2609_v35 }
 0x475   :  { %vm2024_vm2 = vmor %vm2022_vm0, %vm2023_vm15  ;;  %v2049_v23 = vor.u32 1.1754944e-38, %v2048_v12  ;;  %vm2047_vm7 = vcmp.eq.f32.partialorder %v2046_v28, 8.507059e+37 }
 0x476   :  { %v2019_v2 = vsub.f32 1.0, %v2018_v11 }
 0x478   :  { %v2020_v16 = vmul.f32 %v2609_v35, %v2019_v2 }
 0x479   :  { %v2611_v63 = vpop.eup %2610 }
 0x47a   :  { %v2038_v4 = vmul.f32 %v2611_v63, %v2036_v41  ;;  %v2021_v22 = vadd.f32 %v2609_v35, %v2020_v16  ;;  %vm2043_vm4 = vweird.f32 %v2611_v63  ;;  %v4164_v41 = vld [vmem:[#allocation29_spill] sm:$0xff] }
 0x47b   :  { %vm2044_vm6 = vmor %vm2042_vm5, %vm2043_vm4 }
 0x47c   :  { %v2039_v29 = vsub.f32 1.0, %v2038_v4  ;;  %v2025_v1 = vsel %vm2024_vm2, %v2609_v35, %v2021_v22 }
 0x47d   :  { %v2030_v17 = vsel %vm2027_vm3, %v2029_v39, %v2025_v1  ;;  %v4165_v39 = vld [vmem:[#allocation30_spill] sm:$0xff] }
 0x47e   :  { %v2040_v24 = vmul.f32 %v2611_v63, %v2039_v29  ;;  %v2053_v9 = vmul.f32 %v2052_v5, %v2030_v17  ;;  %v4166_v17 = vld [vmem:[#allocation33_spill] sm:$0xff] }
 0x480   :  { %v2041_v18 = vadd.f32 %v2611_v63, %v2040_v24  ;;  %v2054_v15 = vadd.f32 %v2053_v9, %v4161_v6 }
 0x482   :  { %v2045_v20 = vsel %vm2044_vm6, %v2611_v63, %v2041_v18  ;;  %2612 = vtanh.f32 %v2054_v15 }
 0x483   :  { %v2050_v30 = vsel %vm2047_vm7, %v2049_v23, %v2045_v20 }
 0x484   :  { %v2056_v14 = vsub.f32 1.0, %v2050_v30  ;;  %v2058_v36 = vmul.f32 %v2050_v30, %v1944_v54 }
 0x488   :  { %v2613_v3 = vpop.eup %2612 }
 0x489   :  { %v2057_v8 = vmul.f32 %v2613_v3, %v2056_v14 }
 0x48b   :  { %v2059_v10 = vadd.f32 %v2058_v36, %v2057_v8 }
 0x48d   :  { %2060 = vst.msk [vmem:[%s4050_s5 + $0x28] sm:$0xff] %vm20_vm1, %v2059_v10  ;;  %2480 = vmatmul.msk.f32.vlgmr.msra.gmra.mxu0 %vm20_vm1, %v2059_v10  ;;  %2481 = vmatmul.msk.f32.vlgmr.msrb.gmra.mxu1 %vm20_vm1, %v2059_v10 }
 0x48e   :  { %2482 = vmatmul.msk.f32.vlgmr.msrb.gmra.mxu2 %vm20_vm1, %v2059_v10 }
 0x50a   :  { %v2084_v37 = vpop.f32.mrf.mxu0  ;;  %v2104_v38 = vpop.f32.mrf.mxu1 }
 0x50b   :  { %v2127_v45 = vadd.f32 %v2084_v37, %v4162_v43  ;;  %v2147_v51 = vadd.f32 %v2104_v38, %v4163_v49 }
 0x50d   :  { %v2483_v31 = vmul.f32 -1.442695, %v2127_v45  ;;  %v2484_v55 = vmul.f32 -1.442695, %v2147_v51 }
 0x50f   :  { %2614 = vpow2.f32 %v2483_v31 }
 0x510   :  { %2616 = vpow2.f32 %v2484_v55 }
 0x511   :  { %v2124_v59 = vpop.f32.mrf.mxu2 }
 0x512   :  { %v2167_v27 = vadd.f32 %v3953_v26, %v2124_v59 }
 0x515   :  { %v2615_v50 = vpop.eup %2614 }
 0x516   :  { %v2617_v7 = vpop.eup %2616  ;;  %v2131_v60 = vadd.f32 1.0, %v2615_v50 }
 0x517   :  { %v2151_v61 = vadd.f32 1.0, %v2617_v7 }
 0x518   :  { %2618 = vrcp.f32 %v2131_v60  ;;  %v2143_v32 = vand.u32 2147483648, %v2131_v60  ;;  %v2141_v54 = vand.u32 2147483647, %v2131_v60  ;;  %vm2137_vm9 = vweird.f32 %v2131_v60 }
 0x519   :  { %2620 = vrcp.f32 %v2151_v61  ;;  %v2163_v58 = vand.u32 2147483648, %v2151_v61  ;;  %vm2157_vm13 = vweird.f32 %v2151_v61  ;;  %v2161_v48 = vand.u32 2147483647, %v2151_v61 }
 0x51a   :  { %v2144_v53 = vor.u32 1.1754944e-38, %v2143_v32  ;;  %vm2142_vm11 = vcmp.eq.f32.partialorder %v2141_v54, 8.507059e+37 }
 0x51b   :  { %v2164_v2 = vor.u32 1.1754944e-38, %v2163_v58  ;;  %vm2162_vm15 = vcmp.eq.f32.partialorder %v2161_v48, 8.507059e+37 }
 0x51e   :  { %v2619_v19 = vpop.eup %2618 }
 0x51f   :  { %v2621_v62 = vpop.eup %2620  ;;  %v2133_v34 = vmul.f32 %v2619_v19, %v2131_v60  ;;  %vm2138_vm8 = vweird.f32 %v2619_v19 }
 0x520   :  { %v2153_v0 = vmul.f32 %v2621_v62, %v2151_v61  ;;  %vm2139_vm10 = vmor %vm2137_vm9, %vm2138_vm8  ;;  %vm2158_vm12 = vweird.f32 %v2621_v62  ;;  %v4167_v61 = vld [vmem:[#allocation32_spill] sm:$0xff] }
 0x521   :  { %v2134_v13 = vsub.f32 1.0, %v2133_v34  ;;  %vm2159_vm14 = vmor %vm2157_vm13, %vm2158_vm12 }
 0x522   :  { %v2154_v47 = vsub.f32 1.0, %v2153_v0 }
 0x523   :  { %v2135_v57 = vmul.f32 %v2619_v19, %v2134_v13 }
 0x524   :  { %v2155_v52 = vmul.f32 %v2621_v62, %v2154_v47 }
 0x525   :  { %v2136_v42 = vadd.f32 %v2619_v19, %v2135_v57 }
 0x526   :  { %v2156_v21 = vadd.f32 %v2621_v62, %v2155_v52 }
 0x527   :  { %v2140_v46 = vsel %vm2139_vm10, %v2619_v19, %v2136_v42 }
 0x528   :  { %v2145_v33 = vsel %vm2142_vm11, %v2144_v53, %v2140_v46  ;;  %v2160_v11 = vsel %vm2159_vm14, %v2621_v62, %v2156_v21 }
 0x529   :  { %v2168_v44 = vmul.f32 %v2167_v27, %v2145_v33  ;;  %v2165_v56 = vsel %vm2162_vm15, %v2164_v2, %v2160_v11 }
 0x52a   :  { %v2171_v16 = vsub.f32 1.0, %v2165_v56  ;;  %v2173_v25 = vmul.f32 %v2165_v56, %v2059_v10 }
 0x52b   :  { %v2169_v35 = vadd.f32 %v2168_v44, %v4164_v41 }
 0x52d   :  { %2622 = vtanh.f32 %v2169_v35 }
 0x533   :  { %v2623_v40 = vpop.eup %2622 }
 0x534   :  { %v2172_v63 = vmul.f32 %v2623_v40, %v2171_v16 }
 0x536   :  { %v2174_v4 = vadd.f32 %v2173_v25, %v2172_v63 }
 0x538   :  { %2175 = vst.msk [vmem:[%s4050_s5 + $0x30] sm:$0xff] %vm20_vm1, %v2174_v4  ;;  %2485 = vmatmul.msk.f32.vlgmr.msrb.gmra.mxu3 %vm20_vm1, %v2174_v4  ;;  %2486 = vmatmul.msk.f32.vlgmr.msrb.gmra.mxu0 %vm20_vm1, %v2174_v4 }
 0x539   :  { %2487 = vmatmul.msk.f32.vlgmr.msra.gmra.mxu1 %vm20_vm1, %v2174_v4 }
 0x5b5   :  { %v2219_v22 = vpop.f32.mrf.mxu0 }
 0x5b6   :  { %v2262_v29 = vadd.f32 %v2219_v22, %v4165_v39  ;;  %v2239_v38 = vpop.f32.mrf.mxu1 }
 0x5b7   :  { %v2282_v49 = vadd.f32 %v3953_v26, %v2239_v38 }
 0x5b8   :  { %v2489_v1 = vmul.f32 -1.442695, %v2262_v29 }
 0x5ba   :  { %2624 = vpow2.f32 %v2489_v1 }
 0x5bb   :  { %v2199_v5 = vpop.f32.mrf.mxu3 }
 0x5bc   :  { %v2242_v24 = vadd.f32 %v2199_v5, %v4166_v17 }
 0x5be   :  { %v2488_v12 = vmul.f32 -1.442695, %v2242_v24 }
 0x5c0   :  { %v2625_v9 = vpop.eup %2624  ;;  %2626 = vpow2.f32 %v2488_v12 }
 0x5c1   :  { %v2266_v28 = vadd.f32 1.0, %v2625_v9 }
 0x5c3   :  { %2628 = vrcp.f32 %v2266_v28  ;;  %v2278_v50 = vand.u32 2147483648, %v2266_v28  ;;  %vm2272_vm6 = vweird.f32 %v2266_v28  ;;  %v2276_v60 = vand.u32 2147483647, %v2266_v28 }
 0x5c5   :  { %v2279_v34 = vor.u32 1.1754944e-38, %v2278_v50  ;;  %vm2277_vm8 = vcmp.eq.f32.partialorder %v2276_v60, 8.507059e+37 }
 0x5c6   :  { %v2627_v18 = vpop.eup %2626 }
 0x5c7   :  { %v2246_v6 = vadd.f32 1.0, %v2627_v18 }
 0x5c9   :  { %2630 = vrcp.f32 %v2246_v6  ;;  %v2629_v15 = vpop.eup %2628  ;;  %v2258_v8 = vand.u32 2147483648, %v2246_v6  ;;  %v2256_v10 = vand.u32 2147483647, %v2246_v6  ;;  %vm2252_vm2 = vweird.f32 %v2246_v6 }
 0x5ca   :  { %v2268_v23 = vmul.f32 %v2629_v15, %v2266_v28  ;;  %vm2273_vm5 = vweird.f32 %v2629_v15 }
 0x5cb   :  { %v2259_v45 = vor.u32 1.1754944e-38, %v2258_v8  ;;  %vm2257_vm4 = vcmp.eq.f32.partialorder %v2256_v10, 8.507059e+37  ;;  %vm2274_vm7 = vmor %vm2272_vm6, %vm2273_vm5 }
 0x5cc   :  { %v2269_v14 = vsub.f32 1.0, %v2268_v23 }
 0x5ce   :  { %v2270_v37 = vmul.f32 %v2629_v15, %v2269_v14 }
 0x5cf   :  { %v2631_v20 = vpop.eup %2630 }
 0x5d0   :  { %v2248_v30 = vmul.f32 %v2631_v20, %v2246_v6  ;;  %vm2253_vm0 = vweird.f32 %v2631_v20  ;;  %v2271_v31 = vadd.f32 %v2629_v15, %v2270_v37 }
 0x5d1   :  { %vm2254_vm3 = vmor %vm2252_vm2, %vm2253_vm0 }
 0x5d2   :  { %v2249_v3 = vsub.f32 1.0, %v2248_v30  ;;  %v2275_v62 = vsel %vm2274_vm7, %v2629_v15, %v2271_v31 }
 0x5d3   :  { %v2280_v0 = vsel %vm2277_vm8, %v2279_v34, %v2275_v62 }
 0x5d4   :  { %v2250_v36 = vmul.f32 %v2631_v20, %v2249_v3  ;;  %v2286_v13 = vsub.f32 1.0, %v2280_v0  ;;  %v2288_v26 = vmul.f32 %v2280_v0, %v2174_v4 }
 0x5d6   :  { %v2251_v43 = vadd.f32 %v2631_v20, %v2250_v36 }
 0x5d8   :  { %v2255_v51 = vsel %vm2254_vm3, %v2631_v20, %v2251_v43 }
 0x5d9   :  { %v2260_v55 = vsel %vm2257_vm4, %v2259_v45, %v2255_v51 }
 0x5da   :  { %v2283_v7 = vmul.f32 %v2282_v49, %v2260_v55 }
 0x5dc   :  { %v2284_v19 = vadd.f32 %v2283_v7, %v4167_v61 }
 0x5de   :  { %2632 = vtanh.f32 %v2284_v19 }
 0x5e4   :  { %v2633_v47 = vpop.eup %2632 }
 0x5e5   :  { %v2287_v32 = vmul.f32 %v2633_v47, %v2286_v13 }
 0x5e7   :  { %v2289_v57 = vadd.f32 %v2288_v26, %v2287_v32 }
 0x5e9   :  { %2290 = vst.msk [vmem:[%s4050_s5 + $0x38] sm:$0xff] %vm20_vm1, %v2289_v57 }

</bundles_post_ra>
